<compile_context>
chip_gen: v6e
topology: v6e:2x2x1
jax: 0.10.0
libtpu: 0.0.40
codegen_flags: <defaults>
</compile_context>

<pallas_src>
import functools

import jax
import jax.numpy as jnp
import numpy as np
from jax.experimental import pallas as pl
from jax.experimental.pallas import tpu as pltpu

LANE = 128      # lane width (feature padding, molecule-lane output)
TILE = 128      # atom tile size (rows and neighbor columns), MXU-sized
POSW = 8        # thin sublane/lane padding for xyz coordinates


def _round_up(x, m):
    return (x + m - 1) // m * m


# ----------------------------- Pallas kernel -------------------------------- #
def _moldyn_kernel(scal_ref,                    # SMEM (1,): bo2*std
                   pos_r_ref, pos_cT_ref,       # (TR,8) f32, (8,TC) f32
                   bid_r_ref, bid_c_ref,        # (TR,1) i32, (1,TC) i32
                   x0c_ref, x0r_ref,            # (TC,Hp) bf16, (TR,Hp) bf16
                   w1_ref, wo1_ref,             # (Hp,Hp) bf16
                   bo1_ref, wo2s_ref,           # (1,Hp) f32  (std folded into wo2s)
                   out_ref,                     # (1,1,MOLP) f32
                   acc_ref,                     # VMEM scratch (TR,Hp) f32
                   *, cutoff):
    f32, bf16 = jnp.float32, jnp.bfloat16
    c = pl.program_id(1)

    @pl.when(c == 0)
    def _init():
        acc_ref[...] = jnp.zeros_like(acc_ref)

    # --- radius_graph(pos, r=cutoff, batch, loop=True) for this (row, col) tile ---
    # Direct coordinate differences on the VPU (no Gram-expansion cancellation).
    pr = pos_r_ref[...]                                           # (TR, 8)
    pc = pos_cT_ref[...]                                          # (8, TC)
    dx = pr[:, 0:1] - pc[0:1, :]
    dy = pr[:, 1:2] - pc[1:2, :]
    dz = pr[:, 2:3] - pc[2:3, :]
    d = jnp.sqrt(dx * dx + dy * dy + dz * dz)                     # (TR, TC)
    same_mol = bid_r_ref[...] == bid_c_ref[...]                   # (TR, TC) bool
    # cosine cutoff envelope; loop=True -> self edge (d=0) has weight 1.
    env = 0.5 * (jnp.cos(d * np.float32(np.pi / cutoff)) + 1.0)
    adj = jnp.where((d < cutoff) & same_mol, env, 0.0)            # (TR, TC) f32

    # --- message accumulation over neighbor-column tiles (bf16 MXU, f32 accum) ---
    acc_ref[...] += jnp.dot(adj.astype(bf16), x0c_ref[...],
                            preferred_element_type=f32)           # (TR, Hp)

    @pl.when(c == pl.num_programs(1) - 1)
    def _finalize():
        # (adj @ x0) @ W1  ==  adj @ (x0 @ W1)
        msg = jnp.dot(acc_ref[...].astype(bf16), w1_ref[...],
                      preferred_element_type=f32)                 # (TR, Hp)
        x = x0r_ref[...].astype(f32) + jax.nn.silu(msg)           # residual (f32)

        # output_model.pre_reduce: 2-layer MLP -> per-atom scalar
        h = jax.nn.silu(jnp.dot(x.astype(bf16), wo1_ref[...],
                                preferred_element_type=f32) + bo1_ref[...])
        # wo2s = Wo2*std (row), scal[0] = bo2*std  ->  y = (h @ Wo2 + bo2) * std
        y = jnp.sum(h * wo2s_ref[...], axis=-1, keepdims=True) + scal_ref[0]  # (TR,1)

        # scatter(y, batch, reduce='add'): masked sublane reduce into a lane-dense
        # molecule row.  Ghost atoms have bid = -1 and match no lane.
        mol = jax.lax.broadcasted_iota(jnp.int32, (y.shape[0], out_ref.shape[2]), 1)
        seg = bid_r_ref[...] == mol                               # (TR, MOLP)
        out_ref[0, :, :] = jnp.sum(jnp.where(seg, y, 0.0), axis=0, keepdims=True)


# ------------------------------- wrapper ------------------------------------ #
@functools.partial(jax.jit, static_argnames=("num_mols", "cutoff"))
def moldyn_forward(z, pos, batch, emb, W1, Wo1, bo1, Wo2, bo2, std, mean,
                   *, num_mols, cutoff=5.0):
    """Returns (out, None), matching MolDynModel.forward with derivative=False."""
    f32, bf16 = jnp.float32, jnp.bfloat16
    N = pos.shape[0]
    H = emb.shape[1]
    Npad = _round_up(N, TILE)
    Hp = _round_up(H, LANE)
    MOLP = _round_up(max(int(num_mols), 1), LANE)

    # ---- XLA-side prep (fused by jit): padding, embedding gather, weight folding ----
    x0 = jnp.zeros((Npad, Hp), f32).at[:N, :H].set(emb[z].astype(f32)).astype(bf16)
    pos_pad = jnp.zeros((Npad, POSW), f32).at[:N, :3].set(pos.astype(f32))
    pos_padT = pos_pad.T                                          # thin (8, Npad)
    bid = jnp.full((Npad,), -1, jnp.int32).at[:N].set(batch.astype(jnp.int32))
    bid_col = bid[:, None]                                        # (Npad, 1)
    bid_row = bid[None, :]                                        # (1, Npad)

    std_s = jnp.asarray(std, f32).reshape(())
    W1p = jnp.zeros((Hp, Hp), f32).at[:H, :H].set(W1.astype(f32)).astype(bf16)
    Wo1p = jnp.zeros((Hp, Hp), f32).at[:H, :H].set(Wo1.astype(f32)).astype(bf16)
    bo1p = jnp.zeros((1, Hp), f32).at[:, :H].set(bo1.reshape(1, H).astype(f32))
    wo2s = jnp.zeros((1, Hp), f32).at[:, :H].set(
        (Wo2.reshape(H).astype(f32) * std_s)[None, :])
    scal = (jnp.asarray(bo2, f32).reshape(()) * std_s).reshape((1,))   # bo2*std -> SMEM

    n_r = Npad // TILE
    n_c = Npad // TILE

    in_specs = [
        pl.BlockSpec(memory_space=pltpu.MemorySpace.SMEM),              # scal
        pl.BlockSpec((TILE, POSW), lambda r, c: (r, 0)),                # pos rows
        pl.BlockSpec((POSW, TILE), lambda r, c: (0, c)),                # pos cols (thin T)
        pl.BlockSpec((TILE, 1), lambda r, c: (r, 0)),                   # mol id, rows
        pl.BlockSpec((1, TILE), lambda r, c: (0, c)),                   # mol id, cols
        pl.BlockSpec((TILE, Hp), lambda r, c: (c, 0)),                  # x0 neighbor tile
        pl.BlockSpec((TILE, Hp), lambda r, c: (r, 0)),                  # x0 residual tile
        pl.BlockSpec((Hp, Hp), lambda r, c: (0, 0)),                    # W1
        pl.BlockSpec((Hp, Hp), lambda r, c: (0, 0)),                    # Wo1
        pl.BlockSpec((1, Hp), lambda r, c: (0, 0)),                     # bo1
        pl.BlockSpec((1, Hp), lambda r, c: (0, 0)),                     # Wo2*std
    ]

    out_blocks = pl.pallas_call(
        functools.partial(_moldyn_kernel, cutoff=float(cutoff)),
        out_shape=jax.ShapeDtypeStruct((n_r, 1, MOLP), f32),
        grid=(n_r, n_c),
        in_specs=in_specs,
        out_specs=pl.BlockSpec((1, 1, MOLP), lambda r, c: (r, 0, 0)),
        scratch_shapes=[pltpu.VMEM((TILE, Hp), jnp.float32)],
        compiler_params=pltpu.CompilerParams(
            dimension_semantics=("parallel", "arbitrary"),
            vmem_limit_bytes=64 << 20),
    )(scal, pos_pad, pos_padT, bid_col, bid_row, x0, x0, W1p, Wo1p, bo1p, wo2s)

    # sum partial molecule rows over atom-row blocks, add mean, slice to (B, 1)
    out = (jnp.sum(out_blocks[:, 0, :], axis=0)[:num_mols, None]
           + jnp.asarray(mean, f32).reshape(()))
    return out, None


# --------------------------- pure-JAX reference ------------------------------ #
def moldyn_reference(z, pos, batch, num_mols, emb, W1, Wo1, bo1, Wo2, bo2,
                     std, mean, *, cutoff=5.0):
    f32, bf16 = jnp.float32, jnp.bfloat16
    x0 = emb[z].astype(bf16)
    pos = pos.astype(f32)
    dx = pos[:, None, 0] - pos[None, :, 0]
    dy = pos[:, None, 1] - pos[None, :, 1]
    dz = pos[:, None, 2] - pos[None, :, 2]
    d = jnp.sqrt(dx * dx + dy * dy + dz * dz)
    same = batch[:, None] == batch[None, :]
    env = 0.5 * (jnp.cos(d * np.float32(np.pi / cutoff)) + 1.0)
    adj = jnp.where((d < cutoff) & same, env, 0.0).astype(bf16)
    acc = jnp.dot(adj, x0, preferred_element_type=f32)
    msg = jnp.dot(acc.astype(bf16), W1.astype(bf16), preferred_element_type=f32)
    x = x0.astype(f32) + jax.nn.silu(msg)
    h = jax.nn.silu(jnp.dot(x.astype(bf16), Wo1.astype(bf16),
                            preferred_element_type=f32) + bo1.astype(f32))
    std_s = jnp.asarray(std, f32).reshape(())
    y = (jnp.sum(h * (Wo2.reshape(-1).astype(f32) * std_s)[None, :],
                 axis=-1, keepdims=True)
         + jnp.asarray(bo2, f32).reshape(()) * std_s)
    out = jax.ops.segment_sum(y, batch, num_segments=num_mols)
    return out + jnp.asarray(mean, f32).reshape(())


# --------------------------------- main -------------------------------------- #
if __name__ == "__main__":
    # 8 molecules x 25 atoms batched into one call so the message matmuls see
    # 128-row MXU tiles; hidden 64 is zero-padded to 128 lanes inside the wrapper.
    N, H, NZ, B = 200, 64, 10, 2 * 4   # atoms, hidden, atomic-number vocab, molecules
    cutoff = 5.0

    key = jax.random.PRNGKey(0)
    k_z, k_pos, k_emb, k_w1, k_wo1, k_bo1, k_wo2, k_bo2 = jax.random.split(key, 8)

    # synthetic molecular data
    z = jax.random.randint(k_z, (N,), 0, NZ)                      # atomic numbers
    pos = 3.0 * jax.random.normal(k_pos, (N, 3), jnp.float32)     # coordinates
    batch = jnp.repeat(jnp.arange(B), N // B)                     # molecule index per atom

    # deterministic synthetic parameters (MABNet-like representation + output head)
    emb = 0.1 * jax.random.normal(k_emb, (NZ, H), jnp.float32)
    W1 = 0.1 * jax.random.normal(k_w1, (H, H), jnp.float32)
    Wo1 = 0.1 * jax.random.normal(k_wo1, (H, H), jnp.float32)
    bo1 = 0.1 * jax.random.normal(k_bo1, (1, H), jnp.float32)
    Wo2 = 0.1 * jax.random.normal(k_wo2, (H, 1), jnp.float32)
    bo2 = 0.1 * jax.random.normal(k_bo2, (1, 1), jnp.float32)
    std = jnp.full((1, 1), 1.5, jnp.float32)    # registered buffer 'std'
    mean = jnp.full((1, 1), 0.25, jnp.float32)  # registered buffer 'mean'

    out, dy = moldyn_forward(z, pos, batch, emb, W1, Wo1, bo1, Wo2, bo2,
                             std, mean, num_mols=B, cutoff=cutoff)
    out = jax.block_until_ready(out)
    assert dy is None  # derivative=False path (no force prediction requested)

    ref = moldyn_reference(z, pos, batch, B, emb, W1, Wo1, bo1, Wo2, bo2,
                           std, mean, cutoff=cutoff)
    np.testing.assert_allclose(np.asarray(out), np.asarray(ref),
                               rtol=5e-3, atol=5e-3)

    print("KERNEL_OK")
</pallas_src>

<mosaic_0001>
module attributes {stable_mosaic.version = 11 : i64} {
  func.func @_moldyn_kernel(%arg0: i32, %arg1: i32, %arg2: memref<1xf32, #tpu.memory_space<smem>>, %arg3: memref<128x8xf32, #tpu.memory_space<vmem>>, %arg4: memref<8x128xf32, #tpu.memory_space<vmem>>, %arg5: memref<128x1xi32, #tpu.memory_space<vmem>>, %arg6: memref<1x128xi32, #tpu.memory_space<vmem>>, %arg7: memref<128x128xbf16, #tpu.memory_space<vmem>>, %arg8: memref<128x128xbf16, #tpu.memory_space<vmem>>, %arg9: memref<128x128xbf16, #tpu.memory_space<vmem>>, %arg10: memref<128x128xbf16, #tpu.memory_space<vmem>>, %arg11: memref<1x128xf32, #tpu.memory_space<vmem>>, %arg12: memref<1x128xf32, #tpu.memory_space<vmem>>, %arg13: memref<1x1x128xf32, #tpu.memory_space<vmem>>, %arg14: memref<128x128xf32, #tpu.memory_space<vmem>>) attributes {dimension_semantics = [#tpu.dimension_semantics<parallel>, #tpu.dimension_semantics<arbitrary>], iteration_bounds = array<i64: 2, 2>, scalar_prefetch = 0 : i64, scratch_operands = 1 : i64, tpu.core_type = #tpu.core_type<tc>, window_params = [{transform_indices = @transform_0, window_bounds = array<i64: 1>}, {transform_indices = @transform_1, window_bounds = array<i64: 128, 8>}, {transform_indices = @transform_2, window_bounds = array<i64: 8, 128>}, {transform_indices = @transform_3, window_bounds = array<i64: 128, 1>}, {transform_indices = @transform_4, window_bounds = array<i64: 1, 128>}, {transform_indices = @transform_5, window_bounds = array<i64: 128, 128>}, {transform_indices = @transform_6, window_bounds = array<i64: 128, 128>}, {pipeline_mode = #tpu.pipeline_mode<synchronous>, transform_indices = @transform_7, window_bounds = array<i64: 128, 128>}, {pipeline_mode = #tpu.pipeline_mode<synchronous>, transform_indices = @transform_8, window_bounds = array<i64: 128, 128>}, {pipeline_mode = #tpu.pipeline_mode<synchronous>, transform_indices = @transform_9, window_bounds = array<i64: 1, 128>}, {pipeline_mode = #tpu.pipeline_mode<synchronous>, transform_indices = @transform_10, window_bounds = array<i64: 1, 128>}, {transform_indices = @transform_11, window_bounds = array<i64: 1, 1, 128>}]} {
    %c0_i32 = arith.constant 0 : i32
    %0 = arith.cmpi eq, %arg1, %c0_i32 : i32
    %1 = arith.extui %0 : i1 to i32
    %c0_i32_0 = arith.constant 0 : i32
    %2 = arith.cmpi ne, %1, %c0_i32_0 : i32
    scf.if %2 {
      %cst_20 = arith.constant 0.000000e+00 : f32
      %52 = vector.broadcast %cst_20 : f32 to vector<128x128xf32>
      %c0_21 = arith.constant 0 : index
      %c0_22 = arith.constant 0 : index
      %53 = vector.load %arg14[%c0_21, %c0_22] : memref<128x128xf32, #tpu.memory_space<vmem>>, vector<128x128xf32>
      tpu.vector_store %arg14[%c0_21, %c0_22], %52 {strides = array<i32>} : memref<128x128xf32, #tpu.memory_space<vmem>>, vector<128x128xf32>,
    } else {
    }
    %c0 = arith.constant 0 : index
    %c0_1 = arith.constant 0 : index
    %3 = vector.load %arg3[%c0, %c0_1] : memref<128x8xf32, #tpu.memory_space<vmem>>, vector<128x8xf32>
    %c0_2 = arith.constant 0 : index
    %c0_3 = arith.constant 0 : index
    %4 = vector.load %arg4[%c0_2, %c0_3] : memref<8x128xf32, #tpu.memory_space<vmem>>, vector<8x128xf32>
    %5 = vector.extract_strided_slice %3 {offsets = [0, 0], sizes = [128, 1], strides = [1, 1]} : vector<128x8xf32> to vector<128x1xf32>
    %6 = vector.extract_strided_slice %4 {offsets = [0, 0], sizes = [1, 128], strides = [1, 1]} : vector<8x128xf32> to vector<1x128xf32>
    %7 = vector.broadcast %5 : vector<128x1xf32> to vector<128x128xf32>
    %8 = vector.broadcast %6 : vector<1x128xf32> to vector<128x128xf32>
    %9 = arith.subf %7, %8 : vector<128x128xf32>
    %10 = vector.extract_strided_slice %3 {offsets = [0, 1], sizes = [128, 1], strides = [1, 1]} : vector<128x8xf32> to vector<128x1xf32>
    %11 = vector.extract_strided_slice %4 {offsets = [1, 0], sizes = [1, 128], strides = [1, 1]} : vector<8x128xf32> to vector<1x128xf32>
    %12 = vector.broadcast %10 : vector<128x1xf32> to vector<128x128xf32>
    %13 = vector.broadcast %11 : vector<1x128xf32> to vector<128x128xf32>
    %14 = arith.subf %12, %13 : vector<128x128xf32>
    %15 = vector.extract_strided_slice %3 {offsets = [0, 2], sizes = [128, 1], strides = [1, 1]} : vector<128x8xf32> to vector<128x1xf32>
    %16 = vector.extract_strided_slice %4 {offsets = [2, 0], sizes = [1, 128], strides = [1, 1]} : vector<8x128xf32> to vector<1x128xf32>
    %17 = vector.broadcast %15 : vector<128x1xf32> to vector<128x128xf32>
    %18 = vector.broadcast %16 : vector<1x128xf32> to vector<128x128xf32>
    %19 = arith.subf %17, %18 : vector<128x128xf32>
    %20 = arith.mulf %9, %9 : vector<128x128xf32>
    %21 = arith.mulf %14, %14 : vector<128x128xf32>
    %22 = arith.addf %20, %21 : vector<128x128xf32>
    %23 = arith.mulf %19, %19 : vector<128x128xf32>
    %24 = arith.addf %22, %23 : vector<128x128xf32>
    %25 = math.sqrt %24 : vector<128x128xf32>
    %c0_4 = arith.constant 0 : index
    %c0_5 = arith.constant 0 : index
    %26 = vector.load %arg5[%c0_4, %c0_5] : memref<128x1xi32, #tpu.memory_space<vmem>>, vector<128x1xi32>
    %c0_6 = arith.constant 0 : index
    %c0_7 = arith.constant 0 : index
    %27 = vector.load %arg6[%c0_6, %c0_7] : memref<1x128xi32, #tpu.memory_space<vmem>>, vector<1x128xi32>
    %28 = vector.broadcast %26 : vector<128x1xi32> to vector<128x128xi32>
    %29 = vector.broadcast %27 : vector<1x128xi32> to vector<128x128xi32>
    %30 = arith.cmpi eq, %28, %29 : vector<128x128xi32>
    %cst = arith.constant 0.628318548 : f32
    %31 = vector.broadcast %cst : f32 to vector<128x128xf32>
    %32 = arith.mulf %25, %31 : vector<128x128xf32>
    %33 = math.cos %32 : vector<128x128xf32>
    %cst_8 = arith.constant 1.000000e+00 : f32
    %34 = vector.broadcast %cst_8 : f32 to vector<128x128xf32>
    %35 = arith.addf %33, %34 : vector<128x128xf32>
    %cst_9 = arith.constant 5.000000e-01 : f32
    %36 = vector.broadcast %cst_9 : f32 to vector<128x128xf32>
    %37 = arith.mulf %36, %35 : vector<128x128xf32>
    %cst_10 = arith.constant 5.000000e+00 : f32
    %38 = vector.broadcast %cst_10 : f32 to vector<128x128xf32>
    %39 = arith.cmpf olt, %25, %38 : vector<128x128xf32>
    %40 = arith.andi %39, %30 : vector<128x128xi1>
    %cst_11 = arith.constant 0.000000e+00 : f32
    %41 = vector.broadcast %cst_11 : f32 to vector<128x128xf32>
    %42 = arith.select %40, %37, %41 : vector<128x128xi1>, vector<128x128xf32>
    %c0_12 = arith.constant 0 : index
    %c0_13 = arith.constant 0 : index
    %43 = vector.load %arg14[%c0_12, %c0_13] : memref<128x128xf32, #tpu.memory_space<vmem>>, vector<128x128xf32>
    %44 = arith.truncf %42 : vector<128x128xf32> to vector<128x128xbf16>
    %c0_14 = arith.constant 0 : index
    %c0_15 = arith.constant 0 : index
    %45 = vector.load %arg7[%c0_14, %c0_15] : memref<128x128xbf16, #tpu.memory_space<vmem>>, vector<128x128xbf16>
    %cst_16 = arith.constant dense<0.000000e+00> : vector<128x128xf32>
    %46 = tpu.matmul %44, %45, %cst_16 {dimension_numbers = #tpu.dot_dimension_numbers<[1], [0], [0], [1], [0, 0, 1, 1], [], []>} : vector<128x128xbf16>, vector<128x128xbf16>, vector<128x128xf32> -> vector<128x128xf32>
    %47 = arith.addf %43, %46 : vector<128x128xf32>
    %c0_17 = arith.constant 0 : index
    %c0_18 = arith.constant 0 : index
    %48 = vector.load %arg14[%c0_17, %c0_18] : memref<128x128xf32, #tpu.memory_space<vmem>>, vector<128x128xf32>
    tpu.vector_store %arg14[%c0_17, %c0_18], %47 {strides = array<i32>} : memref<128x128xf32, #tpu.memory_space<vmem>>, vector<128x128xf32>,
    %c1_i32 = arith.constant 1 : i32
    %49 = arith.cmpi eq, %arg1, %c1_i32 : i32
    %50 = arith.extui %49 : i1 to i32
    %c0_i32_19 = arith.constant 0 : i32
    %51 = arith.cmpi ne, %50, %c0_i32_19 : i32
    scf.if %51 {
      %c0_20 = arith.constant 0 : index
      %c0_21 = arith.constant 0 : index
      %52 = vector.load %arg14[%c0_20, %c0_21] : memref<128x128xf32, #tpu.memory_space<vmem>>, vector<128x128xf32>
      %53 = arith.truncf %52 : vector<128x128xf32> to vector<128x128xbf16>
      %c0_22 = arith.constant 0 : index
      %c0_23 = arith.constant 0 : index
      %54 = vector.load %arg9[%c0_22, %c0_23] : memref<128x128xbf16, #tpu.memory_space<vmem>>, vector<128x128xbf16>
      %cst_24 = arith.constant dense<0.000000e+00> : vector<128x128xf32>
      %55 = tpu.matmul %53, %54, %cst_24 {dimension_numbers = #tpu.dot_dimension_numbers<[1], [0], [0], [1], [0, 0, 1, 1], [], []>} : vector<128x128xbf16>, vector<128x128xbf16>, vector<128x128xf32> -> vector<128x128xf32>
      %c0_25 = arith.constant 0 : index
      %c0_26 = arith.constant 0 : index
      %56 = vector.load %arg8[%c0_25, %c0_26] : memref<128x128xbf16, #tpu.memory_space<vmem>>, vector<128x128xbf16>
      %57 = arith.extf %56 : vector<128x128xbf16> to vector<128x128xf32>
      %58 = arith.negf %55 : vector<128x128xf32>
      %59 = math.exp %58 : vector<128x128xf32>
      %cst_27 = arith.constant 1.000000e+00 : f32
      %60 = vector.broadcast %cst_27 : f32 to vector<128x128xf32>
      %61 = arith.addf %60, %59 : vector<128x128xf32>
      %62 = arith.divf %60, %61 : vector<128x128xf32>
      %63 = arith.mulf %55, %62 : vector<128x128xf32>
      %64 = arith.addf %57, %63 : vector<128x128xf32>
      %65 = arith.truncf %64 : vector<128x128xf32> to vector<128x128xbf16>
      %c0_28 = arith.constant 0 : index
      %c0_29 = arith.constant 0 : index
      %66 = vector.load %arg10[%c0_28, %c0_29] : memref<128x128xbf16, #tpu.memory_space<vmem>>, vector<128x128xbf16>
      %cst_30 = arith.constant dense<0.000000e+00> : vector<128x128xf32>
      %67 = tpu.matmul %65, %66, %cst_30 {dimension_numbers = #tpu.dot_dimension_numbers<[1], [0], [0], [1], [0, 0, 1, 1], [], []>} : vector<128x128xbf16>, vector<128x128xbf16>, vector<128x128xf32> -> vector<128x128xf32>
      %c0_31 = arith.constant 0 : index
      %c0_32 = arith.constant 0 : index
      %68 = vector.load %arg11[%c0_31, %c0_32] : memref<1x128xf32, #tpu.memory_space<vmem>>, vector<1x128xf32>
      %69 = vector.broadcast %68 : vector<1x128xf32> to vector<128x128xf32>
      %70 = arith.addf %67, %69 : vector<128x128xf32>
      %71 = arith.negf %70 : vector<128x128xf32>
      %72 = math.exp %71 : vector<128x128xf32>
      %cst_33 = arith.constant 1.000000e+00 : f32
      %73 = vector.broadcast %cst_33 : f32 to vector<128x128xf32>
      %74 = arith.addf %73, %72 : vector<128x128xf32>
      %75 = arith.divf %73, %74 : vector<128x128xf32>
      %76 = arith.mulf %70, %75 : vector<128x128xf32>
      %c0_34 = arith.constant 0 : index
      %c0_35 = arith.constant 0 : index
      %77 = vector.load %arg12[%c0_34, %c0_35] : memref<1x128xf32, #tpu.memory_space<vmem>>, vector<1x128xf32>
      %78 = vector.broadcast %77 : vector<1x128xf32> to vector<128x128xf32>
      %79 = arith.mulf %76, %78 : vector<128x128xf32>
      %cst_36 = arith.constant dense<0.000000e+00> : vector<128xf32>
      %80 = vector.multi_reduction <add>, %79, %cst_36 [1] : vector<128x128xf32> to vector<128xf32>
      %81 = vector.shape_cast %80 : vector<128xf32> to vector<128x1xf32>
      %c0_37 = arith.constant 0 : index
      %82 = memref.load %arg2[%c0_37] : memref<1xf32, #tpu.memory_space<smem>>
      %83 = vector.broadcast %82 : f32 to vector<128x1xf32>
      %84 = arith.addf %81, %83 : vector<128x1xf32>
      %85 = tpu.iota {dimensions = array<i32: 1>} : vector<128x128xi32>
      %c0_38 = arith.constant 0 : index
      %c0_39 = arith.constant 0 : index
      %86 = vector.load %arg5[%c0_38, %c0_39] : memref<128x1xi32, #tpu.memory_space<vmem>>, vector<128x1xi32>
      %87 = vector.broadcast %86 : vector<128x1xi32> to vector<128x128xi32>
      %88 = arith.cmpi eq, %87, %85 : vector<128x128xi32>
      %cst_40 = arith.constant 0.000000e+00 : f32
      %89 = vector.shape_cast %84 : vector<128x1xf32> to vector<128x1xf32>
      %90 = vector.broadcast %89 : vector<128x1xf32> to vector<128x128xf32>
      %91 = vector.broadcast %cst_40 : f32 to vector<128x128xf32>
      %92 = arith.select %88, %90, %91 : vector<128x128xi1>, vector<128x128xf32>
      %cst_41 = arith.constant dense<0.000000e+00> : vector<128xf32>
      %93 = vector.multi_reduction <add>, %92, %cst_41 [0] : vector<128x128xf32> to vector<128xf32>
      %94 = vector.shape_cast %93 : vector<128xf32> to vector<1x128xf32>
      %c0_42 = arith.constant 0 : index
      %c0_43 = arith.constant 0 : index
      %c0_44 = arith.constant 0 : index
      %95 = vector.load %arg13[%c0_42, %c0_43, %c0_44] : memref<1x1x128xf32, #tpu.memory_space<vmem>>, vector<1x1x128xf32>
      %96 = vector.shape_cast %95 : vector<1x1x128xf32> to vector<1x128xf32>
      %97 = vector.shape_cast %94 : vector<1x128xf32> to vector<1x1x128xf32>
      tpu.vector_store %arg13[%c0_42, %c0_43, %c0_44], %97 {strides = array<i32>} : memref<1x1x128xf32, #tpu.memory_space<vmem>>, vector<1x1x128xf32>,
    } else {
    }
    return
  }
  func.func @transform_0(%arg0: i32, %arg1: i32) -> i32 {
    %c0_i32 = arith.constant 0 : i32
    %c0_i32_0 = arith.constant 0 : i32
    return %c0_i32 : i32
  }
  func.func @transform_1(%arg0: i32, %arg1: i32) -> (i32, i32) {
    %c0_i32 = arith.constant 0 : i32
    %c0_i32_0 = arith.constant 0 : i32
    return %arg0, %c0_i32 : i32, i32
  }
  func.func @transform_2(%arg0: i32, %arg1: i32) -> (i32, i32) {
    %c0_i32 = arith.constant 0 : i32
    %c0_i32_0 = arith.constant 0 : i32
    return %c0_i32, %arg1 : i32, i32
  }
  func.func @transform_3(%arg0: i32, %arg1: i32) -> (i32, i32) {
    %c0_i32 = arith.constant 0 : i32
    %c0_i32_0 = arith.constant 0 : i32
    return %arg0, %c0_i32 : i32, i32
  }
  func.func @transform_4(%arg0: i32, %arg1: i32) -> (i32, i32) {
    %c0_i32 = arith.constant 0 : i32
    %c0_i32_0 = arith.constant 0 : i32
    return %c0_i32, %arg1 : i32, i32
  }
  func.func @transform_5(%arg0: i32, %arg1: i32) -> (i32, i32) {
    %c0_i32 = arith.constant 0 : i32
    %c0_i32_0 = arith.constant 0 : i32
    return %arg1, %c0_i32 : i32, i32
  }
  func.func @transform_6(%arg0: i32, %arg1: i32) -> (i32, i32) {
    %c0_i32 = arith.constant 0 : i32
    %c0_i32_0 = arith.constant 0 : i32
    return %arg0, %c0_i32 : i32, i32
  }
  func.func @transform_7(%arg0: i32, %arg1: i32) -> (i32, i32) {
    %c0_i32 = arith.constant 0 : i32
    %c0_i32_0 = arith.constant 0 : i32
    %c0_i32_1 = arith.constant 0 : i32
    return %c0_i32, %c0_i32_0 : i32, i32
  }
  func.func @transform_8(%arg0: i32, %arg1: i32) -> (i32, i32) {
    %c0_i32 = arith.constant 0 : i32
    %c0_i32_0 = arith.constant 0 : i32
    %c0_i32_1 = arith.constant 0 : i32
    return %c0_i32, %c0_i32_0 : i32, i32
  }
  func.func @transform_9(%arg0: i32, %arg1: i32) -> (i32, i32) {
    %c0_i32 = arith.constant 0 : i32
    %c0_i32_0 = arith.constant 0 : i32
    %c0_i32_1 = arith.constant 0 : i32
    return %c0_i32, %c0_i32_0 : i32, i32
  }
  func.func @transform_10(%arg0: i32, %arg1: i32) -> (i32, i32) {
    %c0_i32 = arith.constant 0 : i32
    %c0_i32_0 = arith.constant 0 : i32
    %c0_i32_1 = arith.constant 0 : i32
    return %c0_i32, %c0_i32_0 : i32, i32
  }
  func.func @transform_11(%arg0: i32, %arg1: i32) -> (i32, i32, i32) {
    %c0_i32 = arith.constant 0 : i32
    %c0_i32_0 = arith.constant 0 : i32
    %c0_i32_1 = arith.constant 0 : i32
    return %arg0, %c0_i32, %c0_i32_0 : i32, i32, i32
  }
}

</mosaic_0001>

<bundles_post_ra>
// kernel: moldyn_forward.1
= control target key start
LH: loop header
LB: loop body
LE: loop exit
PB: predicated region body
PF: predicated region fallthrough
CT: control target
= control target key end

     0   :  { %s4844_s19 = smov 0   ;;  %s4846_s20 = smov 0   ;;  %s7394_s0 = inlined_call_operand.<no memory space> [shape: f32[1], index: 0, kind: input, shape index: {}]   ;;  %s7395_s1 = inlined_call_operand.vmem [shape: f32[256,8], index: 1, kind: input, shape index: {}]   ;;  %s7396_s2 = inlined_call_operand.vmem [shape: f32[8,256], index: 2, kind: input, shape index: {}]   ;;  %s7397_s3 = inlined_call_operand.vmem [shape: s32[256,1], index: 3, kind: input, shape index: {}]   ;;  %s7398_s4 = inlined_call_operand.vmem [shape: s32[1,256], index: 4, kind: input, shape index: {}]   ;;  %s7399_s5 = inlined_call_operand.vmem [shape: bf16[256,128], index: 5, kind: input, shape index: {}, may-alias: {5,6}]   ;;  %s7400_s6 = inlined_call_operand.vmem [shape: bf16[256,128], index: 6, kind: input, shape index: {}, may-alias: {5,6}]   ;;  %s7401_s7 = inlined_call_operand.vmem [shape: bf16[128,128], index: 7, kind: input, shape index: {}]   ;;  %s7402_s8 = inlined_call_operand.vmem [shape: bf16[128,128], index: 8, kind: input, shape index: {}]   ;;  %s7403_s9 = inlined_call_operand.vmem [shape: f32[1,128], index: 9, kind: input, shape index: {}]   ;;  %s7404_s10 = inlined_call_operand.vmem [shape: f32[1,128], index: 10, kind: input, shape index: {}]   ;;  %s7405_s11 = inlined_call_operand.vmem [shape: f32[2,1,128], index: 11, kind: output, shape index: {}]  }
   0x1   :  { %7548 = sst [smem:[#allocation61_spill]] %s7398_s4  ;;  %s4848_s21 = smov 0  }
   0x2   :  { %16 = sst [smem:[#allocation3]] %s7394_s0  ;;  %s4850_s22 = smov 0  }
   0x3   :  { %s4852_s23 = smov 0  }
   0x4 LB: > { %7549 = sst [smem:[#allocation4_spill]] %s4760_s21  ;;  %s31_s0 = sadd.s32 1, %s4760_s21  ;;  %s4768_s23 = sphi %s4852_s23, %s22_s23   ;;  %s4764_s22 = sphi %s4850_s22, %s7856_s22   ;;  %s4760_s21 = sphi %s4848_s21, %s7855_s21   ;;  %s4756_s20 = sphi %s4846_s20, %s7854_s20   ;;  %s4752_s19 = sphi %s4844_s19, %s7853_s19  }
   0x5   : > { %7550 = sst [smem:[#allocation5_spill]] %s4764_s22  ;;  %s34_s24 = sadd.s32 1, %s4764_s22 }
   0x6   : > { %p32_p0 = scmp.ge.s32.totalorder %s31_s0, 2  ;;  %p3988_p1 = scmp.ge.s32.totalorder %s4768_s23, 1 }
   0x7   : > { %p401_p2 = scmp.lt.s32.totalorder %s4768_s23, 5 }
   0x8   : > { %s7858_s0 = smov (%p32_p0, %s31_s0), 0  ;;  %s7860_s24 = smov (!%p32_p0, %s34_s24), %s4764_s22 }
   0x9   : > { %7551 = sst [smem:[#allocation6_spill]] %s7858_s0  ;;  %p402_p3 = pnand %p3988_p1, %p401_p2 }
   0xa   : > { %p36_p4 = scmp.ge.s32.totalorder %s7860_s24, 2 }
   0xb   : > { %405 = sbr.rel (%p402_p3) target bundleno = 1630 (0x65e), region = 64 }
   0xc   : > { %s7862_s24 = smov (%p36_p4, %s7860_s24), 0 }
   0xd   : > { %7552 = sst [smem:[#allocation7_spill]] %s7862_s24 }
  0x10   : > { %s3989_s25 = sshll.u32 %s4756_s20, 4  ;;  %p467_p5 = scmp.lt.s32.totalorder %s4752_s19, 1 }
  0x11   : > { %p462_p6 = scmp.lt.s32.totalorder %s3989_s25, 31  ;;  %s3994_s26 = sshll.u32 %s4752_s19, 4 }
  0x12   : > { %s468_s27 = scalar_select %p467_p5, %s4752_s19, 1 }
  0x13   : > { %s7864_s25 = smov (!%p462_p6, %s3989_s25), 31  ;;  %s7553_s4 = sld [smem:[#allocation61_spill]] }
  0x14   : > { %s3991_s28 = sshll.u32 %s468_s27, 3  ;;  %s3990_s13 = sshll.u32 %s7864_s25, 3 }
  0x15   : > { %s4890_s16 = scalar_lea.vmem %s7396_s2, %s3991_s28  ;;  %s4895_s24 = scalar_lea.vmem %s7395_s1, %s3990_s13 }
  0x16   : > { %s4900_s21 = scalar_lea.vmem %s7397_s3, %s3990_s13  ;;  %p481_p7 = scmp.lt.s32.totalorder %s3994_s26, 31 }
  0x17   : > { %s3997_s29 = sshll.u32 %s7864_s25, 2  ;;  %p492_p8 = scmp.lt.s32.totalorder %s4756_s20, 1 }
  0x18   : > { %s7866_s26 = smov (!%p481_p7, %s3994_s26), 31  ;;  %p3998_p9 = scmp.ne.s32.totalorder %s4752_s19, 0 }
  0x19   : > { %s4885_s12 = scalar_lea.vmem %s7553_s4, %s468_s27  ;;  %s4905_s4 = scalar_lea.vmem %s7400_s6, %s3997_s29 }
  0x1a   : > { %s7868_s20 = smov (!%p492_p8, %s4756_s20), 1  ;;  %s3995_s28 = sshll.u32 %s7866_s26, 2 }
  0x1b   : > { %s4914_s17 = scalar_lea.vmem %s7399_s5, %s3995_s28  ;;  %s494_s25 = scalar_lea.vmem %s7405_s11, %s7868_s20 }
  0x1c   : > { %499 = sbr.rel (%p3998_p9) target bundleno = 42 (0x2a), region = 68 }
  0x21   : > { %v4770_v0 = vmov 0.0  }
  0x22   : > { %500 = vst [vmem:[#allocation2 + $0x30] sm:$0xff] %v4770_v0  ;;  %501 = vst [vmem:[#allocation2] sm:$0xff] %v4770_v0 }
  0x23   : > { %502 = vst [vmem:[#allocation2 + $0x58] sm:$0xff] %v4770_v0  ;;  %503 = vst [vmem:[#allocation2 + $0x18] sm:$0xff] %v4770_v0 }
  0x24   : > { %504 = vst [vmem:[#allocation2 + $0x50] sm:$0xff] %v4770_v0  ;;  %505 = vst [vmem:[#allocation2 + $0x68] sm:$0xff] %v4770_v0 }
  0x25   : > { %506 = vst [vmem:[#allocation2 + $0x8] sm:$0xff] %v4770_v0  ;;  %507 = vst [vmem:[#allocation2 + $0x48] sm:$0xff] %v4770_v0 }
  0x26   : > { %508 = vst [vmem:[#allocation2 + $0x40] sm:$0xff] %v4770_v0  ;;  %509 = vst [vmem:[#allocation2 + $0x20] sm:$0xff] %v4770_v0 }
  0x27   : > { %510 = vst [vmem:[#allocation2 + $0x10] sm:$0xff] %v4770_v0  ;;  %511 = vst [vmem:[#allocation2 + $0x38] sm:$0xff] %v4770_v0 }
  0x28   : > { %512 = vst [vmem:[#allocation2 + $0x60] sm:$0xff] %v4770_v0  ;;  %513 = vst [vmem:[#allocation2 + $0x70] sm:$0xff] %v4770_v0 }
  0x29   : > { %514 = vst [vmem:[#allocation2 + $0x78] sm:$0xff] %v4770_v0  ;;  %515 = vst [vmem:[#allocation2 + $0x28] sm:$0xff] %v4770_v0 }
  0x2a PF: > { %v524_v1 = vld [vmem:[%s4895_s24 + $0x40] sm:$0xff]  ;;  %v4771_v3 = vmov 0   ;;  %v525_v4 = vld [vmem:[%s4895_s24 + $0x48] sm:$0xff]  ;;  %v519_v6 = vld [vmem:[%s4895_s24 + $0x18] sm:$0xff]  ;;  %v4772_v7 = vmov 1   ;;  %v4773_v15 = vmov 2   ;;  %v7408_v27 = vlaneseq }
  0x2b   : > { %v516_v2 = vld [vmem:[%s4895_s24] sm:$0xff]  ;;  %4464 = vset.pattern.permute.xlu1 %v4771_v3  ;;  %4463 = vset.pattern.permute.xlu0 %v4771_v3  ;;  %v517_v5 = vld [vmem:[%s4895_s24 + $0x8] sm:$0xff]  ;;  %v518_v10 = vld [vmem:[%s4895_s24 + $0x10] sm:$0xff]  ;;  %p4096_p10 = scmp.ne.s32.totalorder %s4752_s19, 1 }
  0x2c   : > { %575 = vperm.xlu1 %4464, %v524_v1   ;;  %535 = vperm.xlu0 %4463, %v516_v2   ;;  %v520_v8 = vld [vmem:[%s4895_s24 + $0x20] sm:$0xff]  ;;  %v529_v9 = vld [vmem:[%s4895_s24 + $0x68] sm:$0xff]  ;;  %v4934_v11 = vld [vmem:[%s4895_s24 + $0x30] sm:$0xff]  ;;  %v614_v29 = vshrl.u32 %v7408_v27, 7  ;;  %s3731_s13 = sld [smem:[#allocation3]] (!%p4096_p10) }
  0x2d   : > { %v526_v12 = vld [vmem:[%s4895_s24 + $0x50] sm:$0xff]  ;;  %v531_v13 = vld [vmem:[%s4895_s24 + $0x78] sm:$0xff]  ;;  %v521_v16 = vld [vmem:[%s4895_s24 + $0x28] sm:$0xff] }
  0x2e   : > { %v527_v14 = vld [vmem:[%s4895_s24 + $0x58] sm:$0xff]  ;;  %v528_v18 = vld [vmem:[%s4895_s24 + $0x60] sm:$0xff]  ;;  %v994_v19 = vld [vmem:[%s4900_s21 + $0x8] sm:$0xff]  ;;  %v615_v30 = vsub.s32 0, %v614_v29  ;;  %v699_v35 = vsub.s32 1, %v614_v29 }
  0x2f   : > { %v523_v17 = vld [vmem:[%s4895_s24 + $0x38] sm:$0xff]  ;;  %v530_v20 = vld [vmem:[%s4895_s24 + $0x70] sm:$0xff]  ;;  %v997_v23 = vld [vmem:[%s4900_s21 + $0x20] sm:$0xff] }
  0x30   : > { %580 = vperm.xlu1 %4464, %v525_v4   ;;  %540 = vperm.xlu0 %4463, %v517_v5   ;;  %v995_v21 = vld [vmem:[%s4900_s21 + $0x10] sm:$0xff]  ;;  %v1005_v24 = vld [vmem:[%s4900_s21 + $0x60] sm:$0xff]  ;;  %v1002_v39 = vld [vmem:[%s4900_s21 + $0x48] sm:$0xff] }
  0x31   : > { %v1003_v22 = vld [vmem:[%s4900_s21 + $0x50] sm:$0xff]  ;;  %v993_v28 = vld [vmem:[%s4900_s21] sm:$0xff]  ;;  %v996_v43 = vld [vmem:[%s4900_s21 + $0x18] sm:$0xff] }
  0x32   : > { %v999_v25 = vld [vmem:[%s4900_s21 + $0x30] sm:$0xff]  ;;  %v1001_v33 = vld [vmem:[%s4900_s21 + $0x40] sm:$0xff]  ;;  %v1004_v49 = vld [vmem:[%s4900_s21 + $0x58] sm:$0xff] }
  0x33   : > { %v1007_v26 = vld [vmem:[%s4900_s21 + $0x70] sm:$0xff]  ;;  %v532_v34 = vld [vmem:[%s4890_s16] sm:$0xff]  ;;  %v998_v53 = vld [vmem:[%s4900_s21 + $0x28] sm:$0xff] }
  0x34   : > { %4465 = vset.pattern.permute.xlu1 %v4772_v7  ;;  %550 = vperm.xlu0 %4463, %v519_v6   ;;  %v4967_v36 = vrot.slane %v532_v34, %v615_v30  ;;  %v4973_v41 = vrot.slane %v532_v34, %v699_v35  ;;  %v1006_v56 = vld [vmem:[%s4900_s21 + $0x68] sm:$0xff]  ;;  %v1000_v60 = vld [vmem:[%s4900_s21 + $0x38] sm:$0xff] }
  0x35   : > { %638 = vperm.xlu1 %4465, %v517_v5   ;;  %v1008_v63 = vld [vmem:[%s4900_s21 + $0x78] sm:$0xff] }
  0x38   : > { %555 = vperm.xlu0 %4463, %v520_v8  }
  0x39   : > { %666 = vperm.xlu1 %4465, %v524_v1  }
  0x3c   : > { %600 = vperm.xlu0 %4463, %v529_v9  }
  0x3d   : > { %4466 = vset.pattern.permute.xlu1 %v4771_v3 }
  0x3e   : > { %545 = vperm.xlu1 %4466, %v518_v10  }
  0x40   : > { %565 = vperm.xlu0 %4463, %v4934_v11  }
  0x42   : > { %585 = vperm.xlu1 %4466, %v526_v12  }
  0x44   : > { %610 = vperm.xlu0 %4463, %v531_v13  }
  0x46   : > { %590 = vperm.xlu1 %4466, %v527_v14  }
  0x48   : > { %4472 = vset.pattern.permute.xlu0 %v4772_v7 }
  0x49   : > { %634 = vperm.xlu0 %4472, %v516_v2  }
  0x4a   : > { %4467 = vset.pattern.permute.xlu1 %v4772_v7 }
  0x4b   : > { %646 = vperm.xlu1 %4467, %v519_v6  }
  0x4d   : > { %670 = vperm.xlu0 %4472, %v525_v4  }
  0x4f   : > { %674 = vperm.xlu1 %4467, %v526_v12  }
  0x51   : > { %642 = vperm.xlu0 %4472, %v518_v10  }
  0x53   : > { %4468 = vset.pattern.permute.xlu1 %v4773_v15 }
  0x54   : > { %718 = vperm.xlu1 %4468, %v516_v2  }
  0x55   : > { %678 = vperm.xlu0 %4472, %v527_v14  }
  0x58   : > { %750 = vperm.xlu1 %4468, %v524_v1  }
  0x59   : > { %654 = vperm.xlu0 %4472, %v521_v16  }
  0x5c   : > { %754 = vperm.xlu1 %4468, %v525_v4  }
  0x5d   : > { %662 = vperm.xlu0 %4472, %v523_v17  }
  0x60   : > { %730 = vperm.xlu1 %4468, %v519_v6  }
  0x61   : > { %4474 = vset.pattern.permute.xlu0 %v4773_v15 }
  0x62   : > { %722 = vperm.xlu0 %4474, %v517_v5  }
  0x64   : > { %762 = vperm.xlu1 %4468, %v527_v14  }
  0x66   : > { %726 = vperm.xlu0 %4474, %v518_v10  }
  0x68   : > { %4469 = vset.pattern.permute.xlu1 %v4771_v3 }
  0x69   : > { %560 = vperm.xlu1 %4469, %v521_v16  }
  0x6a   : > { %758 = vperm.xlu0 %4474, %v526_v12  }
  0x6d   : > { %595 = vperm.xlu1 %4469, %v528_v18  }
  0x6e   : > { %734 = vperm.xlu0 %4474, %v520_v8  }
  0x71   : > { %4470 = vset.pattern.permute.xlu1 %v4772_v7 }
  0x72   : > { %650 = vperm.xlu1 %4470, %v520_v8   ;;  %770 = vperm.xlu0 %4474, %v529_v9  }
  0x76   : > { %682 = vperm.xlu1 %4470, %v528_v18   ;;  %746 = vperm.xlu0 %4474, %v523_v17  }
  0x7a   : > { %686 = vperm.xlu1 %4470, %v529_v9   ;;  %778 = vperm.xlu0 %4474, %v531_v13  }
  0x7e   : > { %4471 = vset.pattern.permute.xlu1 %v4771_v3  ;;  %4477 = vset.pattern.permute.xlu0 %v4771_v3 }
  0x7f   : > { %570 = vperm.xlu1 %4471, %v523_v17   ;;  %1014 = vperm.xlu0 %4477, %v994_v19  }
  0x83   : > { %605 = vperm.xlu1 %4471, %v530_v20   ;;  %1017 = vperm.xlu0 %4477, %v995_v21  }
  0x87   : > { %4473 = vset.pattern.permute.xlu1 %v4772_v7  ;;  %1041 = vperm.xlu0 %4477, %v1003_v22   ;;  %v783_v7 = vsub.s32 2, %v614_v29 }
  0x88   : > { %658 = vperm.xlu1 %4473, %v4934_v11  }
  0x89   : > { %v5003_v14 = vrot.slane %v532_v34, %v783_v7 }
  0x8b   : > { %1023 = vperm.xlu0 %4477, %v997_v23  }
  0x8c   : > { %690 = vperm.xlu1 %4473, %v530_v20  }
  0x8f   : > { %1047 = vperm.xlu0 %4477, %v1005_v24  }
  0x90   : > { %694 = vperm.xlu1 %4473, %v531_v13  }
  0x93   : > { %1029 = vperm.xlu0 %4477, %v999_v25  }
  0x94   : > { %4475 = vset.pattern.permute.xlu1 %v4773_v15 }
  0x95   : > { %738 = vperm.xlu1 %4475, %v521_v16  }
  0x97   : > { %1053 = vperm.xlu0 %4477, %v1007_v26  }
  0x99   : > { %766 = vperm.xlu1 %4475, %v528_v18  }
  0x9d   : > { %742 = vperm.xlu1 %4475, %v4934_v11  }
  0xa1   : > { %774 = vperm.xlu1 %4475, %v530_v20  }
  0xa5   : > { %4476 = vset.pattern.permute.xlu1 %v4771_v3 }
  0xa6   : > { %1011 = vperm.xlu1 %4476, %v993_v28  }
  0xa7   : > { %v4963_v31 = vpop.permute.xlu1 %575  ;;  %v536_v32 = vpop.permute.xlu0 %535 }
  0xa8   : > { %v617_v4 = vsub.f32 %v536_v32, %v4967_v36 }
  0xaa   : > { %1035 = vperm.xlu1 %4476, %v1001_v33   ;;  %v801_v11 = vmul.f32 %v617_v4, %v617_v4 }
  0xab   : > { %v4969_v37 = vpop.permute.xlu1 %580  ;;  %v541_v38 = vpop.permute.xlu0 %540 }
  0xac   : > { %v618_v40 = vsub.f32 %v541_v38, %v4967_v36 }
  0xae   : > { %1038 = vperm.xlu1 %4476, %v1002_v39   ;;  %v802_v45 = vmul.f32 %v618_v40, %v618_v40 }
  0xaf   : > { %v551_v42 = vpop.permute.xlu0 %550 }
  0xb0   : > { %v639_v44 = vpop.permute.xlu1 %638  ;;  %v620_v62 = vsub.f32 %v551_v42, %v4967_v36 }
  0xb1   : > { %v702_v46 = vsub.f32 %v639_v44, %v4973_v41 }
  0xb2   : > { %1020 = vperm.xlu1 %4476, %v996_v43   ;;  %v804_v2 = vmul.f32 %v620_v62, %v620_v62 }
  0xb3   : > { %v818_v47 = vmul.f32 %v702_v46, %v702_v46  ;;  %v4977_v48 = vpop.permute.xlu0 %555 }
  0xb4   : > { %v4980_v50 = vpop.permute.xlu1 %666 }
  0xb5   : > { %v4982_v51 = vadd.f32 %v818_v47, %v802_v45 }
  0xb6   : > { %1044 = vperm.xlu1 %4476, %v1004_v49  }
  0xb7   : > { %v4984_v52 = vpop.permute.xlu0 %600 }
  0xb9   : > { %v546_v54 = vpop.permute.xlu1 %545 }
  0xba   : > { %1026 = vperm.xlu1 %4476, %v998_v53   ;;  %v619_v30 = vsub.f32 %v546_v54, %v4967_v36 }
  0xbb   : > { %v566_v55 = vpop.permute.xlu0 %565 }
  0xbc   : > { %v4989_v57 = vsub.f32 %v566_v55, %v4967_v36  ;;  %v803_v40 = vmul.f32 %v619_v30, %v619_v30 }
  0xbd   : > { %v586_v58 = vpop.permute.xlu1 %585 }
  0xbe   : > { %1050 = vperm.xlu1 %4476, %v1006_v56   ;;  %v627_v42 = vsub.f32 %v586_v58, %v4967_v36  ;;  %v5068_v30 = vmul.f32 %v4989_v57, %v4989_v57 }
  0xbf   : > { %v4991_v59 = vpop.permute.xlu0 %610 }
  0xc0   : > { %v811_v53 = vmul.f32 %v627_v42, %v627_v42 }
  0xc1   : > { %v4994_v61 = vpop.permute.xlu1 %590 }
  0xc2   : > { %1032 = vperm.xlu1 %4476, %v1000_v60  }
  0xc4   : > { %v635_v0 = vpop.permute.xlu0 %634 }
  0xc5   : > { %v701_v5 = vsub.f32 %v635_v0, %v4973_v41  ;;  %v621_v0 = vsub.f32 %v4977_v48, %v4967_v36  ;;  %v626_v48 = vsub.f32 %v4969_v37, %v4967_v36 }
  0xc6   : > { %v647_v1 = vpop.permute.xlu1 %646  ;;  %1056 = vperm.xlu1 %4476, %v1008_v63  }
  0xc7   : > { %v704_v3 = vsub.f32 %v647_v1, %v4973_v41  ;;  %v817_v12 = vmul.f32 %v701_v5, %v701_v5  ;;  %v625_v5 = vsub.f32 %v4963_v31, %v4967_v36  ;;  %v805_v7 = vmul.f32 %v621_v0, %v621_v0 }
  0xc8   : > { %v5001_v6 = vpop.permute.xlu0 %670 }
  0xc9   : > { %v820_v8 = vmul.f32 %v704_v3, %v704_v3  ;;  %v833_v16 = vadd.f32 %v817_v12, %v801_v11  ;;  %v632_v12 = vsub.f32 %v4991_v59, %v4967_v36  ;;  %v809_v31 = vmul.f32 %v625_v5, %v625_v5 }
  0xca   : > { %v675_v9 = vpop.permute.xlu1 %674 }
  0xcb   : > { %v836_v10 = vadd.f32 %v820_v8, %v804_v2  ;;  %v711_v34 = vsub.f32 %v675_v9, %v4973_v41  ;;  %v709_v2 = vsub.f32 %v4980_v50, %v4973_v41  ;;  %v630_v50 = vsub.f32 %v4984_v52, %v4967_v36 }
  0xcc   : > { %v643_v13 = vpop.permute.xlu0 %642 }
  0xcd   : > { %v703_v26 = vsub.f32 %v643_v13, %v4973_v41  ;;  %v827_v44 = vmul.f32 %v711_v34, %v711_v34  ;;  %v5064_v59 = vmul.f32 %v630_v50, %v630_v50 }
  0xcf   : > { %v719_v15 = vpop.permute.xlu1 %718  ;;  %v819_v35 = vmul.f32 %v703_v26, %v703_v26  ;;  %v843_v56 = vadd.f32 %v827_v44, %v811_v53  ;;  %v810_v26 = vmul.f32 %v626_v48, %v626_v48 }
  0xd0   : > { %v785_v17 = vsub.f32 %v719_v15, %v5003_v14  ;;  %v679_v18 = vpop.permute.xlu0 %678 }
  0xd1   : > { %v835_v45 = vadd.f32 %v819_v35, %v803_v40  ;;  %v712_v37 = vsub.f32 %v679_v18, %v4973_v41 }
  0xd2   : > { %v849_v19 = vmul.f32 %v785_v17, %v785_v17  ;;  %v710_v17 = vsub.f32 %v5001_v6, %v4973_v41 }
  0xd3   : > { %v5006_v20 = vpop.permute.xlu1 %750  ;;  %v828_v34 = vmul.f32 %v712_v37, %v712_v37 }
  0xd4   : > { %v5008_v21 = vadd.f32 %v849_v19, %v833_v16  ;;  %v5010_v22 = vpop.permute.xlu0 %654  ;;  %v628_v16 = vsub.f32 %v4994_v61, %v4967_v36  ;;  %v793_v61 = vsub.f32 %v5006_v20, %v5003_v14  ;;  %v826_v18 = vmul.f32 %v710_v17, %v710_v17 }
  0xd5   : > { %v706_v57 = vsub.f32 %v5010_v22, %v4973_v41 }
  0xd6   : > { %7554 = vst [vmem:[#allocation8_spill] sm:$0xff] %v5008_v21  ;;  %v812_v6 = vmul.f32 %v628_v16, %v628_v16  ;;  %v857_v20 = vmul.f32 %v793_v61, %v793_v61 }
  0xd7   : > { %v5012_v23 = vpop.permute.xlu1 %754  ;;  %v5112_v16 = vmul.f32 %v706_v57, %v706_v57 }
  0xd8   : > { %v5014_v24 = vpop.permute.xlu0 %662  ;;  %v844_v50 = vadd.f32 %v828_v34, %v812_v6 }
  0xdb   : > { %v731_v25 = vpop.permute.xlu1 %730 }
  0xdc   : > { %v788_v28 = vsub.f32 %v731_v25, %v5003_v14 }
  0xdd   : > { %v5018_v29 = vpop.permute.xlu0 %722 }
  0xde   : > { %v852_v32 = vmul.f32 %v788_v28, %v788_v28  ;;  %v786_v48 = vsub.f32 %v5018_v29, %v5003_v14 }
  0xdf   : > { %v5021_v33 = vpop.permute.xlu1 %762 }
  0xe0   : > { %v5024_v38 = vadd.f32 %v852_v32, %v836_v10  ;;  %v825_v10 = vmul.f32 %v709_v2, %v709_v2  ;;  %v5070_v32 = vmul.f32 %v632_v12, %v632_v12  ;;  %v5123_v61 = vmul.f32 %v786_v48, %v786_v48 }
  0xe1   : > { %v727_v39 = vpop.permute.xlu0 %726 }
  0xe2   : > { %v787_v43 = vsub.f32 %v727_v39, %v5003_v14  ;;  %v841_v52 = vadd.f32 %v825_v10, %v809_v31  ;;  %v708_v39 = vsub.f32 %v5014_v24, %v4973_v41  ;;  %vm904_vm4 = vcmp.eq.f32.partialorder %v5024_v38, inf }
  0xe3   : > { %vm906_vm6 = vcmp.eq.f32.partialorder %v5024_v38, 0.0  ;;  %v907_v57 = vand.u32 2147483648, %v5024_v38 }
  0xe4   : > { %v851_v46 = vmul.f32 %v787_v43, %v787_v43  ;;  %v5028_v47 = vpop.permute.xlu1 %560 }
  0xe5   : > { %v759_v49 = vpop.permute.xlu0 %758 }
  0xe6   : > { %v867_v54 = vadd.f32 %v851_v46, %v835_v45  ;;  %v795_v55 = vsub.f32 %v759_v49, %v5003_v14  ;;  %v796_v46 = vsub.f32 %v5021_v33, %v5003_v14 }
  0xe8   : > { %4486 = vrsqrt.f32 %v867_v54  ;;  %v859_v60 = vmul.f32 %v795_v55, %v795_v55  ;;  %v5031_v62 = vpop.permute.xlu1 %595  ;;  %vm897_vm0 = vcmp.eq.f32.partialorder %v867_v54, inf  ;;  %v900_v42 = vand.u32 2147483648, %v867_v54 }
  0xe9   : > { %v735_v58 = vpop.permute.xlu0 %734  ;;  %vm899_vm1 = vcmp.eq.f32.partialorder %v867_v54, 0.0  ;;  %v794_v55 = vsub.f32 %v5012_v23, %v5003_v14  ;;  %v860_v5 = vmul.f32 %v796_v46, %v796_v46 }
  0xea   : > { %v5033_v63 = vadd.f32 %v859_v60, %v843_v56  ;;  %v789_v1 = vsub.f32 %v735_v58, %v5003_v14 }
  0xeb   : > { %v5117_v29 = vadd.f32 %v860_v5, %v844_v50 }
  0xec   : > { %4488 = vrsqrt.f32 %v5033_v63  ;;  %v853_v8 = vmul.f32 %v789_v1, %v789_v1  ;;  %vm953_vm2 = vcmp.eq.f32.partialorder %v5033_v63, inf  ;;  %vm955_vm3 = vcmp.eq.f32.partialorder %v5033_v63, 0.0 }
  0xed   : > { %v651_v3 = vpop.permute.xlu1 %650  ;;  %4490 = vrsqrt.f32 %v5024_v38  ;;  %v5053_v15 = vpop.permute.xlu0 %770  ;;  %v956_v33 = vand.u32 2147483648, %v5033_v63 }
  0xee   : > { %v705_v4 = vsub.f32 %v651_v3, %v4973_v41  ;;  %v842_v3 = vadd.f32 %v826_v18, %v810_v26 }
  0xf0   : > { %v821_v9 = vmul.f32 %v705_v4, %v705_v4  ;;  %v5097_v4 = vadd.f32 %v857_v20, %v841_v52 }
  0xf1   : > { %v5047_v11 = vpop.permute.xlu1 %682  ;;  %v747_v40 = vpop.permute.xlu0 %746 }
  0xf2   : > { %v837_v13 = vadd.f32 %v821_v9, %v805_v7  ;;  %v792_v44 = vsub.f32 %v747_v40, %v5003_v14  ;;  %7555 = vst [vmem:[#allocation9_spill] sm:$0xff] %v5097_v4  ;;  %v858_v9 = vmul.f32 %v794_v55, %v794_v55 }
  0xf4   : > { %v5060_v19 = vadd.f32 %v853_v8, %v837_v13  ;;  %v856_v0 = vmul.f32 %v792_v44, %v792_v44  ;;  %v5121_v52 = vadd.f32 %v858_v9, %v842_v3  ;;  %v5137_v44 = vsub.f32 %v5047_v11, %v4973_v41 }
  0xf5   : > { %v4487_v25 = vpop.eup %4486  ;;  %v5062_v28 = vpop.permute.xlu1 %686  ;;  %v7429_v11 = vmov 683565275   ;;  %v7413_v3 = vmov 2131351028   ;;  %v7411_v9 = vmov 2102212464  }
  0xf6   : > { %v896_v35 = vmul.f32 %v4487_v25, %v867_v54  ;;  %4492 = vrsqrt.f32 %v5060_v19  ;;  %7556 = vst [vmem:[#allocation10_spill] sm:$0xff] %v5121_v52  ;;  %vm911_vm7 = vcmp.eq.f32.partialorder %v5060_v19, inf  ;;  %vm913_vm9 = vcmp.eq.f32.partialorder %v5060_v19, 0.0 }
  0xf7   : > { %4494 = vrsqrt.f32 %v5008_v21 }
  0xf8   : > { %v898_v45 = vsel %vm897_vm0, %v867_v54, %v896_v35  ;;  %v824_v54 = vmul.f32 %v708_v39, %v708_v39  ;;  %4496 = vrsqrt.f32 %v5097_v4  ;;  %v4478_v4 = vld [vmem:[%s4914_s17 + $0x38] sm:$0xff]  }
  0xf9   : > { %v4489_v43 = vpop.eup %4488  ;;  %v5082_v53 = vsel %vm899_vm1, %v900_v42, %v898_v45  ;;  %4498 = vrsqrt.f32 %v5117_v29  ;;  %4236 = vmatprep.subr.bf16.mxu0 %v4478_v4  ;;  %4332 = vmatprep.subr.bf16.mxu1 %v4478_v4 }
  0xfa   : > { %v571_v49 = vpop.permute.xlu1 %570  ;;  %v952_v24 = vmul.f32 %v4489_v43, %v5033_v63  ;;  %v5089_v22 = vmul.f32 0.62831855, %v5082_v53  ;;  %v4491_v58 = vpop.eup %4490  ;;  %4500 = vrsqrt.f32 %v5121_v52  ;;  %4237 = vmatpush3.bf16.msra.mxu0 %v4478_v4  ;;  %4340 = vmatpush3.bf16.msra.mxu1 %v4478_v4  ;;  %v7577_v4 = vmov 0 }
  0xfb   : > { %v624_v56 = vsub.f32 %v571_v49, %v4967_v36  ;;  %v903_v31 = vmul.f32 %v4491_v58, %v5024_v38 }
  0xfc   : > { %v954_v60 = vsel %vm953_vm2, %v5033_v63, %v952_v24  ;;  %v7410_v2 = vand.u32 2147483647, %v5089_v22  ;;  %v1303_v23 = vand.u32 2139095040, %v5089_v22 }
  0xfd   : > { %v808_v1 = vmul.f32 %v624_v56, %v624_v56  ;;  %v5101_v8 = vsel %vm955_vm3, %v956_v33, %v954_v60  ;;  %v905_v40 = vsel %vm904_vm4, %v5024_v38, %v903_v31 }
  0xfe   : > { %v5099_v7 = vpop.permute.xlu1 %605  ;;  %v1304_v10 = vshrl.u32 %v1303_v23, 23  ;;  %v1307_v12 = vand.u32 8388607, %v7410_v2  ;;  %v5108_v13 = vmul.f32 0.62831855, %v5101_v8  ;;  %v5140_v24 = vsel %vm906_vm6, %v907_v57, %v905_v40 }
  0xff   : > { %v840_v63 = vadd.f32 %v824_v54, %v808_v1 }
 0x100   : > { %v4008_v37 = vadd.s32 4294967169, %v1304_v10  ;;  %v7409_v25 = vand.u32 2147483647, %v5108_v13  ;;  %v2127_v26 = vand.u32 2139095040, %v5108_v13  ;;  %v1308_v34 = vor.u32 8388608, %v1307_v12 }
 0x101   : > { %v5114_v17 = vadd.f32 %v856_v0, %v840_v63  ;;  %v7415_v0 = vmov 2475754826   ;;  %v7423_v63 = vmov 920167782  }
 0x102   : > { %v1310_v6 = vadd.s32 1, %v4008_v37  ;;  %v2128_v35 = vshrl.u32 %v2127_v26, 23  ;;  %v5128_v39 = vand.u32 8388607, %v7409_v25  ;;  %v5142_v55 = vshll.u32 %v1308_v34, 8 }
 0x103   : > { %v659_v18 = vpop.permute.xlu1 %658  ;;  %v4493_v42 = vpop.eup %4492 }
 0x104   : > { %vm1311_vm5 = vcmp.gt.s32.totalorder %v1310_v6, 0  ;;  %v707_v43 = vsub.f32 %v659_v18, %v4973_v41  ;;  %v4040_v20 = vadd.s32 4294967169, %v2128_v35  ;;  %v2132_v56 = vor.u32 8388608, %v5128_v39  ;;  %v5160_v40 = vpop.eup %4494 }
 0x105   : > { %v1312_v45 = vsel %vm1311_vm5, %v1310_v6, 0  ;;  %v910_v60 = vmul.f32 %v4493_v42, %v5060_v19  ;;  %v7421_v6 = vmov 1326507024   ;;  %7557 = vst [vmem:[#allocation11_spill] sm:$0xff] %v5160_v40  ;;  %vm960_vm5 = vcmp.eq.f32.partialorder %v5117_v29, inf }
 0x106   : > { %v1313_v46 = vshrl.u32 %v1312_v45, 5  ;;  %v1314_v49 = vand.u32 31, %v1312_v45  ;;  %v823_v54 = vmul.f32 %v707_v43, %v707_v43  ;;  %v2134_v23 = vadd.s32 1, %v4040_v20 }
 0x107   : > { %v5145_v38 = vpop.permute.xlu1 %690 }
 0x108   : > { %v1315_v33 = vsub.s32 32, %v1314_v49  ;;  %v1317_v58 = vshll.u32 %v7429_v11, %v1314_v49  ;;  %v1320_v1 = vshll.u32 %v7415_v0, %v1314_v49  ;;  %v1323_v5 = vshll.u32 %v7413_v3, %v1314_v49 }
 0x109   : > { %v1326_v48 = vshll.u32 %v7411_v9, %v1314_v49  ;;  %v1329_v10 = vshll.u32 %v7423_v63, %v1314_v49  ;;  %vm1332_vm8 = vcmp.lt.s32.totalorder %v1313_v46, 1  ;;  %vm1334_vm10 = vcmp.lt.s32.totalorder %v1313_v46, 3  ;;  %v5167_v49 = vpop.eup %4496 }
 0x10a   : > { %v1316_v50 = vshrl.u32 %v7429_v11, %v1315_v33  ;;  %v1318_v12 = vshrl.u32 %v7415_v0, %v1315_v33  ;;  %v1321_v31 = vshrl.u32 %v7413_v3, %v1315_v33  ;;  %v1324_v37 = vshrl.u32 %v7411_v9, %v1315_v33  ;;  %7558 = vst [vmem:[#allocation12_spill] sm:$0xff] %v5167_v49 }
 0x10b   : > { %v1327_v26 = vshrl.u32 %v7423_v63, %v1315_v33  ;;  %v1330_v18 = vshrl.u32 %v7421_v6, %v1315_v33  ;;  %vm1335_vm11 = vcmp.lt.s32.totalorder %v1313_v46, 4  ;;  %vm2135_vm12 = vcmp.gt.s32.totalorder %v2134_v23, 0  ;;  %v5165_v20 = vpop.permute.xlu1 %694 }
 0x10c   : > { %v1319_v34 = vor.u32 %v1318_v12, %v1317_v58  ;;  %v1322_v35 = vor.u32 %v1321_v31, %v1320_v1  ;;  %v1325_v39 = vor.u32 %v1324_v37, %v1323_v5  ;;  %v2136_v57 = vsel %vm2135_vm12, %v2134_v23, 0 }
 0x10d   : > { %v1328_v42 = vor.u32 %v1327_v26, %v1326_v48  ;;  %v1331_v43 = vor.u32 %v1330_v18, %v1329_v10  ;;  %v5163_v45 = vadd.f32 %v823_v54, %v5068_v30  ;;  %v912_v30 = vsel %vm911_vm7, %v5060_v19, %v910_v60 }
 0x10e   : > { %v1336_v33 = vsel %vm1332_vm8, %v1316_v50, %v1319_v34  ;;  %v1337_v27 = vsel %vm1335_vm11, %v1325_v39, 2102212464  ;;  %v1340_v58 = vsel %vm1332_vm8, %v1319_v34, %v1322_v35  ;;  %v1344_v1 = vsel %vm1332_vm8, %v1322_v35, %v1325_v39 }
 0x10f   : > { %v1338_v5 = vsel %vm1334_vm10, %v1322_v35, %v1337_v27  ;;  %v1341_v48 = vsel %vm1335_vm11, %v1328_v42, 920167782  ;;  %v1345_v23 = vsel %vm1335_vm11, %v1331_v43, 1326507024  ;;  %vm1333_vm13 = vcmp.lt.s32.totalorder %v1313_v46, 2  ;;  %v5182_v27 = vpop.eup %4498 }
 0x110   : > { %v1342_v54 = vsel %vm1334_vm10, %v1325_v39, %v1341_v48  ;;  %v1346_v10 = vsel %vm1334_vm10, %v1328_v42, %v1345_v23  ;;  %v2138_v50 = vand.u32 31, %v2136_v57  ;;  %v1339_v12 = vsel %vm1333_vm13, %v1336_v33, %v1338_v5  ;;  %v5199_v33 = vpop.permute.xlu1 %738 }
 0x111   : > { %v1343_v31 = vsel %vm1333_vm13, %v1340_v58, %v1342_v54  ;;  %v1347_v37 = vsel %vm1333_vm13, %v1344_v1, %v1346_v10  ;;  %v914_v26 = vand.u32 2147483648, %v5060_v19  ;;  %v2137_v39 = vshrl.u32 %v2136_v57, 5 }
 0x112   : > { %v5185_v18 = vmul.u32.u64.low %v5142_v55, %v1347_v37  ;;  %v5186_v34 = vmul.u32.u64.high %v5142_v55, %v1347_v37, %v5185_v18  ;;  %v5189_v35 = vmul.u32.u64.low %v5142_v55, %v1343_v31  ;;  %v5190_v60 = vmul.u32.u64.high %v5142_v55, %v1343_v31, %v5189_v35 }
 0x113   : > { %v2139_v46 = vsub.s32 32, %v2138_v50  ;;  %v5193_v42 = vshll.u32 %v2132_v56, 8  ;;  %v5197_v43 = vsel %vm913_vm9, %v914_v26, %v912_v30  ;;  %v1355_v58 = vmul.u32 %v5142_v55, %v1339_v12 }
 0x114   : > { %v2141_v1 = vshll.u32 %v7429_v11, %v2138_v50  ;;  %v2144_v5 = vshll.u32 %v7415_v0, %v2138_v50  ;;  %v2147_v48 = vshll.u32 %v7413_v3, %v2138_v50  ;;  %v2150_v19 = vshll.u32 %v7411_v9, %v2138_v50 }
 0x115   : > { %v2142_v23 = vshrl.u32 %v7415_v0, %v2139_v46  ;;  %v2145_v57 = vshrl.u32 %v7413_v3, %v2139_v46  ;;  %v2148_v56 = vshrl.u32 %v7411_v9, %v2139_v46  ;;  %vm1357_vm14 = vc.u32 %v5186_v34, %v5189_v35  ;;  %v767_v3 = vpop.permute.xlu1 %766 }
 0x116   : > { %v1358_v30 = vadd.s32 1, %v5190_v60  ;;  %v2151_v55 = vshrl.u32 %v7423_v63, %v2139_v46  ;;  %v2153_v54 = vshll.u32 %v7423_v63, %v2138_v50  ;;  %v2154_v37 = vshrl.u32 %v7421_v6, %v2139_v46 }
 0x117   : > { %v2143_v10 = vor.u32 %v2142_v23, %v2141_v1  ;;  %v2146_v12 = vor.u32 %v2145_v57, %v2144_v5  ;;  %v2149_v31 = vor.u32 %v2148_v56, %v2147_v48  ;;  %vm2156_vm15 = vcmp.lt.s32.totalorder %v2137_v39, 1 }
 0x118   : > { %v1359_v26 = vsel %vm1357_vm14, %v1358_v30, %v5190_v60  ;;  %v2152_v18 = vor.u32 %v2151_v55, %v2150_v19  ;;  %vm2159_vm0 = vcmp.lt.s32.totalorder %v2137_v39, 4  ;;  %v2155_v2 = vor.u32 %v2154_v37, %v2153_v54 }
 0x119   : > { %v1360_v25 = vadd.s32 %v1359_v26, %v1355_v58  ;;  %vm2158_vm1 = vcmp.lt.s32.totalorder %v2137_v39, 3  ;;  %v2161_v9 = vsel %vm2159_vm0, %v2149_v31, 2102212464  ;;  %v2140_v0 = vshrl.u32 %v7429_v11, %v2139_v46 }
 0x11a   : > { %v2164_v40 = vsel %vm2156_vm15, %v2143_v10, %v2146_v12  ;;  %v2165_v21 = vsel %vm2159_vm0, %v2152_v18, 920167782  ;;  %v2168_v50 = vsel %vm2156_vm15, %v2146_v12, %v2149_v31  ;;  %vm2157_vm2 = vcmp.lt.s32.totalorder %v2137_v39, 2 }
 0x11b   : > { %v1361_v1 = vadd.s32 536870912, %v1360_v25  ;;  %v2166_v5 = vsel %vm2158_vm1, %v2149_v31, %v2165_v21  ;;  %v2169_v48 = vsel %vm2159_vm0, %v2155_v2, 1326507024  ;;  %v2160_v23 = vsel %vm2156_vm15, %v2140_v0, %v2143_v10 }
 0x11c   : > { %v2162_v57 = vsel %vm2158_vm1, %v2146_v12, %v2161_v9  ;;  %v2167_v60 = vsel %vm2157_vm2, %v2164_v40, %v2166_v5  ;;  %v2170_v56 = vsel %vm2158_vm1, %v2152_v18, %v2169_v48  ;;  %v5230_v21 = vmul.f32 0.62831855, %v5197_v43  ;;  %v743_v40 = vpop.permute.xlu1 %742 }
 0x11d   : > { %v5217_v19 = vshrl.u32 %v1361_v1, 30  ;;  %v2171_v58 = vsel %vm2157_vm2, %v2168_v50, %v2170_v56  ;;  %v5220_v30 = vmul.u32.u64.low %v5193_v42, %v2167_v60  ;;  %v5221_v55 = vmul.u32.u64.high %v5193_v42, %v2167_v60, %v5220_v30 }
 0x11e   : > { %v5226_v46 = vmul.u32.u64.low %v5193_v42, %v2171_v58  ;;  %v5227_v54 = vmul.u32.u64.high %v5193_v42, %v2171_v58, %v5226_v46  ;;  %7560 = vst [vmem:[#allocation14_spill] sm:$0xff] %v5230_v21  ;;  %v629_v2 = vsub.f32 %v5031_v62, %v4967_v36  ;;  %v2163_v9 = vsel %vm2157_vm2, %v2160_v23, %v2162_v57 }
 0x11f   : > { %7559 = vst [vmem:[#allocation13_spill] sm:$0xff] %v5217_v19  ;;  %v1363_v0 = vshll.u32 %v5217_v19, 30  ;;  %v5236_v39 = vmul.f32 0.62831855, %v5140_v24  ;;  %v5240_v10 = vadd.f32 %v5123_v61, %v4982_v51  ;;  %v622_v12 = vsub.f32 %v5028_v47, %v4967_v36  ;;  %v779_v46 = vpop.permute.xlu0 %778 }
 0x120   : > { %v1509_v31 = vand.u32 2139095040, %v5230_v21  ;;  %v797_v37 = vsub.f32 %v767_v3, %v5003_v14  ;;  %v829_v62 = vmul.f32 %v5137_v44, %v5137_v44  ;;  %v714_v26 = vsub.f32 %v5062_v28, %v4973_v41  ;;  %v5263_v56 = vpop.permute.xlu1 %774 }
 0x121   : > { %7561 = vst [vmem:[#allocation15_spill] sm:$0xff] %v5236_v39  ;;  %7562 = vst [vmem:[#allocation16_spill] sm:$0xff] %v5240_v10  ;;  %v5250_v18 = vsub.s32 %v1360_v25, %v1363_v0  ;;  %v2182_v50 = vadd.s32 1, %v5221_v55  ;;  %v798_v51 = vsub.f32 %v5053_v15, %v5003_v14  ;;  %v2179_v61 = vmul.u32 %v5193_v42, %v2163_v9 }
 0x122   : > { %vm2181_vm3 = vc.u32 %v5227_v54, %v5220_v30  ;;  %v1510_v47 = vshrl.u32 %v1509_v31, 23  ;;  %v813_v3 = vmul.f32 %v629_v2, %v629_v2  ;;  %v1406_v28 = vand.u32 2139095040, %v5236_v39 }
 0x123   : > { %v1366_v1 = vsub.s32 0, %v5250_v18  ;;  %v2183_v44 = vsel %vm2181_vm3, %v2182_v50, %v5221_v55  ;;  %v806_v25 = vmul.f32 %v622_v12, %v622_v12  ;;  %v861_v23 = vmul.f32 %v797_v37, %v797_v37 }
 0x124   : > { %v2184_v5 = vadd.s32 %v2183_v44, %v2179_v61  ;;  %v4016_v48 = vadd.s32 4294967169, %v1510_v47  ;;  %v845_v57 = vadd.f32 %v829_v62, %v813_v3  ;;  %v830_v60 = vmul.f32 %v714_v26, %v714_v26  ;;  %v5280_v44 = vpop.eup %4500 }
 0x125   : > { %v4009_v15 = vmin.u32 %v1366_v1, %v5250_v18  ;;  %v791_v42 = vsub.f32 %v743_v40, %v5003_v14  ;;  %v862_v58 = vmul.f32 %v798_v51, %v798_v51  ;;  %v959_v55 = vmul.f32 %v5182_v27, %v5117_v29  ;;  %7564 = vst [vmem:[#allocation18_spill] sm:$0xff] %v5280_v44 }
 0x126   : > { %v2185_v2 = vadd.s32 536870912, %v2184_v5  ;;  %v1516_v0 = vadd.s32 1, %v4016_v48  ;;  %v5267_v12 = vadd.f32 %v861_v23, %v845_v57  ;;  %v1407_v37 = vshrl.u32 %v1406_v28, 23  ;;  %v5283_v28 = vpop.permute.xlu1 %1011  ;;  %v5292_v57 = vpop.permute.xlu0 %1014 }
 0x127   : > { %v1368_v9 = vclz %v4009_v15  ;;  %v855_v31 = vmul.f32 %v791_v42, %v791_v42  ;;  %v800_v62 = vsub.f32 %v779_v46, %v5003_v14  ;;  %v7419_v40 = vand.u32 2147483647, %v5236_v39  ;;  %7565 = vst [vmem:[#allocation19_spill] sm:$0xff] %v5283_v28  ;;  %7566 = vst [vmem:[#allocation20_spill] sm:$0xff] %v5292_v57 }
 0x128   : > { %v5270_v26 = vshrl.u32 %v2185_v2, 30  ;;  %vm1517_vm4 = vcmp.gt.s32.totalorder %v1516_v0, 0  ;;  %v846_v50 = vadd.f32 %v830_v60, %v5064_v59  ;;  %4502 = vrsqrt.f32 %v5240_v10 }
 0x129   : > { %v4010_v51 = vadd.s32 4294967294, %v1368_v9  ;;  %v1518_v61 = vsel %vm1517_vm4, %v1516_v0, 0  ;;  %v5275_v47 = vadd.f32 %v855_v31, %v5163_v45  ;;  %v7420_v3 = vand.u32 2147483647, %v5230_v21 }
 0x12a   : > { %7563 = vst [vmem:[#allocation17_spill] sm:$0xff] %v5270_v26  ;;  %v2187_v27 = vshll.u32 %v5270_v26, 30  ;;  %v1520_v1 = vand.u32 31, %v1518_v61  ;;  %4504 = vrsqrt.f32 %v5267_v12  ;;  %v4012_v48 = vadd.s32 4294967169, %v1407_v37  ;;  %v5321_v57 = vpop.permute.xlu1 %1035 }
 0x12b   : > { %v5288_v45 = vadd.f32 %v5112_v16, %v806_v25  ;;  %v5290_v23 = vmul.f32 %v800_v62, %v800_v62  ;;  %v5296_v42 = vadd.f32 %v862_v58, %v846_v50  ;;  %vm4011_vm6 = vcmp.lt.s32.totalorder %v4010_v51, 0  ;;  %7571 = vst [vmem:[#allocation21_spill] sm:$0xff] %v5321_v57 }
 0x12c   : > { %v5294_v60 = vsub.s32 %v2184_v5, %v2187_v27  ;;  %v1521_v15 = vsub.s32 32, %v1520_v1  ;;  %v5300_v46 = vand.u32 8388607, %v7419_v40  ;;  %v5303_v2 = vsel %vm960_vm5, %v5117_v29, %v959_v55 }
 0x12d   : > { %v1513_v25 = vand.u32 8388607, %v7420_v3  ;;  %v7567_v0 = vmov 2475754826   ;;  %v7568_v5 = vmov 2131351028   ;;  %v1523_v58 = vshll.u32 %v7429_v11, %v1520_v1 }
 0x12e   : > { %v2190_v16 = vsub.s32 0, %v5294_v60  ;;  %v1524_v9 = vshrl.u32 %v7567_v0, %v1521_v15  ;;  %v1527_v31 = vshrl.u32 %v7568_v5, %v1521_v15  ;;  %v1526_v37 = vshll.u32 %v7567_v0, %v1520_v1 }
 0x12f   : > { %v7569_v62 = vmov 2102212464   ;;  %v1413_v27 = vadd.s32 1, %v4012_v48  ;;  %v5313_v40 = vsel %vm4011_vm6, 0, %v4010_v51  ;;  %v5316_v59 = vshrl.u32 %v1518_v61, 5  ;;  %v5324_v48 = vpop.permute.xlu0 %1017 }
 0x130   : > { %v1530_v50 = vshrl.u32 %v7569_v62, %v1521_v15  ;;  %v4041_v55 = vmin.u32 %v2190_v16, %v5294_v60  ;;  %v1529_v3 = vshll.u32 %v7568_v5, %v1520_v1  ;;  %v1525_v6 = vor.u32 %v1524_v9, %v1523_v58 }
 0x131   : > { %v1528_v63 = vor.u32 %v1527_v31, %v1526_v37  ;;  %v1532_v26 = vshll.u32 %v7569_v62, %v1520_v1  ;;  %v7570_v19 = vmov 920167782   ;;  %4506 = vrsqrt.f32 %v5296_v42  ;;  %v5330_v31 = vld [vmem:[%s4885_s12] ss:$0 sm:$0xff] }
 0x132   : > { %v1533_v11 = vshrl.u32 %v7570_v19, %v1521_v15  ;;  %v2192_v51 = vclz %v4041_v55  ;;  %v1514_v28 = vor.u32 8388608, %v1513_v25  ;;  %v7572_v16 = vmov 1326507024  }
 0x133   : > { %v1536_v61 = vshrl.u32 %v7572_v16, %v1521_v15  ;;  %v1376_v10 = vsub.s32 4294967266, %v5313_v40  ;;  %v1531_v44 = vor.u32 %v1530_v50, %v1529_v3  ;;  %v1535_v9 = vshll.u32 %v7570_v19, %v1520_v1 }
 0x134   : > { %v1534_v52 = vor.u32 %v1533_v11, %v1532_v26  ;;  %v631_v58 = vsub.f32 %v5099_v7, %v4967_v36  ;;  %v4042_v37 = vadd.s32 4294967294, %v2192_v51  ;;  %vm1538_vm7 = vcmp.lt.s32.totalorder %v5316_v59, 1  ;;  %v5353_v51 = vpop.permute.xlu1 %1038 }
 0x135   : > { %vm1064_vm8 = vcmp.eq.s32.totalorder %v5324_v48, %v5330_v31  ;;  %v1537_v25 = vor.u32 %v1536_v61, %v1535_v9  ;;  %vm1541_vm9 = vcmp.lt.s32.totalorder %v5316_v59, 4  ;;  %v1546_v11 = vsel %vm1538_vm7, %v1525_v6, %v1528_v63  ;;  %v5346_v26 = vpop.eup %4502  ;;  %7575 = vst [vmem:[#allocation23_spill] sm:$0xff] %v5353_v51 }
 0x136   : > { %vm1414_vm10 = vcmp.gt.s32.totalorder %v1413_v27, 0  ;;  %vm4043_vm11 = vcmp.lt.s32.totalorder %v4042_v37, 0  ;;  %vm1540_vm12 = vcmp.lt.s32.totalorder %v5316_v59, 3  ;;  %v1547_v36 = vsel %vm1541_vm9, %v1534_v52, 920167782  ;;  %7573 = vst [vmem:[#allocation22_spill] sm:$0xff] %v5346_v26 }
 0x137   : > { %v5344_v7 = vshll.u32 %v1514_v28, 8  ;;  %v1377_v3 = vadd.s32 127, %v1376_v10  ;;  %vm2776_vm13 = vcmp.lt.f32.partialorder %v5082_v53, 5.0  ;;  %v7574_v1 = vmov 683565275   ;;  %v4505_v61 = vpop.eup %4504 }
 0x138   : > { %v1522_v50 = vshrl.u32 %v7574_v1, %v1521_v15  ;;  %vm1539_vm14 = vcmp.lt.s32.totalorder %v5316_v59, 2  ;;  %v1548_v55 = vsel %vm1540_vm12, %v1531_v44, %v1547_v36  ;;  %v5355_v9 = vsel %vm4043_vm11, 0, %v4042_v37  ;;  %vm5419_vm1 = vmand %vm2776_vm13, %vm1064_vm8 }
 0x139   : > { %v1543_v28 = vsel %vm1541_vm9, %v1531_v44, 2102212464  ;;  %v1549_v10 = vsel %vm1539_vm14, %v1546_v11, %v1548_v55  ;;  %v1550_v15 = vsel %vm1538_vm7, %v1528_v63, %v1531_v44  ;;  %vm2777_vm15 = vcmp.lt.f32.partialorder %v5140_v24, 5.0 }
 0x13a   : > { %v5364_v57 = vmul.f32 %v631_v58, %v631_v58  ;;  %v1551_v36 = vsel %vm1541_vm9, %v1537_v25, 1326507024  ;;  %v5369_v37 = vmul.u32.u64.low %v5344_v7, %v1549_v10  ;;  %v5370_v26 = vmul.u32.u64.high %v5344_v7, %v1549_v10, %v5369_v37 }
 0x13b   : > { %v1372_v51 = vsub.s32 32, %v5313_v40  ;;  %v1542_v11 = vsel %vm1538_vm7, %v1522_v50, %v1525_v6  ;;  %v1552_v44 = vsel %vm1540_vm12, %v1534_v52, %v1551_v36  ;;  %v5379_v55 = vsel %vm1414_vm10, %v1413_v27, 0 }
 0x13c   : > { %v2200_v58 = vsub.s32 4294967266, %v5355_v9  ;;  %v1544_v25 = vsel %vm1540_vm12, %v1528_v63, %v1543_v28  ;;  %v1553_v10 = vsel %vm1539_vm14, %v1550_v15, %v1552_v44  ;;  %v966_v49 = vmul.f32 %v4505_v61, %v5267_v12  ;;  %v1021_v61 = vpop.permute.xlu1 %1020  ;;  %v4479_v44 = vld [vmem:[%s4914_s17 + $0x30] sm:$0xff]  }
 0x13d   : > { %v1356_v6 = vadd.s32 %v5189_v35, %v5186_v34  ;;  %v1378_v50 = vshll.u32 %v1377_v3, 23  ;;  %v715_v52 = vsub.f32 %v5145_v38, %v4973_v41  ;;  %v716_v27 = vsub.f32 %v5165_v20, %v4973_v41  ;;  %4238 = vmatprep.subr.bf16.mxu0 %v4479_v44  ;;  %4333 = vmatprep.subr.bf16.mxu1 %v4479_v44 }
 0x13e   : > { %v2180_v36 = vadd.s32 %v5220_v30, %v5227_v54  ;;  %v5397_v63 = vmul.u32.u64.low %v5344_v7, %v1553_v10  ;;  %v5398_v28 = vmul.u32.u64.high %v5344_v7, %v1553_v10, %v5397_v63  ;;  %vm967_vm0 = vcmp.eq.f32.partialorder %v5267_v12, inf  ;;  %v5406_v35 = vpop.eup %4506  ;;  %4239 = vmatpush3.bf16.msra.mxu0 %v4479_v44  ;;  %4341 = vmatpush3.bf16.msra.mxu1 %v4479_v44 }
 0x13f   : > { %v2196_v34 = vsub.s32 32, %v5355_v9  ;;  %v1545_v38 = vsel %vm1539_vm14, %v1542_v11, %v1544_v25  ;;  %v1564_v41 = vadd.s32 1, %v5370_v26  ;;  %v968_v20 = vsel %vm967_vm0, %v5267_v12, %v966_v49  ;;  %7576 = vst [vmem:[#allocation24_spill] sm:$0xff] %v5406_v35 }
 0x140   : > { %v1374_v30 = vshrl.u32 %v1356_v6, %v1372_v51  ;;  %v2201_v54 = vadd.s32 127, %v2200_v58  ;;  %v799_v3 = vsub.f32 %v5263_v56, %v5003_v14  ;;  %v970_v15 = vand.u32 2147483648, %v5267_v12 }
 0x141   : > { %v1373_v59 = vshll.u32 %v5250_v18, %v5313_v40  ;;  %v1379_v11 = vor.u32 4788187, %v1378_v50  ;;  %v7578_v4 = vsel %vm5419_vm1, 4294967295, %v7577_v4  ;;  %vm969_vm2 = vcmp.eq.f32.partialorder %v5267_v12, 0.0 }
 0x142   : > { %7579 = vst [vmem:[#allocation25_spill] sm:$0xff] %v7578_v4  ;;  %vm1065_vm3 = vcmp.eq.s32.totalorder %v1021_v61, %v5330_v31  ;;  %v1561_v49 = vmul.u32 %v5344_v7, %v1545_v38  ;;  %vm1563_vm4 = vc.u32 %v5398_v28, %v5369_v37  ;;  %v5428_v18 = vsel %vm969_vm2, %v970_v15, %v968_v20 }
 0x143   : > { %7580 = vst [vmem:[#allocation26_spill] sm:$0xff] %v5428_v18  ;;  %v1417_v56 = vand.u32 31, %v5379_v55  ;;  %vm5433_vm5 = vmand %vm2777_vm15, %vm1065_vm3  ;;  %v7581_v53 = vmov 0  ;;  %v2198_v12 = vshrl.u32 %v2180_v36, %v2196_v34  ;;  %v831_v40 = vmul.f32 %v715_v52, %v715_v52 }
 0x144   : > { %v7582_v53 = vsel %vm5433_vm5, 4294967295, %v7581_v53  ;;  %v1565_v48 = vsel %vm1563_vm4, %v1564_v41, %v5370_v26  ;;  %v5439_v7 = vmul.f32 0.62831855, %v5428_v18  ;;  %v1375_v24 = vor.u32 %v1374_v30, %v1373_v59 }
 0x145   : > { %7583 = vst [vmem:[#allocation27_spill] sm:$0xff] %v7582_v53  ;;  %v2202_v51 = vshll.u32 %v2201_v54, 23  ;;  %v1566_v58 = vadd.s32 %v1565_v48, %v1561_v49  ;;  %v790_v25 = vsub.f32 %v5199_v33, %v5003_v14  ;;  %v2197_v10 = vshll.u32 %v5294_v60, %v5355_v9 }
 0x146   : > { %7584 = vst [vmem:[#allocation28_spill] sm:$0xff] %v5439_v7  ;;  %v832_v26 = vmul.f32 %v716_v27, %v716_v27  ;;  %v7441_v6 = vand.u32 2147483647, %v5439_v7  ;;  %v2333_v50 = vand.u32 2139095040, %v5439_v7  ;;  %v1380_v52 = vand.u32 2147483647, %v1379_v11 }
 0x147   : > { %v1567_v36 = vadd.s32 536870912, %v1566_v58  ;;  %v863_v63 = vmul.f32 %v799_v3, %v799_v3  ;;  %v1418_v61 = vsub.s32 32, %v1417_v56  ;;  %v5451_v34 = vor.u32 %v2198_v12, %v2197_v10 }
 0x148   : > { %v2334_v38 = vshrl.u32 %v2333_v50, 23  ;;  %v2337_v41 = vand.u32 8388607, %v7441_v6  ;;  %v5456_v14 = vshrl.u32 %v5379_v55, 5  ;;  %v1382_v33 = vcvt.s32.f32 %v1375_v24 }
 0x149   : > { %v5458_v60 = vor.u32 4788187, %v2202_v51  ;;  %v847_v9 = vadd.f32 %v831_v40, %v5364_v57  ;;  %v5461_v27 = vshrl.u32 %v1567_v36, 30  ;;  %v5464_v20 = vadd.f32 %v832_v26, %v5070_v32 }
 0x14a   : > { %v5466_v30 = vmul.f32 %v790_v25, %v790_v25  ;;  %4508 = vrsqrt.f32 %v5275_v47  ;;  %v4048_v54 = vadd.s32 4294967169, %v2334_v38  ;;  %v5469_v3 = vmul.f32 %v1382_v33, %v1380_v52 }
 0x14b   : > { %7585 = vst [vmem:[#allocation29_spill] sm:$0xff] %v5461_v27  ;;  %v1569_v55 = vshll.u32 %v5461_v27, 30  ;;  %v5472_v15 = vadd.f32 %v863_v63, %v847_v9  ;;  %v1421_v44 = vshrl.u32 %v7567_v0, %v1418_v61  ;;  %v2338_v59 = vor.u32 8388608, %v2337_v41 }
 0x14c   : > { %v2340_v11 = vadd.s32 1, %v4048_v54  ;;  %v1424_v32 = vshrl.u32 %v7568_v5, %v1418_v61  ;;  %v1420_v40 = vshll.u32 %v7574_v1, %v1417_v56  ;;  %v1427_v48 = vshrl.u32 %v7569_v62, %v1418_v61 }
 0x14d   : > { %v5478_v12 = vsub.s32 %v1566_v58, %v1569_v55  ;;  %v5483_v24 = vshrl.u32 %v7574_v1, %v1418_v61  ;;  %v1423_v51 = vshll.u32 %v7567_v0, %v1417_v56  ;;  %v1430_v25 = vshrl.u32 %v7570_v19, %v1418_v61 }
 0x14e   : > { %vm2341_vm7 = vcmp.gt.s32.totalorder %v2340_v11, 0  ;;  %v5488_v50 = vor.u32 %v1421_v44, %v1420_v40  ;;  %v1426_v58 = vshll.u32 %v7568_v5, %v1417_v56  ;;  %vm1435_vm8 = vcmp.lt.s32.totalorder %v5456_v14, 1 }
 0x14f   : > { %v1572_v10 = vsub.s32 0, %v5478_v12  ;;  %v2342_v26 = vsel %vm2341_vm7, %v2340_v11, 0  ;;  %v5492_v36 = vshll.u32 %v2338_v59, 8  ;;  %v5494_v63 = vor.u32 %v1424_v32, %v1423_v51 }
 0x150   : > { %v2344_v52 = vand.u32 31, %v2342_v26  ;;  %v1429_v38 = vshll.u32 %v7569_v62, %v1417_v56  ;;  %v1428_v33 = vor.u32 %v1427_v48, %v1426_v58  ;;  %v1432_v9 = vshll.u32 %v7570_v19, %v1417_v56 }
 0x151   : > { %v4017_v41 = vmin.u32 %v1572_v10, %v5478_v12  ;;  %v1433_v54 = vshrl.u32 %v7572_v16, %v1418_v61  ;;  %v2343_v55 = vshrl.u32 %v2342_v26, 5  ;;  %vm1438_vm9 = vcmp.lt.s32.totalorder %v5456_v14, 4 }
 0x152   : > { %v2345_v44 = vsub.s32 32, %v2344_v52  ;;  %v1431_v11 = vor.u32 %v1430_v25, %v1429_v38  ;;  %v2347_v59 = vshll.u32 %v7574_v1, %v2344_v52  ;;  %v2350_v32 = vshll.u32 %v7567_v0, %v2344_v52 }
 0x153   : > { %v1574_v40 = vclz %v4017_v41  ;;  %v2353_v51 = vshll.u32 %v7568_v5, %v2344_v52  ;;  %v2356_v61 = vshll.u32 %v7569_v62, %v2344_v52  ;;  %vm1437_vm10 = vcmp.lt.s32.totalorder %v5456_v14, 3 }
 0x154   : > { %v2348_v6 = vshrl.u32 %v7567_v0, %v2345_v44  ;;  %v2351_v48 = vshrl.u32 %v7568_v5, %v2345_v44  ;;  %v2354_v56 = vshrl.u32 %v7569_v62, %v2345_v44  ;;  %v2357_v10 = vshrl.u32 %v7570_v19, %v2345_v44 }
 0x155   : > { %v4018_v25 = vadd.s32 4294967294, %v1574_v40  ;;  %v2359_v26 = vshll.u32 %v7570_v19, %v2344_v52  ;;  %v2360_v58 = vshrl.u32 %v7572_v16, %v2345_v44  ;;  %v1434_v49 = vor.u32 %v1433_v54, %v1432_v9 }
 0x156   : > { %v2349_v38 = vor.u32 %v2348_v6, %v2347_v59  ;;  %v2352_v41 = vor.u32 %v2351_v48, %v2350_v32  ;;  %v2355_v57 = vor.u32 %v2354_v56, %v2353_v51  ;;  %v2358_v53 = vor.u32 %v2357_v10, %v2356_v61 }
 0x157   : > { %v4509_v4 = vpop.eup %4508  ;;  %vm4019_vm11 = vcmp.lt.s32.totalorder %v4018_v25, 0  ;;  %v2361_v27 = vor.u32 %v2360_v58, %v2359_v26  ;;  %v1440_v39 = vsel %vm1438_vm9, %v1428_v33, 2102212464  ;;  %vm2362_vm12 = vcmp.lt.s32.totalorder %v2343_v55, 1 }
 0x158   : > { %vm2365_vm13 = vcmp.lt.s32.totalorder %v2343_v55, 4  ;;  %v1443_v52 = vsel %vm1435_vm8, %v5488_v50, %v5494_v63  ;;  %v1444_v6 = vsel %vm1438_vm9, %v1431_v11, 920167782  ;;  %v2346_v40 = vshrl.u32 %v7574_v1, %v2345_v44 }
 0x159   : > { %vm2364_vm14 = vcmp.lt.s32.totalorder %v2343_v55, 3  ;;  %v2367_v9 = vsel %vm2365_vm13, %v2355_v57, 2102212464  ;;  %v2370_v54 = vsel %vm2362_vm12, %v2349_v38, %v2352_v41  ;;  %v5522_v59 = vsel %vm4019_vm11, 0, %v4018_v25 }
 0x15a   : > { %v2371_v32 = vsel %vm2365_vm13, %v2358_v53, 920167782  ;;  %v2374_v51 = vsel %vm2362_vm12, %v2352_v41, %v2355_v57  ;;  %v2375_v48 = vsel %vm2365_vm13, %v2361_v27, 1326507024  ;;  %vm2363_vm15 = vcmp.lt.s32.totalorder %v2343_v55, 2  ;;  %v5538_v27 = vpop.permute.xlu0 %1041 }
 0x15b   : > { %v2372_v56 = vsel %vm2364_vm14, %v2355_v57, %v2371_v32  ;;  %v2376_v61 = vsel %vm2364_vm14, %v2358_v53, %v2375_v48  ;;  %v1447_v10 = vsel %vm1435_vm8, %v5494_v63, %v1428_v33  ;;  %v2366_v26 = vsel %vm2362_vm12, %v2346_v40, %v2349_v38 }
 0x15c   : > { %v2368_v44 = vsel %vm2364_vm14, %v2352_v41, %v2367_v9  ;;  %v2373_v58 = vsel %vm2363_vm15, %v2370_v54, %v2372_v56  ;;  %v2377_v7 = vsel %vm2363_vm15, %v2374_v51, %v2376_v61  ;;  %v1582_v25 = vsub.s32 4294967266, %v5522_v59 }
 0x15d   : > { %v5533_v18 = vmul.u32.u64.low %v5492_v36, %v2377_v7  ;;  %v5534_v35 = vmul.u32.u64.high %v5492_v36, %v2377_v7, %v5533_v18  ;;  %v1445_v53 = vsel %vm1437_vm10, %v1428_v33, %v1444_v6  ;;  %vm1436_vm0 = vcmp.lt.s32.totalorder %v5456_v14, 2 }
 0x15e   : > { %v5541_v57 = vmul.u32.u64.low %v5492_v36, %v2373_v58  ;;  %v5542_v32 = vmul.u32.u64.high %v5492_v36, %v2373_v58, %v5541_v57  ;;  %v1448_v38 = vsel %vm1438_vm9, %v1434_v49, 1326507024  ;;  %vm962_vm2 = vcmp.eq.f32.partialorder %v5117_v29, 0.0 }
 0x15f   : > { %v2369_v7 = vsel %vm2363_vm15, %v2366_v26, %v2368_v44  ;;  %v1439_v18 = vsel %vm1435_vm8, %v5483_v24, %v5488_v50  ;;  %v1441_v33 = vsel %vm1437_vm10, %v5494_v63, %v1440_v39  ;;  %v1449_v41 = vsel %vm1437_vm10, %v1431_v11, %v1448_v38  ;;  %v1045_v38 = vpop.permute.xlu1 %1044 }
 0x160   : > { %v1446_v6 = vsel %vm1436_vm0, %v1443_v52, %v1445_v53  ;;  %v1450_v49 = vsel %vm1436_vm0, %v1447_v10, %v1449_v41  ;;  %v7586_v55 = vor.u32 8388608, %v5300_v46  ;;  %v924_v9 = vmul.f32 %v4509_v4, %v5275_v47 }
 0x161   : > { %vm1072_vm3 = vcmp.eq.s32.totalorder %v5538_v27, %v5330_v31  ;;  %v1578_v24 = vsub.s32 32, %v5522_v59  ;;  %v1583_v39 = vadd.s32 127, %v1582_v25  ;;  %vm2387_vm4 = vc.u32 %v5534_v35, %v5541_v57 }
 0x162   : > { %v1451_v40 = vshll.u32 %v7586_v55, 8  ;;  %vm925_vm7 = vcmp.eq.f32.partialorder %v5275_v47, inf  ;;  %v2388_v50 = vadd.s32 1, %v5542_v32  ;;  %vm7468_vm8 = vcmp.lt.s32.totalorder %v5089_v22, 0 }
 0x163   : > { %v926_v46 = vsel %vm925_vm7, %v5275_v47, %v924_v9  ;;  %vm2784_vm9 = vcmp.lt.f32.partialorder %v5101_v8, 5.0  ;;  %v2385_v4 = vmul.u32 %v5492_v36, %v2369_v7  ;;  %v928_v51 = vand.u32 2147483648, %v5275_v47 }
 0x164   : > { %v5573_v63 = vmul.u32.u64.low %v1451_v40, %v1450_v49  ;;  %v5574_v11 = vmul.u32.u64.high %v1451_v40, %v1450_v49, %v5573_v63  ;;  %v5580_v52 = vmul.u32.u64.low %v1451_v40, %v1446_v6  ;;  %v5581_v54 = vmul.u32.u64.high %v1451_v40, %v1446_v6, %v5580_v52  ;;  %vm5644_vm15 = vmand %vm2784_vm9, %vm1072_vm3 }
 0x165   : > { %vm7467_vm10 = vcmp.lt.s32.totalorder %v5108_v13, 0  ;;  %v7587_v48 = vand.u32 2147483647, %v5458_v60  ;;  %v7588_v56 = vcvt.s32.f32 %v5451_v34  ;;  %v1562_v10 = vadd.s32 %v5369_v37, %v5398_v28 }
 0x166   : > { %v2389_v26 = vsel %vm2387_vm4, %v2388_v50, %v5542_v32  ;;  %vm927_vm11 = vcmp.eq.f32.partialorder %v5275_v47, 0.0  ;;  %v1584_v36 = vshll.u32 %v1583_v39, 23  ;;  %v1442_v58 = vsel %vm1436_vm0, %v1439_v18, %v1441_v33 }
 0x167   : > { %v2207_v61 = vmul.f32 %v7588_v56, %v7587_v48  ;;  %v2390_v44 = vadd.s32 %v2389_v26, %v2385_v4  ;;  %v5596_v25 = vsel %vm927_vm11, %v928_v51, %v926_v46  ;;  %v7589_v53 = vand.u32 2147483647, %v5089_v22 }
 0x168   : > { %v1384_v34 = vxor.u32 2147483648, %v5469_v3  ;;  %v5607_v37 = vadd.f32 %v5466_v30, %v5288_v45  ;;  %vm1460_vm13 = vc.u32 %v5574_v11, %v5580_v52  ;;  %v5612_v47 = vmul.f32 0.62831855, %v5596_v25 }
 0x169   : > { %vm5600_vm12 = vcmp.le.f32.partialorder %v7589_v53, 0.7853982  ;;  %v1580_v28 = vshrl.u32 %v1562_v10, %v1578_v24  ;;  %v2391_v14 = vadd.s32 536870912, %v2390_v44  ;;  %v1461_v32 = vadd.s32 1, %v5581_v54 }
 0x16a   : > { %7592 = vst [vmem:[#allocation30_spill] sm:$0xff] %v5612_v47  ;;  %v7593_v7 = vand.u32 2147483648, %v5117_v29  ;;  %v2208_v33 = vxor.u32 2147483648, %v2207_v61  ;;  %4510 = vrsqrt.f32 %v5472_v15  ;;  %v1458_v45 = vmul.u32 %v1451_v40, %v1442_v58 }
 0x16b   : > { %v1715_v30 = vand.u32 2139095040, %v5612_v47  ;;  %v1579_v41 = vshll.u32 %v5478_v12, %v5522_v59  ;;  %v1585_v6 = vor.u32 4788187, %v1584_v36  ;;  %v5624_v49 = vshrl.u32 %v2391_v14, 30 }
 0x16c   : > { %v964_v18 = vsel %vm962_vm2, %v7593_v7, %v5303_v2  ;;  %v1462_v55 = vsel %vm1460_vm13, %v1461_v32, %v5581_v54  ;;  %vm1073_vm14 = vcmp.eq.s32.totalorder %v1045_v38, %v5330_v31  ;;  %4512 = vrsqrt.f32 %v5114_v17 }
 0x16d   : > { %7594 = vst [vmem:[#allocation31_spill] sm:$0xff] %v5624_v49  ;;  %v1463_v9 = vadd.s32 %v1462_v55, %v1458_v45  ;;  %v1716_v24 = vshrl.u32 %v1715_v30, 23  ;;  %v5628_v29 = vmul.f32 0.62831855, %v964_v18  ;;  %v1581_v2 = vor.u32 %v1580_v28, %v1579_v41  ;;  %v4480_v28 = vld [vmem:[%s4914_s17 + $0x28] sm:$0xff]  }
 0x16e   : > { %v5633_v40 = vadd.f32 %v5290_v23, %v5464_v20  ;;  %v2393_v12 = vshll.u32 %v5624_v49, 30  ;;  %v1385_v59 = vsel %vm7468_vm8, %v1384_v34, %v5469_v3  ;;  %v7595_v39 = vmov 0  ;;  %4240 = vmatprep.subr.bf16.mxu0 %v4480_v28  ;;  %4334 = vmatprep.subr.bf16.mxu1 %v4480_v28 }
 0x16f   : > { %v7596_v39 = vsel %vm5644_vm15, 4294967295, %v7595_v39  ;;  %v1464_v50 = vadd.s32 536870912, %v1463_v9  ;;  %v4024_v63 = vadd.s32 4294967169, %v1716_v24  ;;  %vm2785_vm0 = vcmp.lt.f32.partialorder %v964_v18, 5.0  ;;  %4241 = vmatpush3.bf16.msra.mxu0 %v4480_v28  ;;  %4342 = vmatpush3.bf16.msra.mxu1 %v4480_v28 }
 0x170   : > { %7597 = vst [vmem:[#allocation32_spill] sm:$0xff] %v7596_v39  ;;  %v7598_v23 = vand.u32 2147483647, %v5108_v13  ;;  %v7599_v20 = vmov 0  ;;  %v2209_v3 = vsel %vm7467_vm10, %v2208_v33, %v2207_v61  ;;  %v1586_v46 = vand.u32 2147483647, %v1585_v6  ;;  %vm5660_vm3 = vmand %vm2785_vm0, %vm1073_vm14 }
 0x171   : > { %v5656_v27 = vsub.s32 %v2390_v44, %v2393_v12  ;;  %v7602_v8 = vmov 0  ;;  %4514 = vrsqrt.f32 %v5607_v37  ;;  %v5665_v4 = vshrl.u32 %v1464_v50, 30 }
 0x172   : > { %vm5650_vm2 = vcmp.le.f32.partialorder %v7598_v23, 0.7853982  ;;  %v7603_v8 = vsel %vm5660_vm3, 4294967295, %v7602_v8  ;;  %v1722_v54 = vadd.s32 1, %v4024_v63  ;;  %v2230_v51 = vand.u32 2139095040, %v5628_v29 }
 0x173   : > { %v7600_v20 = vsel %vm5650_vm2, 4294967295, %v7599_v20  ;;  %7604 = vst [vmem:[#allocation34_spill] sm:$0xff] %v7603_v8  ;;  %v1388_v48 = vsel %vm5600_vm12, %v5089_v22, %v1385_v59  ;;  %v1588_v56 = vcvt.s32.f32 %v1581_v2  ;;  %v2396_v61 = vsub.s32 0, %v5656_v27 }
 0x174   : > { %7601 = vst [vmem:[#allocation33_spill] sm:$0xff] %v7600_v20  ;;  %v7453_v10 = vand.u32 2147483647, %v5612_v47  ;;  %v5680_v26 = vsel %vm5650_vm2, %v5108_v13, %v2209_v3  ;;  %4516 = vrsqrt.f32 %v5633_v40  ;;  %v1466_v36 = vshll.u32 %v5665_v4, 30 }
 0x175   : > { %vm1723_vm7 = vcmp.gt.s32.totalorder %v1722_v54, 0  ;;  %v1589_v44 = vmul.f32 %v1588_v56, %v1586_v46  ;;  %v4049_v58 = vmin.u32 %v2396_v61, %v5656_v27  ;;  %v7452_v34 = vand.u32 2147483647, %v5628_v29 }
 0x176   : > { %v1724_v53 = vsel %vm1723_vm7, %v1722_v54, 0  ;;  %4518 = vcosq.f32 %v1388_v48  ;;  %v5687_v14 = vsub.s32 %v1463_v9, %v1466_v36  ;;  %v2231_v38 = vshrl.u32 %v2230_v51, 23 }
 0x177   : > { %v1726_v32 = vand.u32 31, %v1724_v53  ;;  %4520 = vsinq.f32 %v1388_v48  ;;  %v2398_v7 = vclz %v4049_v58  ;;  %v1719_v18 = vand.u32 8388607, %v7453_v10  ;;  %v4511_v30 = vpop.eup %4510 }
 0x178   : > { %4522 = vcosq.f32 %v5680_v26  ;;  %vm7460_vm9 = vcmp.lt.s32.totalorder %v5230_v21, 0  ;;  %v1469_v33 = vsub.s32 0, %v5687_v14  ;;  %v1590_v41 = vxor.u32 2147483648, %v1589_v44 }
 0x179   : > { %v1727_v45 = vsub.s32 32, %v1726_v32  ;;  %v2386_v6 = vadd.s32 %v5541_v57, %v5534_v35  ;;  %v4050_v55 = vadd.s32 4294967294, %v2398_v7  ;;  %v5698_v9 = vand.u32 8388607, %v7452_v34  ;;  %v5705_v3 = vpop.eup %4512 }
 0x17a   : > { %v4013_v24 = vmin.u32 %v1469_v33, %v5687_v14  ;;  %v4044_v59 = vadd.s32 4294967169, %v2231_v38  ;;  %v1720_v50 = vor.u32 8388608, %v1719_v18  ;;  %v1725_v35 = vshrl.u32 %v1724_v53, 5 }
 0x17b   : > { %v1730_v2 = vshrl.u32 %v7567_v0, %v1727_v45  ;;  %v1733_v12 = vshrl.u32 %v7568_v5, %v1727_v45  ;;  %vm4051_vm11 = vcmp.lt.s32.totalorder %v4050_v55, 0  ;;  %v1736_v63 = vshrl.u32 %v7569_v62, %v1727_v45 }
 0x17c   : > { %v1739_v23 = vshrl.u32 %v7570_v19, %v1727_v45  ;;  %v1729_v57 = vshll.u32 %v7574_v1, %v1726_v32  ;;  %v1732_v46 = vshll.u32 %v7567_v0, %v1726_v32  ;;  %v980_v54 = vmul.f32 %v4511_v30, %v5472_v15 }
 0x17d   : > { %v1471_v51 = vclz %v4013_v24  ;;  %v1735_v48 = vshll.u32 %v7568_v5, %v1726_v32  ;;  %v1738_v56 = vshll.u32 %v7569_v62, %v1726_v32  ;;  %v1742_v61 = vshrl.u32 %v7572_v16, %v1727_v45 }
 0x17e   : > { %v2401_v36 = vsel %vm4051_vm11, 0, %v4050_v55  ;;  %v1731_v58 = vor.u32 %v1730_v2, %v1729_v57  ;;  %v1734_v28 = vor.u32 %v1733_v12, %v1732_v46  ;;  %v2237_v38 = vadd.s32 1, %v4044_v59  ;;  %v4515_v7 = vpop.eup %4514 }
 0x17f   : > { %v5715_v53 = vadd.s32 %v5580_v52, %v5574_v11  ;;  %v1737_v18 = vor.u32 %v1736_v63, %v1735_v48  ;;  %v1740_v33 = vor.u32 %v1739_v23, %v1738_v56  ;;  %v1741_v30 = vshll.u32 %v7570_v19, %v1726_v32 }
 0x180   : > { %v1591_v24 = vsel %vm7460_vm9, %v1590_v41, %v1589_v44  ;;  %v1760_v34 = vshll.u32 %v1720_v50, 8  ;;  %v2235_v10 = vor.u32 8388608, %v5698_v9  ;;  %vm981_vm13 = vcmp.eq.f32.partialorder %v5472_v15, inf }
 0x181   : > { %v5722_v55 = vpop.eup %4516  ;;  %v7605_v2 = vand.u32 2147483647, %v5230_v21  ;;  %v7606_v12 = vmov 0  ;;  %v2406_v11 = vsub.s32 4294967266, %v2401_v36  ;;  %v4014_v52 = vadd.s32 4294967294, %v1471_v51 }
 0x182   : > { %v1743_v59 = vor.u32 %v1742_v61, %v1741_v30  ;;  %vm1744_vm0 = vcmp.lt.s32.totalorder %v1725_v35, 1  ;;  %vm1747_vm7 = vcmp.lt.s32.totalorder %v1725_v35, 4  ;;  %vm2238_vm11 = vcmp.gt.s32.totalorder %v2237_v38, 0 }
 0x183   : > { %vm5726_vm14 = vcmp.le.f32.partialorder %v7605_v2, 0.7853982  ;;  %v1752_v44 = vsel %vm1744_vm0, %v1731_v58, %v1734_v28  ;;  %v982_v32 = vsel %vm981_vm13, %v5472_v15, %v980_v54  ;;  %v5732_v41 = vpop.eup %4518  ;;  %v2402_v9 = vsub.s32 32, %v2401_v36 }
 0x184   : > { %v7607_v12 = vsel %vm5726_vm14, 4294967295, %v7606_v12  ;;  %vm1746_vm6 = vcmp.lt.s32.totalorder %v1725_v35, 3  ;;  %v1749_v50 = vsel %vm1747_vm7, %v1737_v18, 2102212464  ;;  %v1753_v63 = vsel %vm1747_vm7, %v1740_v33, 920167782  ;;  %v5736_v23 = vpop.eup %4520 }
 0x185   : > { %7608 = vst [vmem:[#allocation35_spill] sm:$0xff] %v7607_v12  ;;  %v1728_v57 = vshrl.u32 %v7574_v1, %v1727_v45  ;;  %vm1745_vm4 = vcmp.lt.s32.totalorder %v1725_v35, 2  ;;  %v1754_v46 = vsel %vm1746_vm6, %v1737_v18, %v1753_v63  ;;  %v1756_v51 = vsel %vm1744_vm0, %v1734_v28, %v1737_v18  ;;  %v5740_v48 = vpop.eup %4522 }
 0x186   : > { %7609 = vst [vmem:[#allocation36_spill] sm:$0xff] %v5740_v48  ;;  %v2407_v56 = vadd.s32 127, %v2406_v11  ;;  %vm4015_vm13 = vcmp.lt.s32.totalorder %v4014_v52, 0  ;;  %v1755_v54 = vsel %vm1745_vm4, %v1752_v44, %v1754_v46  ;;  %v1757_v61 = vsel %vm1747_vm7, %v1743_v59, 1326507024 }
 0x187   : > { %v1748_v30 = vsel %vm1744_vm0, %v1728_v57, %v1731_v58  ;;  %v1750_v2 = vsel %vm1746_vm6, %v1734_v28, %v1749_v50  ;;  %v1758_v39 = vsel %vm1746_vm6, %v1740_v33, %v1757_v61  ;;  %v2239_v8 = vsel %vm2238_vm11, %v2237_v38, 0 }
 0x188   : > { %v2404_v49 = vshrl.u32 %v2386_v6, %v2402_v9  ;;  %v1759_v45 = vsel %vm1745_vm4, %v1756_v51, %v1758_v39  ;;  %v5747_v63 = vmul.u32.u64.low %v1760_v34, %v1755_v54  ;;  %v5748_v20 = vmul.u32.u64.high %v1760_v34, %v1755_v54, %v5747_v63  ;;  %v4481_v51 = vld [vmem:[%s4914_s17 + $0x20] sm:$0xff]  }
 0x189   : > { %v5750_v18 = vmul.u32.u64.low %v1760_v34, %v1759_v45  ;;  %v5751_v48 = vmul.u32.u64.high %v1760_v34, %v1759_v45, %v5750_v18  ;;  %vm983_vm9 = vcmp.eq.f32.partialorder %v5472_v15, 0.0  ;;  %v984_v11 = vand.u32 2147483648, %v5472_v15  ;;  %4242 = vmatprep.subr.bf16.mxu0 %v4481_v51  ;;  %4335 = vmatprep.subr.bf16.mxu1 %v4481_v51 }
 0x18a   : > { %v2403_v59 = vshll.u32 %v5656_v27, %v2401_v36  ;;  %v5756_v58 = vsel %vm4015_vm13, 0, %v4014_v52  ;;  %v1751_v28 = vsel %vm1745_vm4, %v1748_v30, %v1750_v2  ;;  %v2241_v38 = vand.u32 31, %v2239_v8  ;;  %4243 = vmatpush3.bf16.msra.mxu0 %v4481_v51  ;;  %4343 = vmatpush3.bf16.msra.mxu1 %v4481_v51 }
 0x18b   : > { %v5762_v39 = vsel %vm5726_vm14, %v5230_v21, %v1591_v24  ;;  %v2408_v6 = vshll.u32 %v2407_v56, 23  ;;  %v5764_v33 = vshll.u32 %v2235_v10, 8  ;;  %v5766_v44 = vsel %vm983_vm9, %v984_v11, %v982_v32 }
 0x18c   : > { %v5768_v9 = vor.u32 %v2404_v49, %v2403_v59  ;;  %v1770_v15 = vadd.s32 1, %v5748_v20  ;;  %v2242_v27 = vsub.s32 32, %v2241_v38  ;;  %v5772_v35 = vmul.f32 %v4515_v7, %v5607_v37 }
 0x18d   : > { %v1475_v36 = vsub.s32 32, %v5756_v58  ;;  %v1767_v52 = vmul.u32 %v1760_v34, %v1751_v28  ;;  %v5776_v24 = vadd.s32 %v5747_v63, %v5751_v48  ;;  %vm1769_vm6 = vc.u32 %v5751_v48, %v5747_v63 }
 0x18e   : > { %v1476_v10 = vshll.u32 %v5687_v14, %v5756_v58  ;;  %v1479_v49 = vsub.s32 4294967266, %v5756_v58  ;;  %v1771_v32 = vsel %vm1769_vm6, %v1770_v15, %v5748_v20  ;;  %v2245_v50 = vshrl.u32 %v7567_v0, %v2242_v27 }
 0x18f   : > { %v5784_v57 = vor.u32 4788187, %v2408_v6  ;;  %v1772_v7 = vadd.s32 %v1771_v32, %v1767_v52  ;;  %v2240_v46 = vshrl.u32 %v2239_v8, 5  ;;  %v2244_v34 = vshll.u32 %v7574_v1, %v2241_v38  ;;  %v5794_v8 = vpop.permute.xlu0 %1023 }
 0x190   : > { %v2247_v56 = vshll.u32 %v7567_v0, %v2241_v38  ;;  %v2248_v48 = vshrl.u32 %v7568_v5, %v2242_v27  ;;  %v2250_v54 = vshll.u32 %v7568_v5, %v2241_v38  ;;  %v2251_v14 = vshrl.u32 %v7569_v62, %v2242_v27 }
 0x191   : > { %v1773_v61 = vadd.s32 536870912, %v1772_v7  ;;  %v2246_v30 = vor.u32 %v2245_v50, %v2244_v34  ;;  %v2253_v20 = vshll.u32 %v7569_v62, %v2241_v38  ;;  %v2254_v2 = vshrl.u32 %v7570_v19, %v2242_v27 }
 0x192   : > { %v1477_v45 = vshrl.u32 %v5715_v53, %v1475_v36  ;;  %v2243_v63 = vshrl.u32 %v7574_v1, %v2242_v27  ;;  %v2249_v18 = vor.u32 %v2248_v48, %v2247_v56  ;;  %v2252_v11 = vor.u32 %v2251_v14, %v2250_v54 }
 0x193   : > { %v5798_v59 = vshrl.u32 %v1773_v61, 30  ;;  %v2255_v58 = vor.u32 %v2254_v2, %v2253_v20  ;;  %v2256_v28 = vshll.u32 %v7570_v19, %v2241_v38  ;;  %v2257_v6 = vshrl.u32 %v7572_v16, %v2242_v27  ;;  %v4482_v2 = vld [vmem:[%s4914_s17 + $0x18] sm:$0xff]  }
 0x194   : > { %vm2259_vm4 = vcmp.lt.s32.totalorder %v2240_v46, 1  ;;  %vm2260_vm9 = vcmp.lt.s32.totalorder %v2240_v46, 2  ;;  %vm2261_vm0 = vcmp.lt.s32.totalorder %v2240_v46, 3  ;;  %v5803_v15 = vmul.f32 0.62831855, %v5766_v44  ;;  %4244 = vmatprep.subr.bf16.mxu0 %v4482_v2  ;;  %4336 = vmatprep.subr.bf16.mxu1 %v4482_v2 }
 0x195   : > { %7610 = vst [vmem:[#allocation37_spill] sm:$0xff] %v5798_v59  ;;  %vm2778_vm7 = vcmp.lt.f32.partialorder %v5197_v43, 5.0  ;;  %vm1066_vm11 = vcmp.eq.s32.totalorder %v5794_v8, %v5330_v31  ;;  %v1775_v53 = vshll.u32 %v5798_v59, 30  ;;  %v2258_v36 = vor.u32 %v2257_v6, %v2256_v28  ;;  %4245 = vmatpush3.bf16.msra.mxu0 %v4482_v2  ;;  %4344 = vmatpush3.bf16.msra.mxu1 %v4482_v2 }
 0x196   : > { %7611 = vst [vmem:[#allocation38_spill] sm:$0xff] %v5803_v15  ;;  %vm2262_vm13 = vcmp.lt.s32.totalorder %v2240_v46, 4  ;;  %v2263_v38 = vsel %vm2259_vm4, %v2243_v63, %v2246_v30  ;;  %v2267_v27 = vsel %vm2259_vm4, %v2246_v30, %v2249_v18  ;;  %v2271_v50 = vsel %vm2259_vm4, %v2249_v18, %v2252_v11 }
 0x197   : > { %v2264_v52 = vsel %vm2262_vm13, %v2252_v11, 2102212464  ;;  %v2268_v32 = vsel %vm2262_vm13, %v2255_v58, 920167782  ;;  %v5809_v34 = vsub.s32 %v1772_v7, %v1775_v53  ;;  %v2272_v48 = vsel %vm2262_vm13, %v2258_v36, 1326507024  ;;  %v1027_v36 = vpop.permute.xlu1 %1026  ;;  %vm5855_vm13 = vmand %vm2778_vm7, %vm1066_vm11 }
 0x198   : > { %v2265_v51 = vsel %vm2261_vm0, %v2249_v18, %v2264_v52  ;;  %v2269_v56 = vsel %vm2261_vm0, %v2252_v11, %v2268_v32  ;;  %v2412_v54 = vcvt.s32.f32 %v5768_v9  ;;  %v1480_v14 = vadd.s32 127, %v1479_v49  ;;  %v4483_v52 = vld [vmem:[%s4914_s17 + $0x10] sm:$0xff]  }
 0x199   : > { %v2270_v61 = vsel %vm2260_vm9, %v2267_v27, %v2269_v56  ;;  %v2273_v20 = vsel %vm2261_vm0, %v2255_v58, %v2272_v48  ;;  %v1778_v63 = vsub.s32 0, %v5809_v34  ;;  %v2410_v18 = vand.u32 2147483647, %v5784_v57  ;;  %4246 = vmatprep.subr.bf16.mxu0 %v4483_v52  ;;  %4337 = vmatprep.subr.bf16.mxu1 %v4483_v52 }
 0x19a   : > { %v2274_v30 = vsel %vm2260_vm9, %v2271_v50, %v2273_v20  ;;  %v5820_v7 = vmul.u32.u64.low %v5764_v33, %v2270_v61  ;;  %v5821_v28 = vmul.u32.u64.high %v5764_v33, %v2270_v61, %v5820_v7  ;;  %v2266_v9 = vsel %vm2260_vm9, %v2263_v38, %v2265_v51  ;;  %4247 = vmatpush3.bf16.msra.mxu0 %v4483_v52  ;;  %4345 = vmatpush3.bf16.msra.mxu1 %v4483_v52 }
 0x19b   : > { %v5827_v49 = vmul.u32.u64.low %v5764_v33, %v2274_v30  ;;  %v5828_v11 = vmul.u32.u64.high %v5764_v33, %v2274_v30, %v5827_v49  ;;  %v5830_v58 = vor.u32 %v1477_v45, %v1476_v10  ;;  %v4025_v6 = vmin.u32 %v1778_v63, %v5809_v34 }
 0x19c   : > { %v2539_v53 = vand.u32 2139095040, %v5803_v15  ;;  %vm918_vm6 = vcmp.eq.f32.partialorder %v5607_v37, inf  ;;  %v1481_v57 = vshll.u32 %v1480_v14, 23  ;;  %vm920_vm4 = vcmp.eq.f32.partialorder %v5607_v37, 0.0 }
 0x19d   : > { %v919_v46 = vsel %vm918_vm6, %v5607_v37, %v5772_v35  ;;  %v921_v38 = vand.u32 2147483648, %v5607_v37  ;;  %v1780_v10 = vclz %v4025_v6  ;;  %v2282_v45 = vmul.u32 %v5764_v33, %v2266_v9  ;;  %v7619_v6 = vld [vmem:[#allocation24_spill] sm:$0xff] }
 0x19e   : > { %v2285_v27 = vadd.s32 1, %v5821_v28  ;;  %v2540_v32 = vshrl.u32 %v2539_v53, 23  ;;  %vm2284_vm9 = vc.u32 %v5828_v11, %v5820_v7  ;;  %v7461_v50 = vand.u32 2147483647, %v5803_v15 }
 0x19f   : > { %v922_v51 = vsel %vm920_vm4, %v921_v38, %v919_v46  ;;  %vm1067_vm0 = vcmp.eq.s32.totalorder %v1027_v36, %v5330_v31  ;;  %v5846_v35 = vmul.f32 %v2412_v54, %v2410_v18  ;;  %v4026_v37 = vadd.s32 4294967294, %v1780_v10 }
 0x1a0   : > { %v2286_v56 = vsel %vm2284_vm9, %v2285_v27, %v5821_v28  ;;  %v4056_v48 = vadd.s32 4294967169, %v2540_v32  ;;  %4524 = vsinq.f32 %v5680_v26  ;;  %v7612_v33 = vmov 0 }
 0x1a1   : > { %v7613_v33 = vsel %vm5855_vm13, 4294967295, %v7612_v33  ;;  %v5859_v14 = vor.u32 4788187, %v1481_v57  ;;  %v2287_v54 = vadd.s32 %v2286_v56, %v2282_v45  ;;  %vm2779_vm6 = vcmp.lt.f32.partialorder %v922_v51, 5.0 }
 0x1a2   : > { %7614 = vst [vmem:[#allocation39_spill] sm:$0xff] %v7613_v33  ;;  %4526 = vcosq.f32 %v5762_v39  ;;  %vm4027_vm4 = vcmp.lt.s32.totalorder %v4026_v37, 0  ;;  %v2546_v20 = vadd.s32 1, %v4056_v48  ;;  %vm5865_vm9 = vmand %vm2779_vm6, %vm1067_vm0  ;;  %v7615_v26 = vmov 0 }
 0x1a3   : > { %v7616_v26 = vsel %vm5865_vm9, 4294967295, %v7615_v26  ;;  %v1783_v43 = vsel %vm4027_vm4, 0, %v4026_v37  ;;  %v2288_v8 = vadd.s32 536870912, %v2287_v54  ;;  %v2543_v2 = vand.u32 8388607, %v7461_v50 }
 0x1a4   : > { %7617 = vst [vmem:[#allocation40_spill] sm:$0xff] %v7616_v26  ;;  %v5871_v63 = vmul.f32 0.62831855, %v922_v51  ;;  %v1784_v28 = vsub.s32 32, %v1783_v43  ;;  %v1788_v31 = vsub.s32 4294967266, %v1783_v43  ;;  %vm2547_vm11 = vcmp.gt.s32.totalorder %v2546_v20, 0 }
 0x1a5   : > { %v5879_v9 = vshrl.u32 %v2288_v8, 30  ;;  %v2548_v49 = vsel %vm2547_vm11, %v2546_v20, 0  ;;  %v973_v53 = vmul.f32 %v7619_v6, %v5296_v42  ;;  %v1785_v36 = vshll.u32 %v5809_v34, %v1783_v43  ;;  %v1048_v20 = vpop.permute.xlu0 %1047  ;;  %v7621_v26 = vld [vmem:[#allocation28_spill] sm:$0xff] }
 0x1a6   : > { %7618 = vst [vmem:[#allocation41_spill] sm:$0xff] %v5871_v63  ;;  %v1786_v57 = vshrl.u32 %v5776_v24, %v1784_v28  ;;  %v1789_v46 = vadd.s32 127, %v1788_v31  ;;  %v2550_v38 = vand.u32 31, %v2548_v49  ;;  %v2544_v10 = vor.u32 8388608, %v2543_v2 }
 0x1a7   : > { %v2290_v52 = vshll.u32 %v5879_v9, 30  ;;  %v1612_v45 = vand.u32 2139095040, %v5871_v63  ;;  %vm974_vm0 = vcmp.eq.f32.partialorder %v5296_v42, inf  ;;  %v5888_v51 = vshrl.u32 %v2548_v49, 5 }
 0x1a8   : > { %v1787_v27 = vor.u32 %v1786_v57, %v1785_v36  ;;  %v1790_v32 = vshll.u32 %v1789_v46, 23  ;;  %v2551_v37 = vsub.s32 32, %v2550_v38  ;;  %v2553_v34 = vshll.u32 %v7574_v1, %v2550_v38 }
 0x1a9   : > { %v5890_v56 = vsub.s32 %v2287_v54, %v2290_v52  ;;  %v2556_v24 = vshll.u32 %v7567_v0, %v2550_v38  ;;  %v2559_v48 = vshll.u32 %v7568_v5, %v2550_v38  ;;  %v2562_v28 = vshll.u32 %v7569_v62, %v2550_v38 }
 0x1aa   : > { %v1791_v43 = vor.u32 4788187, %v1790_v32  ;;  %v1794_v8 = vcvt.s32.f32 %v1787_v27  ;;  %v2554_v2 = vshrl.u32 %v7567_v0, %v2551_v37  ;;  %v2557_v49 = vshrl.u32 %v7568_v5, %v2551_v37  ;;  %v7620_v32 = vld [vmem:[#allocation26_spill] sm:$0xff]  ;;  %v5905_v27 = vld [vmem:[%s4885_s12] ss:$0 sm:$0xff] }
 0x1ab   : > { %v2293_v31 = vsub.s32 0, %v5890_v56  ;;  %v2560_v54 = vshrl.u32 %v7569_v62, %v2551_v37  ;;  %v2563_v6 = vshrl.u32 %v7570_v19, %v2551_v37  ;;  %v2565_v46 = vshll.u32 %v7570_v19, %v2550_v38 }
 0x1ac   : > { %v1792_v36 = vand.u32 2147483647, %v1791_v43  ;;  %v2555_v57 = vor.u32 %v2554_v2, %v2553_v34  ;;  %v2566_v52 = vshrl.u32 %v7572_v16, %v2551_v37  ;;  %v2558_v61 = vor.u32 %v2557_v49, %v2556_v24 }
 0x1ad   : > { %v4045_v50 = vmin.u32 %v2293_v31, %v5890_v56  ;;  %v2561_v18 = vor.u32 %v2560_v54, %v2559_v48  ;;  %v2564_v30 = vor.u32 %v2563_v6, %v2562_v28  ;;  %v5909_v33 = vpop.eup %4524  ;;  %vm7469_vm11 = vcmp.lt.s32.totalorder %v7621_v26, 0 }
 0x1ae   : > { %v5912_v34 = vmul.f32 %v1794_v8, %v1792_v36  ;;  %v2567_v38 = vor.u32 %v2566_v52, %v2565_v46  ;;  %v5914_v43 = vshll.u32 %v2544_v10, 8  ;;  %v975_v2 = vsel %vm974_vm0, %v5296_v42, %v973_v53 }
 0x1af   : > { %v5919_v59 = vpop.eup %4526  ;;  %v2295_v12 = vclz %v4045_v50  ;;  %vm2568_vm7 = vcmp.lt.s32.totalorder %v5888_v51, 1  ;;  %vm2571_vm10 = vcmp.lt.s32.totalorder %v5888_v51, 4  ;;  %vm976_vm8 = vcmp.eq.f32.partialorder %v5296_v42, 0.0 }
 0x1b0   : > { %7622 = vst [vmem:[#allocation24_spill] sm:$0xff] %v5919_v59  ;;  %vm2570_vm6 = vcmp.lt.s32.totalorder %v5888_v51, 3  ;;  %v2576_v24 = vsel %vm2568_vm7, %v2555_v57, %v2558_v61  ;;  %v2577_v10 = vsel %vm2571_vm10, %v2564_v30, 920167782  ;;  %v1613_v48 = vshrl.u32 %v1612_v45, 23 }
 0x1b1   : > { %v4046_v8 = vadd.s32 4294967294, %v2295_v12  ;;  %v2578_v53 = vsel %vm2570_vm6, %v2561_v18, %v2577_v10  ;;  %v2580_v50 = vsel %vm2568_vm7, %v2558_v61, %v2561_v18  ;;  %vm2569_vm0 = vcmp.lt.s32.totalorder %v5888_v51, 2 }
 0x1b2   : > { %v2573_v31 = vsel %vm2571_vm10, %v2561_v18, 2102212464  ;;  %v2581_v49 = vsel %vm2571_vm10, %v2567_v38, 1326507024  ;;  %v977_v54 = vand.u32 2147483648, %v5296_v42  ;;  %v2552_v6 = vshrl.u32 %v7574_v1, %v2551_v37 }
 0x1b3   : > { %vm4047_vm4 = vcmp.lt.s32.totalorder %v4046_v8, 0  ;;  %v2579_v12 = vsel %vm2569_vm0, %v2576_v24, %v2578_v53  ;;  %v2582_v45 = vsel %vm2570_vm6, %v2564_v30, %v2581_v49  ;;  %v4020_v52 = vadd.s32 4294967169, %v1613_v48  ;;  %v1051_v24 = vpop.permute.xlu1 %1050 }
 0x1b4   : > { %v2298_v36 = vsel %vm4047_vm4, 0, %v4046_v8  ;;  %v2583_v46 = vsel %vm2569_vm0, %v2580_v50, %v2582_v45  ;;  %v978_v18 = vsel %vm976_vm8, %v977_v54, %v975_v2  ;;  %v2572_v28 = vsel %vm2568_vm7, %v2552_v6, %v2555_v57 }
 0x1b5   : > { %v2299_v38 = vsub.s32 32, %v2298_v36  ;;  %v2303_v10 = vsub.s32 4294967266, %v2298_v36  ;;  %v2574_v37 = vsel %vm2570_vm6, %v2558_v61, %v2573_v31  ;;  %v7623_v42 = vxor.u32 2147483648, %v5846_v35 }
 0x1b6   : > { %v5948_v53 = vmul.u32.u64.low %v5914_v43, %v2583_v46  ;;  %v5949_v30 = vmul.u32.u64.high %v5914_v43, %v2583_v46, %v5948_v53  ;;  %v5952_v8 = vmul.u32.u64.low %v5914_v43, %v2579_v12  ;;  %v5953_v50 = vmul.u32.u64.high %v5914_v43, %v2579_v12, %v5952_v8 }
 0x1b7   : > { %v2415_v2 = vsel %vm7469_vm11, %v7623_v42, %v5846_v35  ;;  %v7624_v57 = vand.u32 2147483647, %v5859_v14  ;;  %v7625_v61 = vcvt.s32.f32 %v5830_v58  ;;  %v2283_v31 = vadd.s32 %v5820_v7, %v5828_v11 }
 0x1b8   : > { %v1619_v49 = vadd.s32 1, %v4020_v52  ;;  %vm7626_vm8 = vcmp.eq.s32.totalorder %v1048_v20, %v5905_v27  ;;  %vm7627_vm10 = vcmp.lt.f32.partialorder %v7620_v32, 5.0  ;;  %v7628_v54 = vmov 0  ;;  %v7641_v52 = vld [vmem:[#allocation15_spill] sm:$0xff] }
 0x1b9   : > { %v5965_v48 = vmul.f32 %v7625_v61, %v7624_v57  ;;  %vm5973_vm7 = vmand %vm7627_vm10, %vm7626_vm8  ;;  %v2575_v35 = vsel %vm2569_vm0, %v2572_v28, %v2574_v37  ;;  %v7631_v14 = vand.u32 2147483647, %v5871_v63  ;;  %vm1075_vm6 = vcmp.eq.s32.totalorder %v1051_v24, %v5905_v27 }
 0x1ba   : > { %v7629_v54 = vsel %vm5973_vm7, 4294967295, %v7628_v54  ;;  %vm2787_vm4 = vcmp.lt.f32.partialorder %v978_v18, 5.0  ;;  %4528 = vsinq.f32 %v5762_v39  ;;  %v7632_v7 = vand.u32 2147483647, %v7621_v26 }
 0x1bb   : > { %7630 = vst [vmem:[#allocation26_spill] sm:$0xff] %v7629_v54  ;;  %v1616_v58 = vand.u32 8388607, %v7631_v14  ;;  %v7633_v11 = vmov 0  ;;  %v2301_v20 = vshrl.u32 %v2283_v31, %v2299_v38  ;;  %vm1620_vm8 = vcmp.gt.s32.totalorder %v1619_v49, 0  ;;  %vm5989_vm10 = vmand %vm2787_vm4, %vm1075_vm6 }
 0x1bc   : > { %vm5985_vm11 = vcmp.le.f32.partialorder %v7632_v7, 0.7853982  ;;  %v7636_v32 = vmov 0  ;;  %v2304_v51 = vadd.s32 127, %v2303_v10  ;;  %vm2593_vm0 = vc.u32 %v5949_v30, %v5952_v8 }
 0x1bd   : > { %v7634_v11 = vsel %vm5985_vm11, 4294967295, %v7633_v11  ;;  %v7637_v32 = vsel %vm5989_vm10, 4294967295, %v7636_v32  ;;  %v2594_v28 = vadd.s32 1, %v5953_v50  ;;  %v1621_v6 = vsel %vm1620_vm8, %v1619_v49, 0 }
 0x1be   : > { %7635 = vst [vmem:[#allocation42_spill] sm:$0xff] %v7634_v11  ;;  %7638 = vst [vmem:[#allocation43_spill] sm:$0xff] %v7637_v32  ;;  %v6003_v39 = vsel %vm5985_vm11, %v7621_v26, %v2415_v2  ;;  %v2300_v12 = vshll.u32 %v5890_v56, %v2298_v36  ;;  %v2591_v45 = vmul.u32 %v5914_v43, %v2575_v35  ;;  %v1623_v46 = vand.u32 31, %v1621_v6 }
 0x1bf   : > { %v2595_v38 = vsel %vm2593_vm0, %v2594_v28, %v5953_v50  ;;  %v1617_v10 = vor.u32 8388608, %v1616_v58  ;;  %v6009_v37 = vmul.f32 0.62831855, %v978_v18  ;;  %v931_v2 = vmul.f32 %v5705_v3, %v5114_v17  ;;  %v1030_v28 = vpop.permute.xlu0 %1029 }
 0x1c0   : > { %v6011_v24 = vor.u32 %v2301_v20, %v2300_v12  ;;  %v2596_v53 = vadd.s32 %v2595_v38, %v2591_v45  ;;  %v1624_v42 = vsub.s32 32, %v1623_v46  ;;  %v2305_v57 = vshll.u32 %v2304_v51, 23 }
 0x1c1   : > { %7639 = vst [vmem:[#allocation44_spill] sm:$0xff] %v6009_v37  ;;  %v1622_v61 = vshrl.u32 %v1621_v6, 5  ;;  %v1626_v56 = vshll.u32 %v7574_v1, %v1623_v46  ;;  %v1629_v43 = vshll.u32 %v7567_v0, %v1623_v46  ;;  %v1632_v50 = vshll.u32 %v7568_v5, %v1623_v46 }
 0x1c2   : > { %v2597_v36 = vadd.s32 536870912, %v2596_v53  ;;  %v1627_v31 = vshrl.u32 %v7567_v0, %v1624_v42  ;;  %v1635_v18 = vshll.u32 %v7569_v62, %v1623_v46  ;;  %v1630_v49 = vshrl.u32 %v7568_v5, %v1624_v42 }
 0x1c3   : > { %v1633_v35 = vshrl.u32 %v7569_v62, %v1624_v42  ;;  %v1636_v14 = vshrl.u32 %v7570_v19, %v1624_v42  ;;  %v1639_v3 = vshrl.u32 %v7572_v16, %v1624_v42  ;;  %v1638_v20 = vshll.u32 %v7570_v19, %v1623_v46 }
 0x1c4   : > { %v6024_v58 = vshrl.u32 %v2597_v36, 30  ;;  %v1628_v7 = vor.u32 %v1627_v31, %v1626_v56  ;;  %v6027_v51 = vshll.u32 %v1617_v10, 8  ;;  %v2306_v6 = vor.u32 4788187, %v2305_v57 }
 0x1c5   : > { %v1631_v12 = vor.u32 %v1630_v49, %v1629_v43  ;;  %v1634_v45 = vor.u32 %v1633_v35, %v1632_v50  ;;  %v1637_v38 = vor.u32 %v1636_v14, %v1635_v18  ;;  %v1640_v32 = vor.u32 %v1639_v3, %v1638_v20 }
 0x1c6   : > { %7640 = vst [vmem:[#allocation45_spill] sm:$0xff] %v6024_v58  ;;  %v2599_v54 = vshll.u32 %v6024_v58, 30  ;;  %vm1641_vm4 = vcmp.lt.s32.totalorder %v1622_v61, 1  ;;  %v1625_v36 = vshrl.u32 %v7574_v1, %v1624_v42  ;;  %vm1644_vm8 = vcmp.lt.s32.totalorder %v1622_v61, 4 }
 0x1c7   : > { %v1649_v46 = vsel %vm1641_vm4, %v1628_v7, %v1631_v12  ;;  %v2436_v10 = vand.u32 2139095040, %v6009_v37  ;;  %vm1068_vm13 = vcmp.eq.s32.totalorder %v1030_v28, %v5905_v27  ;;  %vm1643_vm6 = vcmp.lt.s32.totalorder %v1622_v61, 3  ;;  %v6041_v31 = vpop.eup %4528 }
 0x1c8   : > { %v6037_v57 = vsub.s32 %v2596_v53, %v2599_v54  ;;  %v1646_v56 = vsel %vm1644_vm8, %v1634_v45, 2102212464  ;;  %v1650_v43 = vsel %vm1644_vm8, %v1637_v38, 920167782  ;;  %7642 = vst [vmem:[#allocation15_spill] sm:$0xff] %v6041_v31  ;;  %vm1642_vm9 = vcmp.lt.s32.totalorder %v1622_v61, 2 }
 0x1c9   : > { %v1645_v42 = vsel %vm1641_vm4, %v1625_v36, %v1628_v7  ;;  %v1651_v50 = vsel %vm1643_vm6, %v1634_v45, %v1650_v43  ;;  %v1653_v18 = vsel %vm1641_vm4, %v1631_v12, %v1634_v45  ;;  %v1647_v35 = vsel %vm1643_vm6, %v1631_v12, %v1646_v56 }
 0x1ca   : > { %v2602_v49 = vsub.s32 0, %v6037_v57  ;;  %v1652_v14 = vsel %vm1642_vm9, %v1649_v46, %v1651_v50  ;;  %v1654_v54 = vsel %vm1644_vm8, %v1640_v32, 1326507024  ;;  %v2309_v53 = vcvt.s32.f32 %v6011_v24  ;;  %v1033_v46 = vpop.permute.xlu1 %1032 }
 0x1cb   : > { %v1655_v3 = vsel %vm1643_vm6, %v1637_v38, %v1654_v54  ;;  %v6049_v20 = vmul.u32.u64.low %v6027_v51, %v1652_v14  ;;  %v6050_v11 = vmul.u32.u64.high %v6027_v51, %v1652_v14, %v6049_v20  ;;  %v2307_v58 = vand.u32 2147483647, %v2306_v6 }
 0x1cc   : > { %v4057_v7 = vmin.u32 %v2602_v49, %v6037_v57  ;;  %v1656_v36 = vsel %vm1642_vm9, %v1653_v18, %v1655_v3  ;;  %v2437_v43 = vshrl.u32 %v2436_v10, 23  ;;  %v1648_v45 = vsel %vm1642_vm9, %v1645_v42, %v1647_v35 }
 0x1cd   : > { %v6055_v26 = vmul.u32.u64.low %v6027_v51, %v1656_v36  ;;  %v6056_v12 = vmul.u32.u64.high %v6027_v51, %v1656_v36, %v6055_v26  ;;  %vm932_vm4 = vcmp.eq.f32.partialorder %v5114_v17, inf  ;;  %v7643_v61 = vand.u32 2147483647, %v6009_v37 }
 0x1ce   : > { %v2604_v32 = vclz %v4057_v7  ;;  %v4052_v24 = vadd.s32 4294967169, %v2437_v43  ;;  %v933_v56 = vsel %vm932_vm4, %v5114_v17, %v931_v2  ;;  %v7644_v6 = vxor.u32 2147483648, %v5965_v48 }
 0x1cf   : > { %v2440_v38 = vand.u32 8388607, %v7643_v61  ;;  %vm7645_vm6 = vcmp.lt.s32.totalorder %v7641_v52, 0  ;;  %v1796_v42 = vxor.u32 2147483648, %v5912_v34  ;;  %v1667_v26 = vadd.s32 1, %v6050_v11 }
 0x1d0   : > { %v1488_v10 = vsel %vm7645_vm6, %v7644_v6, %v5965_v48  ;;  %v935_v50 = vand.u32 2147483648, %v5114_v17  ;;  %v6070_v18 = vmul.f32 %v2309_v53, %v2307_v58  ;;  %v4058_v49 = vadd.s32 4294967294, %v2604_v32 }
 0x1d1   : > { %v2443_v35 = vadd.s32 1, %v4052_v24  ;;  %vm934_vm9 = vcmp.eq.f32.partialorder %v5114_v17, 0.0  ;;  %v1664_v2 = vmul.u32 %v6027_v51, %v1648_v45  ;;  %vm1666_vm8 = vc.u32 %v6056_v12, %v6049_v20 }
 0x1d2   : > { %v936_v14 = vsel %vm934_vm9, %v935_v50, %v933_v56  ;;  %vm1069_vm4 = vcmp.eq.s32.totalorder %v1033_v46, %v5905_v27  ;;  %vm4059_vm6 = vcmp.lt.s32.totalorder %v4058_v49, 0  ;;  %v1668_v48 = vsel %vm1666_vm8, %v1667_v26, %v6050_v11 }
 0x1d3   : > { %v2441_v54 = vor.u32 8388608, %v2440_v38  ;;  %vm2444_vm0 = vcmp.gt.s32.totalorder %v2443_v35, 0  ;;  %vm7646_vm1 = vcmp.lt.f32.partialorder %v5596_v25, 5.0  ;;  %v7647_v58 = vmov 0 }
 0x1d4   : > { %vm6082_vm5 = vmand %vm7646_vm1, %vm1068_vm13  ;;  %v2607_v17 = vsel %vm4059_vm6, 0, %v4058_v49  ;;  %v1669_v51 = vadd.s32 %v1668_v48, %v1664_v2  ;;  %v2445_v53 = vsel %vm2444_vm0, %v2443_v35, 0  ;;  %vm2781_vm7 = vcmp.lt.f32.partialorder %v936_v14, 5.0 }
 0x1d5   : > { %v7648_v58 = vsel %vm6082_vm5, 4294967295, %v7647_v58  ;;  %4530 = vcosq.f32 %v6003_v39  ;;  %v7650_v3 = vand.u32 2147483647, %v7641_v52  ;;  %vm7485_vm8 = vcmp.lt.s32.totalorder %v5612_v47, 0  ;;  %vm6094_vm10 = vmand %vm2781_vm7, %vm1069_vm4 }
 0x1d6   : > { %7649 = vst [vmem:[#allocation46_spill] sm:$0xff] %v7648_v58  ;;  %v2612_v28 = vsub.s32 4294967266, %v2607_v17  ;;  %v7653_v25 = vmov 0  ;;  %v6106_v36 = vsel %vm7485_vm8, %v1796_v42, %v5912_v34  ;;  %v1670_v43 = vadd.s32 536870912, %v1669_v51 }
 0x1d7   : > { %vm6089_vm9 = vcmp.le.f32.partialorder %v7650_v3, 0.7853982  ;;  %v7654_v25 = vsel %vm6094_vm10, 4294967295, %v7653_v25  ;;  %v2447_v45 = vand.u32 31, %v2445_v53  ;;  %v2592_v24 = vadd.s32 %v5952_v8, %v5949_v30 }
 0x1d8   : > { %7655 = vst [vmem:[#allocation47_spill] sm:$0xff] %v7654_v25  ;;  %v6101_v7 = vsel %vm6089_vm9, %v7641_v52, %v1488_v10  ;;  %v6115_v61 = vshll.u32 %v2441_v54, 8  ;;  %v6119_v38 = vmul.f32 %v5722_v55, %v5633_v40  ;;  %v2608_v34 = vsub.s32 32, %v2607_v17 }
 0x1d9   : > { %v6121_v46 = vshrl.u32 %v1670_v43, 30  ;;  %v2448_v56 = vsub.s32 32, %v2447_v45  ;;  %v6123_v6 = vmul.f32 0.62831855, %v936_v14  ;;  %v2609_v10 = vshll.u32 %v6037_v57, %v2607_v17 }
 0x1da   : > { %v2613_v42 = vadd.s32 127, %v2612_v28  ;;  %v2446_v26 = vshrl.u32 %v2445_v53, 5  ;;  %v2450_v50 = vshll.u32 %v7574_v1, %v2447_v45  ;;  %v2453_v49 = vshll.u32 %v7567_v0, %v2447_v45 }
 0x1db   : > { %7656 = vst [vmem:[#allocation48_spill] sm:$0xff] %v6121_v46  ;;  %v1672_v30 = vshll.u32 %v6121_v46, 30  ;;  %v2451_v8 = vshrl.u32 %v7567_v0, %v2448_v56  ;;  %v2454_v55 = vshrl.u32 %v7568_v5, %v2448_v56  ;;  %v2456_v35 = vshll.u32 %v7568_v5, %v2447_v45 }
 0x1dc   : > { %v2457_v2 = vshrl.u32 %v7569_v62, %v2448_v56  ;;  %v2459_v14 = vshll.u32 %v7569_v62, %v2447_v45  ;;  %v2460_v57 = vshrl.u32 %v7570_v19, %v2448_v56  ;;  %v2610_v48 = vshrl.u32 %v2592_v24, %v2608_v34 }
 0x1dd   : > { %v6135_v54 = vsub.s32 %v1669_v51, %v1672_v30  ;;  %v2452_v17 = vor.u32 %v2451_v8, %v2450_v50  ;;  %v2455_v53 = vor.u32 %v2454_v55, %v2453_v49  ;;  %v7657_v3 = vand.u32 2147483647, %v5612_v47 }
 0x1de   : > { %v7658_v28 = vmov 0  ;;  %vm7486_vm7 = vcmp.lt.s32.totalorder %v5628_v29, 0  ;;  %v2458_v43 = vor.u32 %v2457_v2, %v2456_v35  ;;  %v2461_v32 = vor.u32 %v2460_v57, %v2459_v14 }
 0x1df   : > { %vm6139_vm13 = vcmp.le.f32.partialorder %v7657_v3, 0.7853982  ;;  %v2462_v58 = vshll.u32 %v7570_v19, %v2447_v45  ;;  %v2463_v25 = vshrl.u32 %v7572_v16, %v2448_v56  ;;  %v2614_v59 = vshll.u32 %v2613_v42, 23 }
 0x1e0   : > { %v7659_v28 = vsel %vm6139_vm13, 4294967295, %v7658_v28  ;;  %v1675_v51 = vsub.s32 0, %v6135_v54  ;;  %v2449_v24 = vshrl.u32 %v7574_v1, %v2448_v56  ;;  %vm2465_vm0 = vcmp.lt.s32.totalorder %v2446_v26, 1  ;;  %v1054_v56 = vpop.permute.xlu0 %1053 }
 0x1e1   : > { %7660 = vst [vmem:[#allocation49_spill] sm:$0xff] %v7659_v28  ;;  %v2464_v34 = vor.u32 %v2463_v25, %v2462_v58  ;;  %vm2467_vm4 = vcmp.lt.s32.totalorder %v2446_v26, 3  ;;  %vm2468_vm6 = vcmp.lt.s32.totalorder %v2446_v26, 4  ;;  %v2473_v50 = vsel %vm2465_vm0, %v2452_v17, %v2455_v53 }
 0x1e2   : > { %v4021_v30 = vmin.u32 %v1675_v51, %v6135_v54  ;;  %v2470_v8 = vsel %vm2468_vm6, %v2458_v43, 2102212464  ;;  %v2474_v49 = vsel %vm2468_vm6, %v2461_v32, 920167782  ;;  %v2477_v55 = vsel %vm2465_vm0, %v2455_v53, %v2458_v43  ;;  %v6152_v2 = vpop.eup %4530 }
 0x1e3   : > { %v2611_v45 = vor.u32 %v2610_v48, %v2609_v10  ;;  %vm2466_vm1 = vcmp.lt.s32.totalorder %v2446_v26, 2  ;;  %v2475_v42 = vsel %vm2467_vm4, %v2458_v43, %v2474_v49  ;;  %v2478_v35 = vsel %vm2468_vm6, %v2464_v34, 1326507024  ;;  %7661 = vst [vmem:[#allocation50_spill] sm:$0xff] %v6152_v2 }
 0x1e4   : > { %v1677_v14 = vclz %v4021_v30  ;;  %v2469_v58 = vsel %vm2465_vm0, %v2449_v24, %v2452_v17  ;;  %v2476_v25 = vsel %vm2466_vm1, %v2473_v50, %v2475_v42  ;;  %v2479_v57 = vsel %vm2467_vm4, %v2461_v32, %v2478_v35  ;;  %v1057_v42 = vpop.permute.xlu1 %1056 }
 0x1e5   : > { %v7662_v3 = vand.u32 2147483647, %v5628_v29  ;;  %v2471_v10 = vsel %vm2467_vm4, %v2455_v53, %v2470_v8  ;;  %v2480_v48 = vsel %vm2466_vm1, %v2477_v55, %v2479_v57  ;;  %v2615_v17 = vor.u32 4788187, %v2614_v59 }
 0x1e6   : > { %v6166_v43 = vmul.u32.u64.low %v6115_v61, %v2476_v25  ;;  %v6167_v34 = vmul.u32.u64.high %v6115_v61, %v2476_v25, %v6166_v43  ;;  %v4022_v24 = vadd.s32 4294967294, %v1677_v14  ;;  %4532 = vsinq.f32 %v6003_v39 }
 0x1e7   : > { %vm6159_vm8 = vcmp.le.f32.partialorder %v7662_v3, 0.7853982  ;;  %v6171_v50 = vmul.u32.u64.low %v6115_v61, %v2480_v48  ;;  %v6172_v32 = vmul.u32.u64.high %v6115_v61, %v2480_v48, %v6171_v50  ;;  %v1818_v53 = vand.u32 2139095040, %v6123_v6 }
 0x1e8   : > { %4534 = vcosq.f32 %v6101_v7  ;;  %v1800_v59 = vsel %vm6139_vm13, %v5612_v47, %v6106_v36  ;;  %v7665_v30 = vxor.u32 2147483648, %v6070_v18  ;;  %v2472_v39 = vsel %vm2466_vm1, %v2469_v58, %v2471_v10 }
 0x1e9   : > { %vm4023_vm4 = vcmp.lt.s32.totalorder %v4022_v24, 0  ;;  %v2491_v49 = vadd.s32 1, %v6167_v34  ;;  %v1819_v55 = vshrl.u32 %v1818_v53, 23  ;;  %vm988_vm0 = vcmp.eq.f32.partialorder %v5633_v40, inf }
 0x1ea   : > { %v2312_v8 = vsel %vm7486_vm7, %v7665_v30, %v6070_v18  ;;  %v2616_v35 = vand.u32 2147483647, %v2615_v17  ;;  %v2618_v14 = vcvt.s32.f32 %v2611_v45  ;;  %v7489_v25 = vand.u32 2147483647, %v6123_v6 }
 0x1eb   : > { %v989_v36 = vsel %vm988_vm0, %v5633_v40, %v6119_v38  ;;  %v2488_v57 = vmul.u32 %v6115_v61, %v2472_v39  ;;  %vm2490_vm7 = vc.u32 %v6172_v32, %v6166_v43  ;;  %v4028_v18 = vadd.s32 4294967169, %v1819_v55 }
 0x1ec   : > { %v991_v26 = vand.u32 2147483648, %v5633_v40  ;;  %v6198_v58 = vsel %vm4023_vm4, 0, %v4022_v24  ;;  %v2492_v3 = vsel %vm2490_vm7, %v2491_v49, %v6167_v34  ;;  %vm990_vm1 = vcmp.eq.f32.partialorder %v5633_v40, 0.0 }
 0x1ed   : > { %vm1077_vm6 = vcmp.eq.s32.totalorder %v1057_v42, %v5905_v27  ;;  %4536 = vsinq.f32 %v6101_v7  ;;  %v2493_v45 = vadd.s32 %v2492_v3, %v2488_v57  ;;  %v1825_v38 = vadd.s32 1, %v4028_v18 }
 0x1ee   : > { %v992_v10 = vsel %vm990_vm1, %v991_v26, %v989_v36  ;;  %v6207_v61 = vsel %vm6159_vm8, %v5628_v29, %v2312_v8  ;;  %v6209_v48 = vmul.f32 %v2618_v14, %v2616_v35  ;;  %vm7666_vm0 = vcmp.eq.s32.totalorder %v1054_v56, %v5905_v27 }
 0x1ef   : > { %vm7667_vm7 = vcmp.lt.f32.partialorder %v5766_v44, 5.0  ;;  %v7668_v40 = vmov 0  ;;  %v1822_v7 = vand.u32 8388607, %v7489_v25  ;;  %vm2789_vm5 = vcmp.lt.f32.partialorder %v992_v10, 5.0 }
 0x1f0   : > { %vm6215_vm4 = vmand %vm7667_vm7, %vm7666_vm0  ;;  %4538 = vcosq.f32 %v1800_v59  ;;  %v1685_v34 = vsub.s32 4294967266, %v6198_v58  ;;  %v2494_v17 = vadd.s32 536870912, %v2493_v45  ;;  %vm1826_vm1 = vcmp.gt.s32.totalorder %v1825_v38, 0 }
 0x1f1   : > { %v7669_v40 = vsel %vm6215_vm4, 4294967295, %v7668_v40  ;;  %vm6222_vm10 = vmand %vm2789_vm5, %vm1077_vm6  ;;  %v7671_v24 = vmov 0  ;;  %4540 = vsinq.f32 %v1800_v59  ;;  %v1827_v56 = vsel %vm1826_vm1, %v1825_v38, 0 }
 0x1f2   : > { %7670 = vst [vmem:[#allocation51_spill] sm:$0xff] %v7669_v40  ;;  %v7672_v24 = vsel %vm6222_vm10, 4294967295, %v7671_v24  ;;  %4542 = vcosq.f32 %v6207_v61  ;;  %v6231_v44 = vshrl.u32 %v2494_v17, 30  ;;  %v1829_v50 = vand.u32 31, %v1827_v56 }
 0x1f3   : > { %7673 = vst [vmem:[#allocation52_spill] sm:$0xff] %v7672_v24  ;;  %v1665_v30 = vadd.s32 %v6049_v20, %v6056_v12  ;;  %v1681_v8 = vsub.s32 32, %v6198_v58  ;;  %v1823_v39 = vor.u32 8388608, %v1822_v7  ;;  %v1686_v59 = vadd.s32 127, %v1685_v34  ;;  %v6240_v35 = vpop.eup %4532 }
 0x1f4   : > { %7674 = vst [vmem:[#allocation53_spill] sm:$0xff] %v6231_v44  ;;  %v2496_v49 = vshll.u32 %v6231_v44, 30  ;;  %v1830_v55 = vsub.s32 32, %v1829_v50  ;;  %v6238_v42 = vmul.f32 0.62831855, %v992_v10  ;;  %7676 = vst [vmem:[#allocation55_spill] sm:$0xff] %v6240_v35  ;;  %v1832_v36 = vshll.u32 %v7574_v1, %v1829_v50 }
 0x1f5   : > { %v1828_v14 = vshrl.u32 %v1827_v56, 5  ;;  %v1835_v57 = vshll.u32 %v7567_v0, %v1829_v50  ;;  %v1838_v18 = vshll.u32 %v7568_v5, %v1829_v50  ;;  %v6245_v26 = vpop.eup %4534  ;;  %v1841_v38 = vshll.u32 %v7569_v62, %v1829_v50 }
 0x1f6   : > { %7675 = vst [vmem:[#allocation54_spill] sm:$0xff] %v6238_v42  ;;  %v6247_v20 = vsub.s32 %v2493_v45, %v2496_v49  ;;  %v1833_v12 = vshrl.u32 %v7567_v0, %v1830_v55  ;;  %v1836_v3 = vshrl.u32 %v7568_v5, %v1830_v55  ;;  %v1839_v10 = vshrl.u32 %v7569_v62, %v1830_v55 }
 0x1f7   : > { %v1842_v7 = vshrl.u32 %v7570_v19, %v1830_v55  ;;  %v1844_v34 = vshll.u32 %v7570_v19, %v1829_v50  ;;  %v1845_v17 = vshrl.u32 %v7572_v16, %v1830_v55  ;;  %v1863_v45 = vshll.u32 %v1823_v39, 8 }
 0x1f8   : > { %v2499_v56 = vsub.s32 0, %v6247_v20  ;;  %v1834_v25 = vor.u32 %v1833_v12, %v1832_v36  ;;  %v1837_v53 = vor.u32 %v1836_v3, %v1835_v57  ;;  %v1683_v49 = vshrl.u32 %v1665_v30, %v1681_v8 }
 0x1f9   : > { %v1840_v40 = vor.u32 %v1839_v10, %v1838_v18  ;;  %v1843_v24 = vor.u32 %v1842_v7, %v1841_v38  ;;  %v1846_v28 = vor.u32 %v1845_v17, %v1844_v34  ;;  %v1687_v47 = vshll.u32 %v1686_v59, 23 }
 0x1fa   : > { %v4053_v44 = vmin.u32 %v2499_v56, %v6247_v20  ;;  %vm1847_vm6 = vcmp.lt.s32.totalorder %v1828_v14, 1  ;;  %v2642_v2 = vand.u32 2139095040, %v6238_v42  ;;  %v6260_v50 = vpop.eup %4536  ;;  %v1831_v35 = vshrl.u32 %v7574_v1, %v1830_v55 }
 0x1fb   : > { %vm1848_vm7 = vcmp.lt.s32.totalorder %v1828_v14, 2  ;;  %vm1850_vm1 = vcmp.lt.s32.totalorder %v1828_v14, 4  ;;  %v1855_v36 = vsel %vm1847_vm6, %v1834_v25, %v1837_v53  ;;  %vm1849_vm0 = vcmp.lt.s32.totalorder %v1828_v14, 3 }
 0x1fc   : > { %v2501_v39 = vclz %v4053_v44  ;;  %v1852_v57 = vsel %vm1850_vm1, %v1840_v40, 2102212464  ;;  %v1856_v30 = vsel %vm1850_vm1, %v1843_v24, 920167782  ;;  %v1851_v18 = vsel %vm1847_vm6, %v1831_v35, %v1834_v25 }
 0x1fd   : > { %v6263_v8 = vpop.eup %4538  ;;  %v1857_v59 = vsel %vm1849_vm0, %v1840_v40, %v1856_v30  ;;  %v1859_v12 = vsel %vm1847_vm6, %v1837_v53, %v1840_v40  ;;  %v1860_v3 = vsel %vm1850_vm1, %v1846_v28, 1326507024  ;;  %v1853_v7 = vsel %vm1849_vm0, %v1837_v53, %v1852_v57 }
 0x1fe   : > { %7677 = vst [vmem:[#allocation56_spill] sm:$0xff] %v6263_v8  ;;  %v6265_v38 = vpop.eup %4540  ;;  %v4054_v10 = vadd.s32 4294967294, %v2501_v39  ;;  %v1858_v34 = vsel %vm1848_vm7, %v1855_v36, %v1857_v59  ;;  %v1861_v55 = vsel %vm1849_vm0, %v1843_v24, %v1860_v3  ;;  %v1682_v44 = vshll.u32 %v6135_v54, %v6198_v58 }
 0x1ff   : > { %7678 = vst [vmem:[#allocation57_spill] sm:$0xff] %v6265_v38  ;;  %v6268_v17 = vpop.eup %4542  ;;  %v1862_v56 = vsel %vm1848_vm7, %v1859_v12, %v1861_v55  ;;  %v6273_v31 = vmul.u32.u64.low %v1863_v45, %v1858_v34  ;;  %v6274_v8 = vmul.u32.u64.high %v1863_v45, %v1858_v34, %v6273_v31  ;;  %v2643_v40 = vshrl.u32 %v2642_v2, 23 }
 0x200   : > { %vm4055_vm5 = vcmp.lt.s32.totalorder %v4054_v10, 0  ;;  %v6276_v25 = vmul.u32.u64.low %v1863_v45, %v1862_v56  ;;  %v6277_v28 = vmul.u32.u64.high %v1863_v45, %v1862_v56, %v6276_v25  ;;  %4544 = vsinq.f32 %v6207_v61  ;;  %v7681_v61 = vld [vmem:[#allocation9_spill] sm:$0xff] }
 0x201   : > { %v1688_v53 = vor.u32 4788187, %v1687_v47  ;;  %v2504_v35 = vsel %vm4055_vm5, 0, %v4054_v10  ;;  %v1854_v24 = vsel %vm1848_vm7, %v1851_v18, %v1853_v7  ;;  %v7679_v36 = vxor.u32 2147483648, %v6209_v48  ;;  %v7682_v47 = vld [vmem:[#allocation12_spill] sm:$0xff]  ;;  %v4484_v25 = vld [vmem:[%s4914_s17 + $0x8] sm:$0xff]  }
 0x202   : > { %vm7680_vm0 = vcmp.lt.s32.totalorder %v5803_v15, 0  ;;  %v1684_v58 = vor.u32 %v1683_v49, %v1682_v44  ;;  %v7501_v39 = vand.u32 2147483647, %v6238_v42  ;;  %v4060_v57 = vadd.s32 4294967169, %v2643_v40  ;;  %4248 = vmatprep.subr.bf16.mxu0 %v4484_v25  ;;  %4338 = vmatprep.subr.bf16.mxu1 %v4484_v25 }
 0x203   : > { %v6286_v54 = vsel %vm7680_vm0, %v7679_v36, %v6209_v48  ;;  %v2505_v30 = vsub.s32 32, %v2504_v35  ;;  %v2509_v59 = vsub.s32 4294967266, %v2504_v35  ;;  %v1873_v2 = vadd.s32 1, %v6274_v8  ;;  %4249 = vmatpush3.bf16.msra.mxu0 %v4484_v25  ;;  %4346 = vmatpush3.bf16.msra.mxu1 %v4484_v25 }
 0x204   : > { %v938_v12 = vmul.f32 %v7682_v47, %v7681_v61  ;;  %v2489_v14 = vadd.s32 %v6166_v43, %v6172_v32  ;;  %v1870_v18 = vmul.u32 %v1863_v45, %v1854_v24  ;;  %v6295_v3 = vadd.s32 %v6273_v31, %v6277_v28  ;;  %v7683_v43 = vld [vmem:[#allocation10_spill] sm:$0xff] }
 0x205   : > { %vm1872_vm5 = vc.u32 %v6277_v28, %v6273_v31  ;;  %v1689_v48 = vand.u32 2147483647, %v1688_v53  ;;  %v2649_v10 = vadd.s32 1, %v4060_v57  ;;  %vm939_vm6 = vcmp.eq.f32.partialorder %v7681_v61, inf  ;;  %v7684_v32 = vld [vmem:[#allocation18_spill] sm:$0xff]  ;;  %v4485_v53 = vld [vmem:[%s4914_s17] sm:$0xff]  }
 0x206   : > { %v1874_v49 = vsel %vm1872_vm5, %v1873_v2, %v6274_v8  ;;  %v1691_v7 = vcvt.s32.f32 %v1684_v58  ;;  %v2646_v55 = vand.u32 8388607, %v7501_v39  ;;  %v945_v45 = vmul.f32 %v7684_v32, %v7683_v43  ;;  %4250 = vmatprep.subr.bf16.mxu0 %v4485_v53  ;;  %4339 = vmatprep.subr.bf16.mxu1 %v4485_v53 }
 0x207   : > { %v1875_v34 = vadd.s32 %v1874_v49, %v1870_v18  ;;  %v2507_v44 = vshrl.u32 %v2489_v14, %v2505_v30  ;;  %v2510_v56 = vadd.s32 127, %v2509_v59  ;;  %vm2650_vm7 = vcmp.gt.s32.totalorder %v2649_v10, 0  ;;  %4251 = vmatpush3.bf16.msra.mxu0 %v4485_v53  ;;  %4347 = vmatpush3.bf16.msra.mxu1 %v4485_v53 }
 0x208   : > { %v940_v31 = vsel %vm939_vm6, %v7681_v61, %v938_v12  ;;  %v2651_v8 = vsel %vm2650_vm7, %v2649_v10, 0  ;;  %vm941_vm1 = vcmp.eq.f32.partialorder %v7681_v61, 0.0  ;;  %v942_v40 = vand.u32 2147483648, %v7681_v61 }
 0x209   : > { %v1876_v28 = vadd.s32 536870912, %v1875_v34  ;;  %v6309_v24 = vmul.f32 %v1691_v7, %v1689_v48  ;;  %v2506_v36 = vshll.u32 %v6247_v20, %v2504_v35  ;;  %v2653_v58 = vand.u32 31, %v2651_v8 }
 0x20a   : > { %vm946_vm0 = vcmp.eq.f32.partialorder %v7683_v43, inf  ;;  %v2647_v30 = vor.u32 8388608, %v2646_v55  ;;  %v6315_v59 = vsel %vm941_vm1, %v942_v40, %v940_v31  ;;  %v2511_v47 = vshll.u32 %v2510_v56, 23 }
 0x20b   : > { %v6313_v57 = vshrl.u32 %v1876_v28, 30  ;;  %v947_v2 = vsel %vm946_vm0, %v7683_v43, %v945_v45  ;;  %v6318_v61 = vor.u32 %v2507_v44, %v2506_v36  ;;  %v2652_v12 = vshrl.u32 %v2651_v8, 5 }
 0x20c   : > { %v2654_v14 = vsub.s32 32, %v2653_v58  ;;  %v2656_v35 = vshll.u32 %v7574_v1, %v2653_v58  ;;  %v2659_v18 = vshll.u32 %v7567_v0, %v2653_v58  ;;  %v2662_v48 = vshll.u32 %v7568_v5, %v2653_v58 }
 0x20d   : > { %7685 = vst [vmem:[#allocation9_spill] sm:$0xff] %v6313_v57  ;;  %v1878_v20 = vshll.u32 %v6313_v57, 30  ;;  %v2665_v55 = vshll.u32 %v7569_v62, %v2653_v58  ;;  %v6328_v32 = vpop.eup %4544  ;;  %v7686_v45 = vand.u32 2147483647, %v5803_v15  ;;  %v7687_v44 = vmov 0 }
 0x20e   : > { %v2657_v49 = vshrl.u32 %v7567_v0, %v2654_v14  ;;  %v2660_v10 = vshrl.u32 %v7568_v5, %v2654_v14  ;;  %v2663_v7 = vshrl.u32 %v7569_v62, %v2654_v14  ;;  %v2666_v31 = vshrl.u32 %v7570_v19, %v2654_v14 }
 0x20f   : > { %vm6332_vm5 = vcmp.le.f32.partialorder %v7686_v45, 0.7853982  ;;  %v6336_v56 = vsub.s32 %v1875_v34, %v1878_v20  ;;  %v2669_v25 = vshrl.u32 %v7572_v16, %v2654_v14  ;;  %v6340_v28 = vshll.u32 %v2647_v30, 8 }
 0x210   : > { %v7688_v44 = vsel %vm6332_vm5, 4294967295, %v7687_v44  ;;  %v2658_v8 = vor.u32 %v2657_v49, %v2656_v35  ;;  %v2661_v40 = vor.u32 %v2660_v10, %v2659_v18  ;;  %v2664_v36 = vor.u32 %v2663_v7, %v2662_v48  ;;  %v7691_v7 = vld [vmem:[#allocation23_spill] sm:$0xff] }
 0x211   : > { %7689 = vst [vmem:[#allocation12_spill] sm:$0xff] %v7688_v44  ;;  %v2668_v39 = vshll.u32 %v7570_v19, %v2653_v58  ;;  %v1881_v45 = vsub.s32 0, %v6336_v56  ;;  %v2667_v57 = vor.u32 %v2666_v31, %v2665_v55  ;;  %vm948_vm6 = vcmp.eq.f32.partialorder %v7683_v43, 0.0 }
 0x212   : > { %v949_v34 = vand.u32 2147483648, %v7683_v43  ;;  %v2512_v20 = vor.u32 4788187, %v2511_v47  ;;  %vm2674_vm7 = vcmp.lt.s32.totalorder %v2652_v12, 4  ;;  %v6347_v30 = vmul.f32 0.62831855, %v6315_v59 }
 0x213   : > { %v2670_v38 = vor.u32 %v2669_v25, %v2668_v39  ;;  %v4029_v53 = vmin.u32 %v1881_v45, %v6336_v56  ;;  %vm2671_vm1 = vcmp.lt.s32.totalorder %v2652_v12, 1  ;;  %v2676_v35 = vsel %vm2674_vm7, %v2664_v36, 2102212464  ;;  %v7690_v43 = vld [vmem:[#allocation21_spill] sm:$0xff] }
 0x214   : > { %v950_v18 = vsel %vm948_vm6, %v949_v34, %v947_v2  ;;  %v2655_v58 = vshrl.u32 %v7574_v1, %v2654_v14  ;;  %vm2673_vm0 = vcmp.lt.s32.totalorder %v2652_v12, 3  ;;  %v2679_v48 = vsel %vm2671_vm1, %v2658_v8, %v2661_v40 }
 0x215   : > { %v2680_v49 = vsel %vm2674_vm7, %v2667_v57, 920167782  ;;  %vm1070_vm4 = vcmp.eq.s32.totalorder %v7690_v43, %v5905_v27  ;;  %vm7512_vm10 = vcmp.lt.s32.totalorder %v5871_v63, 0  ;;  %v1883_v39 = vclz %v4029_v53 }
 0x216   : > { %vm2672_vm13 = vcmp.lt.s32.totalorder %v2652_v12, 2  ;;  %v2681_v47 = vsel %vm2673_vm0, %v2664_v36, %v2680_v49  ;;  %v2683_v10 = vsel %vm2671_vm1, %v2661_v40, %v2664_v36  ;;  %v2675_v55 = vsel %vm2671_vm1, %v2655_v58, %v2658_v8 }
 0x217   : > { %v2677_v2 = vsel %vm2673_vm0, %v2661_v40, %v2676_v35  ;;  %v2682_v14 = vsel %vm2672_vm13, %v2679_v48, %v2681_v47  ;;  %v2684_v31 = vsel %vm2674_vm7, %v2670_v38, 1326507024  ;;  %v4030_v25 = vadd.s32 4294967294, %v1883_v39 }
 0x218   : > { %v2685_v45 = vsel %vm2673_vm0, %v2667_v57, %v2684_v31  ;;  %v6361_v34 = vmul.u32.u64.low %v6340_v28, %v2682_v14  ;;  %v6362_v46 = vmul.u32.u64.high %v6340_v28, %v2682_v14, %v6361_v34  ;;  %v2624_v36 = vsel %vm6332_vm5, %v5803_v15, %v6286_v54 }
 0x219   : > { %v2686_v53 = vsel %vm2672_vm13, %v2683_v10, %v2685_v45  ;;  %v6370_v8 = vmul.f32 0.62831855, %v950_v18  ;;  %v1921_v40 = vand.u32 2139095040, %v6347_v30  ;;  %v7692_v38 = vand.u32 2147483647, %v5871_v63 }
 0x21a   : > { %v7693_v57 = vmov 0  ;;  %vm4031_vm7 = vcmp.lt.s32.totalorder %v4030_v25, 0  ;;  %v2678_v35 = vsel %vm2672_vm13, %v2675_v55, %v2677_v2  ;;  %v1693_v54 = vxor.u32 2147483648, %v6309_v24 }
 0x21b   : > { %vm6375_vm6 = vcmp.le.f32.partialorder %v7692_v38, 0.7853982  ;;  %v6381_v58 = vmul.u32.u64.low %v6340_v28, %v2686_v53  ;;  %v6382_v48 = vmul.u32.u64.high %v6340_v28, %v2686_v53, %v6381_v58  ;;  %v2515_v49 = vcvt.s32.f32 %v6318_v61 }
 0x21c   : > { %v7694_v57 = vsel %vm6375_vm6, 4294967295, %v7693_v57  ;;  %v1886_v39 = vsel %vm4031_vm7, 0, %v4030_v25  ;;  %v1922_v47 = vshrl.u32 %v1921_v40, 23  ;;  %v2513_v10 = vand.u32 2147483647, %v2512_v20 }
 0x21d   : > { %7695 = vst [vmem:[#allocation10_spill] sm:$0xff] %v7694_v57  ;;  %v1887_v14 = vsub.s32 32, %v1886_v39  ;;  %v1891_v31 = vsub.s32 4294967266, %v1886_v39  ;;  %v2697_v45 = vadd.s32 1, %v6362_v46  ;;  %v2694_v38 = vmul.u32 %v6340_v28, %v2678_v35 }
 0x21e   : > { %v7513_v12 = vand.u32 2147483647, %v6347_v30  ;;  %v4032_v55 = vadd.s32 4294967169, %v1922_v47  ;;  %v2024_v2 = vand.u32 2139095040, %v6370_v8  ;;  %v1888_v53 = vshll.u32 %v6336_v56, %v1886_v39 }
 0x21f   : > { %v1889_v58 = vshrl.u32 %v6295_v3, %v1887_v14  ;;  %v1892_v44 = vadd.s32 127, %v1891_v31  ;;  %vm2696_vm13 = vc.u32 %v6382_v48, %v6361_v34  ;;  %v1694_v61 = vsel %vm7512_vm10, %v1693_v54, %v6309_v24 }
 0x220   : > { %v2698_v20 = vsel %vm2696_vm13, %v2697_v45, %v6362_v46  ;;  %v1928_v28 = vadd.s32 1, %v4032_v55  ;;  %vm2782_vm1 = vcmp.lt.f32.partialorder %v6315_v59, 5.0  ;;  %v2516_v25 = vmul.f32 %v2515_v49, %v2513_v10 }
 0x221   : > { %v1890_v40 = vor.u32 %v1889_v58, %v1888_v53  ;;  %v1893_v35 = vshll.u32 %v1892_v44, 23  ;;  %v2699_v47 = vadd.s32 %v2698_v20, %v2694_v38  ;;  %v1925_v3 = vand.u32 8388607, %v7513_v12  ;;  %vm6404_vm11 = vmand %vm2782_vm1, %vm1070_vm4 }
 0x222   : > { %vm1929_vm0 = vcmp.gt.s32.totalorder %v1928_v28, 0  ;;  %v2025_v56 = vshrl.u32 %v2024_v2, 23  ;;  %vm2783_vm7 = vcmp.lt.f32.partialorder %v950_v18, 5.0  ;;  %4546 = vcosq.f32 %v2624_v36 }
 0x223   : > { %v1894_v46 = vor.u32 4788187, %v1893_v35  ;;  %v2700_v59 = vadd.s32 536870912, %v2699_v47  ;;  %v1930_v54 = vsel %vm1929_vm0, %v1928_v28, 0  ;;  %vm7698_vm13 = vcmp.eq.s32.totalorder %v7691_v7, %v5905_v27 }
 0x224   : > { %vm6411_vm10 = vmand %vm2783_vm7, %vm7698_vm13  ;;  %4548 = vsinq.f32 %v2624_v36  ;;  %v6418_v18 = vsel %vm6375_vm6, %v5871_v63, %v1694_v61  ;;  %vm7522_vm4 = vcmp.lt.s32.totalorder %v6009_v37, 0  ;;  %v1932_v43 = vand.u32 31, %v1930_v54 }
 0x225   : > { %v2517_v49 = vxor.u32 2147483648, %v2516_v25  ;;  %v1895_v27 = vand.u32 2147483647, %v1894_v46  ;;  %v1897_v7 = vcvt.s32.f32 %v1890_v40  ;;  %v6425_v39 = vshrl.u32 %v2700_v59, 30 }
 0x226   : > { %v1926_v10 = vor.u32 8388608, %v1925_v3  ;;  %v1931_v36 = vshrl.u32 %v1930_v54, 5  ;;  %v1933_v14 = vsub.s32 32, %v1932_v43  ;;  %v4036_v31 = vadd.s32 4294967169, %v2025_v56 }
 0x227   : > { %7701 = vst [vmem:[#allocation18_spill] sm:$0xff] %v6425_v39  ;;  %v6427_v45 = vmul.f32 %v1897_v7, %v1895_v27  ;;  %v2702_v38 = vshll.u32 %v6425_v39, 30  ;;  %v1935_v55 = vshll.u32 %v7574_v1, %v1932_v43  ;;  %v1938_v2 = vshll.u32 %v7567_v0, %v1932_v43 }
 0x228   : > { %v1936_v53 = vshrl.u32 %v7567_v0, %v1933_v14  ;;  %v1939_v58 = vshrl.u32 %v7568_v5, %v1933_v14  ;;  %v1941_v61 = vshll.u32 %v7568_v5, %v1932_v43  ;;  %v1942_v20 = vshrl.u32 %v7569_v62, %v1933_v14 }
 0x229   : > { %v7702_v28 = vand.u32 2147483647, %v6009_v37  ;;  %v7703_v40 = vmov 0  ;;  %v6442_v35 = vsub.s32 %v2699_v47, %v2702_v38  ;;  %v1944_v3 = vshll.u32 %v7569_v62, %v1932_v43 }
 0x22a   : > { %v1945_v56 = vshrl.u32 %v7570_v19, %v1933_v14  ;;  %v1948_v46 = vshrl.u32 %v7572_v16, %v1933_v14  ;;  %v1937_v59 = vor.u32 %v1936_v53, %v1935_v55  ;;  %v1940_v54 = vor.u32 %v1939_v58, %v1938_v2 }
 0x22b   : > { %vm6438_vm0 = vcmp.le.f32.partialorder %v7702_v28, 0.7853982  ;;  %v1943_v27 = vor.u32 %v1942_v20, %v1941_v61  ;;  %v1947_v7 = vshll.u32 %v7570_v19, %v1932_v43  ;;  %v2518_v12 = vsel %vm7522_vm4, %v2517_v49, %v2516_v25 }
 0x22c   : > { %v7704_v40 = vsel %vm6438_vm0, 4294967295, %v7703_v40  ;;  %v2705_v28 = vsub.s32 0, %v6442_v35  ;;  %v1946_v39 = vor.u32 %v1945_v56, %v1944_v3  ;;  %v7523_v47 = vand.u32 2147483647, %v6370_v8 }
 0x22d   : > { %7705 = vst [vmem:[#allocation21_spill] sm:$0xff] %v7704_v40  ;;  %v1949_v38 = vor.u32 %v1948_v46, %v1947_v7  ;;  %vm1953_vm7 = vcmp.lt.s32.totalorder %v1931_v36, 4  ;;  %v1966_v15 = vshll.u32 %v1926_v10, 8  ;;  %v2031_v57 = vadd.s32 1, %v4036_v31 }
 0x22e   : > { %v4061_v63 = vmin.u32 %v2705_v28, %v6442_v35  ;;  %v1934_v55 = vshrl.u32 %v7574_v1, %v1933_v14  ;;  %vm1950_vm13 = vcmp.lt.s32.totalorder %v1931_v36, 1  ;;  %v1955_v2 = vsel %vm1953_vm7, %v1943_v27, 2102212464 }
 0x22f   : > { %vm1951_vm1 = vcmp.lt.s32.totalorder %v1931_v36, 2  ;;  %vm1952_vm5 = vcmp.lt.s32.totalorder %v1931_v36, 3  ;;  %v1958_v43 = vsel %vm1950_vm13, %v1937_v59, %v1940_v54  ;;  %v1959_v25 = vsel %vm1953_vm7, %v1946_v39, 920167782  ;;  %v6456_v20 = vpop.eup %4546 }
 0x230   : > { %v2707_v49 = vclz %v4061_v63  ;;  %v1954_v53 = vsel %vm1950_vm13, %v1934_v55, %v1937_v59  ;;  %v1960_v58 = vsel %vm1952_vm5, %v1943_v27, %v1959_v25  ;;  %v1962_v61 = vsel %vm1950_vm13, %v1940_v54, %v1943_v27  ;;  %7706 = vst [vmem:[#allocation23_spill] sm:$0xff] %v6456_v20 }
 0x231   : > { %v1956_v10 = vsel %vm1952_vm5, %v1940_v54, %v1955_v2  ;;  %v1961_v31 = vsel %vm1951_vm1, %v1958_v43, %v1960_v58  ;;  %v1963_v3 = vsel %vm1953_vm7, %v1949_v38, 1326507024  ;;  %vm2032_vm4 = vcmp.gt.s32.totalorder %v2031_v57, 0  ;;  %v6460_v14 = vpop.eup %4548 }
 0x232   : > { %7707 = vst [vmem:[#allocation58_spill] sm:$0xff] %v6460_v14  ;;  %v4062_v56 = vadd.s32 4294967294, %v2707_v49  ;;  %v1964_v46 = vsel %vm1952_vm5, %v1946_v39, %v1963_v3  ;;  %v6462_v7 = vmul.u32.u64.low %v1966_v15, %v1961_v31  ;;  %v6463_v28 = vmul.u32.u64.high %v1966_v15, %v1961_v31, %v6462_v7  ;;  %v7709_v3 = vld [vmem:[#allocation11_spill] sm:$0xff] }
 0x233   : > { %4550 = vcosq.f32 %v6418_v18  ;;  %v2521_v63 = vsel %vm6438_vm0, %v6009_v37, %v2518_v12  ;;  %v1965_v59 = vsel %vm1951_vm1, %v1962_v61, %v1964_v46  ;;  %v2033_v54 = vsel %vm2032_vm4, %v2031_v57, 0 }
 0x234   : > { %vm4063_vm13 = vcmp.lt.s32.totalorder %v4062_v56, 0  ;;  %v6471_v27 = vmul.u32.u64.low %v1966_v15, %v1965_v59  ;;  %v6472_v38 = vmul.u32.u64.high %v1966_v15, %v1965_v59, %v6471_v27  ;;  %v2028_v39 = vand.u32 8388607, %v7523_v47 }
 0x235   : > { %4552 = vsinq.f32 %v6418_v18  ;;  %v2710_v55 = vsel %vm4063_vm13, 0, %v4062_v56  ;;  %v1957_v2 = vsel %vm1951_vm1, %v1954_v53, %v1956_v10  ;;  %v2035_v43 = vand.u32 31, %v2033_v54  ;;  %v7708_v10 = vld [vmem:[#allocation8_spill] sm:$0xff] }
 0x236   : > { %4554 = vcosq.f32 %v2521_v63  ;;  %v1976_v25 = vadd.s32 1, %v6463_v28  ;;  %v2695_v57 = vadd.s32 %v6361_v34, %v6382_v48  ;;  %v2715_v12 = vsub.s32 4294967266, %v2710_v55 }
 0x237   : > { %4556 = vsinq.f32 %v2521_v63  ;;  %v2036_v49 = vsub.s32 32, %v2035_v43  ;;  %v2711_v58 = vsub.s32 32, %v2710_v55  ;;  %v1973_v61 = vmul.u32 %v1966_v15, %v1957_v2 }
 0x238   : > { %vm1975_vm5 = vc.u32 %v6472_v38, %v6462_v7  ;;  %v2029_v31 = vor.u32 8388608, %v2028_v39  ;;  %v882_v56 = vmul.f32 %v7709_v3, %v7708_v10  ;;  %v6488_v63 = vshrl.u32 %v2033_v54, 5 }
 0x239   : > { %v1977_v18 = vsel %vm1975_vm5, %v1976_v25, %v6463_v28  ;;  %v2039_v36 = vshrl.u32 %v7567_v0, %v2036_v49  ;;  %v2042_v53 = vshrl.u32 %v7568_v5, %v2036_v49  ;;  %v2038_v34 = vshll.u32 %v7574_v1, %v2035_v43 }
 0x23a   : > { %v1978_v46 = vadd.s32 %v1977_v18, %v1973_v61  ;;  %v2045_v15 = vshrl.u32 %v7569_v62, %v2036_v49  ;;  %v2716_v48 = vadd.s32 127, %v2715_v12  ;;  %v2041_v59 = vshll.u32 %v7567_v0, %v2035_v43 }
 0x23b   : > { %v2047_v27 = vshll.u32 %v7569_v62, %v2035_v43  ;;  %v2048_v28 = vshrl.u32 %v7570_v19, %v2036_v49  ;;  %v2713_v39 = vshrl.u32 %v2695_v57, %v2711_v58  ;;  %v2040_v25 = vor.u32 %v2039_v36, %v2038_v34 }
 0x23c   : > { %v1979_v2 = vadd.s32 536870912, %v1978_v46  ;;  %v2044_v47 = vshll.u32 %v7568_v5, %v2035_v43  ;;  %v2043_v3 = vor.u32 %v2042_v53, %v2041_v59  ;;  %v2050_v54 = vshll.u32 %v7570_v19, %v2035_v43 }
 0x23d   : > { %v2049_v61 = vor.u32 %v2048_v28, %v2047_v27  ;;  %v2051_v18 = vshrl.u32 %v7572_v16, %v2036_v49  ;;  %v6500_v14 = vshll.u32 %v2029_v31, 8  ;;  %vm883_vm4 = vcmp.eq.f32.partialorder %v7708_v10, inf }
 0x23e   : > { %v6498_v20 = vshrl.u32 %v1979_v2, 30  ;;  %v2046_v12 = vor.u32 %v2045_v15, %v2044_v47  ;;  %v2712_v40 = vshll.u32 %v6442_v35, %v2710_v55  ;;  %v2717_v57 = vshll.u32 %v2716_v48, 23 }
 0x23f   : > { %v2052_v58 = vor.u32 %v2051_v18, %v2050_v54  ;;  %v884_v36 = vsel %vm883_vm4, %v7708_v10, %v882_v56  ;;  %v2037_v43 = vshrl.u32 %v7574_v1, %v2036_v49  ;;  %vm2053_vm1 = vcmp.lt.s32.totalorder %v6488_v63, 1  ;;  %v7714_v18 = vld [vmem:[#allocation16_spill] sm:$0xff] }
 0x240   : > { %v6505_v34 = vpop.eup %4550  ;;  %v1981_v53 = vshll.u32 %v6498_v20, 30  ;;  %vm2056_vm7 = vcmp.lt.s32.totalorder %v6488_v63, 4  ;;  %v2714_v47 = vor.u32 %v2713_v39, %v2712_v40  ;;  %v2061_v31 = vsel %vm2053_vm1, %v2040_v25, %v2043_v3 }
 0x241   : > { %7710 = vst [vmem:[#allocation8_spill] sm:$0xff] %v6505_v34  ;;  %v2062_v15 = vsel %vm2056_vm7, %v2049_v61, 920167782  ;;  %v2066_v35 = vsel %vm2056_vm7, %v2052_v58, 1326507024  ;;  %vm2055_vm13 = vcmp.lt.s32.totalorder %v6488_v63, 3  ;;  %v2065_v49 = vsel %vm2053_vm1, %v2043_v3, %v2046_v12 }
 0x242   : > { %v6513_v55 = vpop.eup %4552  ;;  %v6515_v48 = vsub.s32 %v1978_v46, %v1981_v53  ;;  %v2058_v56 = vsel %vm2056_vm7, %v2046_v12, 2102212464  ;;  %v2718_v40 = vor.u32 4788187, %v2717_v57  ;;  %vm2054_vm4 = vcmp.lt.s32.totalorder %v6488_v63, 2  ;;  %v7715_v58 = vld [vmem:[#allocation22_spill] sm:$0xff] }
 0x243   : > { %7711 = vst [vmem:[#allocation11_spill] sm:$0xff] %v6513_v55  ;;  %v6520_v59 = vpop.eup %4554  ;;  %v2063_v27 = vsel %vm2055_vm13, %v2046_v12, %v2062_v15  ;;  %v2067_v28 = vsel %vm2055_vm13, %v2049_v61, %v2066_v35  ;;  %v2057_v2 = vsel %vm2053_vm1, %v2037_v43, %v2040_v25  ;;  %v889_v53 = vmul.f32 %v7715_v58, %v7714_v18 }
 0x244   : > { %7712 = vst [vmem:[#allocation59_spill] sm:$0xff] %v6520_v59  ;;  %v6524_v39 = vpop.eup %4556  ;;  %v1984_v46 = vsub.s32 0, %v6515_v48  ;;  %v2064_v54 = vsel %vm2054_vm4, %v2061_v31, %v2063_v27  ;;  %v2059_v57 = vsel %vm2055_vm13, %v2043_v3, %v2058_v56  ;;  %v2068_v12 = vsel %vm2054_vm4, %v2065_v49, %v2067_v28 }
 0x245   : > { %7713 = vst [vmem:[#allocation60_spill] sm:$0xff] %v6524_v39  ;;  %v6537_v61 = vmul.u32.u64.low %v6500_v14, %v2064_v54  ;;  %v6538_v15 = vmul.u32.u64.high %v6500_v14, %v2064_v54, %v6537_v61  ;;  %v7716_v35 = vand.u32 2147483647, %v6123_v6  ;;  %v7717_v25 = vmov 0 }
 0x246   : > { %v1899_v43 = vxor.u32 2147483648, %v6427_v45  ;;  %v4033_v31 = vmin.u32 %v1984_v46, %v6515_v48  ;;  %vm885_vm13 = vcmp.eq.f32.partialorder %v7708_v10, 0.0  ;;  %v886_v3 = vand.u32 2147483648, %v7708_v10 }
 0x247   : > { %vm6543_vm1 = vcmp.le.f32.partialorder %v7716_v35, 0.7853982  ;;  %v2719_v56 = vand.u32 2147483647, %v2718_v40  ;;  %v2721_v49 = vcvt.s32.f32 %v2714_v47  ;;  %v2060_v58 = vsel %vm2054_vm4, %v2057_v2, %v2059_v57 }
 0x248   : > { %v7718_v25 = vsel %vm6543_vm1, 4294967295, %v7717_v25  ;;  %v6552_v27 = vmul.u32.u64.low %v6500_v14, %v2068_v12  ;;  %v6553_v28 = vmul.u32.u64.high %v6500_v14, %v2068_v12, %v6552_v27  ;;  %v1986_v54 = vclz %v4033_v31  ;;  %v4583_v31 = vld [vmem:[%s4885_s12] ss:$0 sm:$0xff] }
 0x249   : > { %v6557_v35 = vsel %vm885_vm13, %v886_v3, %v884_v36  ;;  %vm890_vm7 = vcmp.eq.f32.partialorder %v7714_v18, inf  ;;  %v2079_v46 = vadd.s32 1, %v6538_v15  ;;  %v893_v10 = vand.u32 2147483648, %v7714_v18  ;;  %v7722_v3 = vld [vmem:[#allocation19_spill] sm:$0xff] }
 0x24a   : > { %v891_v59 = vsel %vm890_vm7, %v7714_v18, %v889_v53  ;;  %v6564_v47 = vmul.f32 0.62831855, %v6557_v35  ;;  %v7719_v40 = vand.u32 2147483647, %v6347_v30  ;;  %v4034_v36 = vadd.s32 4294967294, %v1986_v54 }
 0x24b   : > { %v2004_v2 = vsub.s32 4, %v6498_v20  ;;  %vm892_vm4 = vcmp.eq.f32.partialorder %v7714_v18, 0.0  ;;  %v2722_v57 = vmul.f32 %v2721_v49, %v2719_v56  ;;  %v2076_v53 = vmul.u32 %v6500_v14, %v2060_v58  ;;  %v7724_v58 = vld [vmem:[#allocation20_spill] sm:$0xff] }
 0x24c   : > { %vm6569_vm0 = vcmp.le.f32.partialorder %v7719_v40, 0.7853982  ;;  %vm2078_vm7 = vc.u32 %v6553_v28, %v6537_v61  ;;  %v894_v12 = vsel %vm892_vm4, %v893_v10, %v891_v59  ;;  %vm7723_vm5 = vcmp.lt.s32.totalorder %v6123_v6, 0 }
 0x24d   : > { %v1900_v27 = vsel %vm7723_vm5, %v1899_v43, %v6427_v45  ;;  %vm4035_vm15 = vcmp.lt.s32.totalorder %v4034_v36, 0  ;;  %v2080_v54 = vsel %vm2078_vm7, %v2079_v46, %v6538_v15  ;;  %v6585_v49 = vmul.f32 0.62831855, %v894_v12 }
 0x24e   : > { %v1989_v18 = vsel %vm4035_vm15, 0, %v4034_v36  ;;  %v2081_v56 = vadd.s32 %v2080_v54, %v2076_v53  ;;  %v1097_v14 = vand.u32 2139095040, %v6564_v47  ;;  %v7725_v59 = vand.u32 2147483647, %v6238_v42 }
 0x24f   : > { %v7726_v10 = vmov 0  ;;  %v1974_v45 = vadd.s32 %v6462_v7, %v6472_v38  ;;  %v1990_v15 = vsub.s32 32, %v1989_v18  ;;  %v1994_v43 = vsub.s32 4294967266, %v1989_v18 }
 0x250   : > { %vm6591_vm13 = vcmp.le.f32.partialorder %v7725_v59, 0.7853982  ;;  %vm7729_vm15 = vcmp.lt.s32.totalorder %v6347_v30, 0  ;;  %v1903_v36 = vsel %vm6543_vm1, %v6123_v6, %v1900_v27  ;;  %v2723_v53 = vxor.u32 2147483648, %v2722_v57 }
 0x251   : > { %v7727_v10 = vsel %vm6591_vm13, 4294967295, %v7726_v10  ;;  %v2005_v46 = vsel %vm7729_vm15, %v2004_v2, %v6498_v20  ;;  %v2082_v54 = vadd.s32 536870912, %v2081_v56  ;;  %v1098_v40 = vshrl.u32 %v1097_v14, 23 }
 0x252   : > { %7728 = vst [vmem:[#allocation16_spill] sm:$0xff] %v7727_v10  ;;  %v1991_v59 = vshll.u32 %v6515_v48, %v1989_v18  ;;  %v1992_v39 = vshrl.u32 %v1974_v45, %v1990_v15  ;;  %v1995_v37 = vadd.s32 127, %v1994_v43  ;;  %v7730_v34 = vand.u32 2147483647, %v6564_v47 }
 0x253   : > { %v2007_v38 = vsel %vm6569_vm0, 0, %v2005_v46  ;;  %v2083_v55 = vshrl.u32 %v2082_v54, 30  ;;  %v4000_v21 = vadd.s32 4294967169, %v1098_v40  ;;  %v1200_v20 = vand.u32 2139095040, %v6585_v49 }
 0x254   : > { %v1101_v7 = vand.u32 8388607, %v7730_v34  ;;  %4558 = vcosq.f32 %v1903_v36  ;;  %v1993_v2 = vor.u32 %v1992_v39, %v1991_v59  ;;  %v1996_v27 = vshll.u32 %v1995_v37, 23 }
 0x255   : > { %4560 = vsinq.f32 %v1903_v36  ;;  %vm7731_vm7 = vcmp.lt.s32.totalorder %v6238_v42, 0  ;;  %v2084_v18 = vshll.u32 %v2083_v55, 30  ;;  %v1104_v14 = vadd.s32 1, %v4000_v21 }
 0x256   : > { %v2724_v48 = vsel %vm7731_vm7, %v2723_v53, %v2722_v57  ;;  %v1997_v45 = vor.u32 4788187, %v1996_v27  ;;  %v6612_v34 = vand.u32 3, %v2007_v38  ;;  %v1102_v15 = vor.u32 8388608, %v1101_v7  ;;  %v7736_v53 = vld [vmem:[#allocation13_spill] sm:$0xff] }
 0x257   : > { %v7538_v43 = vand.u32 2147483647, %v6585_v49  ;;  %v6615_v40 = vsub.s32 %v2081_v56, %v2084_v18  ;;  %v2107_v46 = vsub.s32 4, %v2083_v55  ;;  %vm1105_vm15 = vcmp.gt.s32.totalorder %v1104_v14, 0 }
 0x258   : > { %v1201_v39 = vshrl.u32 %v1200_v20, 23  ;;  %v1998_v37 = vand.u32 2147483647, %v1997_v45  ;;  %v2000_v54 = vcvt.s32.f32 %v1993_v2  ;;  %v1106_v59 = vsel %vm1105_vm15, %v1104_v14, 0 }
 0x259   : > { %vm2774_vm4 = vcmp.lt.f32.partialorder %v6557_v35, 5.0  ;;  %v6621_v21 = vsel %vm6591_vm13, %v6238_v42, %v2724_v48  ;;  %v2087_v57 = vsub.s32 0, %v6615_v40  ;;  %v1108_v36 = vand.u32 31, %v1106_v59 }
 0x25a   : > { %vm7732_vm7 = vcmp.eq.s32.totalorder %v7722_v3, %v4583_v31  ;;  %v7733_v56 = vmov 0  ;;  %v2001_v38 = vmul.f32 %v2000_v54, %v1998_v37  ;;  %v2077_v35 = vadd.s32 %v6537_v61, %v6553_v28 }
 0x25b   : > { %vm6626_vm5 = vmand %vm2774_vm4, %vm7732_vm7  ;;  %v6633_v20 = vshll.u32 %v1102_v15, 8  ;;  %vm2775_vm15 = vcmp.lt.f32.partialorder %v894_v12, 5.0  ;;  %v4037_v2 = vmin.u32 %v2087_v57, %v6615_v40  ;;  %vm7737_vm13 = vcmp.lt.s32.totalorder %v6370_v8, 0 }
 0x25c   : > { %v7734_v56 = vsel %vm6626_vm5, 4294967295, %v7733_v56  ;;  %v6638_v27 = vsel %vm7737_vm13, %v2107_v46, %v2083_v55  ;;  %v4004_v3 = vadd.s32 4294967169, %v1201_v39  ;;  %v6642_v48 = vand.u32 8388607, %v7538_v43 }
 0x25d   : > { %7735 = vst [vmem:[#allocation22_spill] sm:$0xff] %v7734_v56  ;;  %vm7738_vm4 = vcmp.eq.s32.totalorder %v7724_v58, %v4583_v31  ;;  %v7739_v18 = vmov 0  ;;  %v2002_v61 = vxor.u32 2147483648, %v2001_v38  ;;  %v6650_v28 = vshrl.u32 %v1106_v59, 5 }
 0x25e   : > { %vm6646_vm7 = vmand %vm2775_vm15, %vm7738_vm4  ;;  %v1109_v12 = vsub.s32 32, %v1108_v36  ;;  %v1111_v14 = vshll.u32 %v7574_v1, %v1108_v36  ;;  %v2089_v55 = vclz %v4037_v2  ;;  %v1114_v45 = vshll.u32 %v7567_v0, %v1108_v36 }
 0x25f   : > { %v7740_v18 = vsel %vm6646_vm7, 4294967295, %v7739_v18  ;;  %v1117_v31 = vshll.u32 %v7568_v5, %v1108_v36  ;;  %v1120_v58 = vshll.u32 %v7569_v62, %v1108_v36  ;;  %vm7742_vm15 = vcmp.lt.s32.totalorder %v6347_v30, 0 }
 0x260   : > { %7741 = vst [vmem:[#allocation19_spill] sm:$0xff] %v7740_v18  ;;  %v2003_v15 = vsel %vm7742_vm15, %v2002_v61, %v2001_v38  ;;  %v1112_v46 = vshrl.u32 %v7567_v0, %v1109_v12  ;;  %v1115_v39 = vshrl.u32 %v7568_v5, %v1109_v12  ;;  %v1123_v37 = vshll.u32 %v7570_v19, %v1108_v36 }
 0x261   : > { %v2006_v54 = vsel %vm6569_vm0, %v6347_v30, %v2003_v15  ;;  %v4038_v59 = vadd.s32 4294967294, %v2089_v55  ;;  %v1118_v57 = vshrl.u32 %v7569_v62, %v1109_v12  ;;  %v1121_v2 = vshrl.u32 %v7570_v19, %v1109_v12  ;;  %v6671_v61 = vpop.eup %4558 }
 0x262   : > { %4562 = vcosq.f32 %v2006_v54  ;;  %v1113_v43 = vor.u32 %v1112_v46, %v1111_v14  ;;  %v1116_v7 = vor.u32 %v1115_v39, %v1114_v45  ;;  %v1124_v38 = vshrl.u32 %v7572_v16, %v1109_v12  ;;  %v6679_v15 = vpop.eup %4560 }
 0x263   : > { %4564 = vsinq.f32 %v2006_v54  ;;  %v7743_v56 = vand.u32 2147483647, %v6370_v8  ;;  %vm4039_vm0 = vcmp.lt.s32.totalorder %v4038_v59, 0  ;;  %v1119_v63 = vor.u32 %v1118_v57, %v1117_v31 }
 0x264   : > { %v1122_v55 = vor.u32 %v1121_v2, %v1120_v58  ;;  %v2092_v18 = vsel %vm4039_vm0, 0, %v4038_v59  ;;  %v1110_v14 = vshrl.u32 %v7574_v1, %v1109_v12  ;;  %v1125_v45 = vor.u32 %v1124_v38, %v1123_v37 }
 0x265   : > { %vm6675_vm4 = vcmp.le.f32.partialorder %v7743_v56, 0.7853982  ;;  %v1207_v46 = vadd.s32 1, %v4004_v3  ;;  %v2093_v39 = vsub.s32 32, %v2092_v18  ;;  %v2097_v10 = vsub.s32 4294967266, %v2092_v18 }
 0x266   : > { %vm1126_vm15 = vcmp.lt.s32.totalorder %v6650_v28, 1  ;;  %vm1127_vm13 = vcmp.lt.s32.totalorder %v6650_v28, 2  ;;  %v2094_v56 = vshll.u32 %v6615_v40, %v2092_v18  ;;  %vm1128_vm5 = vcmp.lt.s32.totalorder %v6650_v28, 3 }
 0x267   : > { %vm1129_vm7 = vcmp.lt.s32.totalorder %v6650_v28, 4  ;;  %v1134_v31 = vsel %vm1126_vm15, %v1113_v43, %v1116_v7  ;;  %v2095_v58 = vshrl.u32 %v2077_v35, %v2093_v39  ;;  %v2098_v54 = vadd.s32 127, %v2097_v10 }
 0x268   : > { %v1131_v12 = vsel %vm1129_vm7, %v1119_v63, 2102212464  ;;  %v1135_v37 = vsel %vm1129_vm7, %v1122_v55, 920167782  ;;  %v1138_v59 = vsel %vm1126_vm15, %v1116_v7, %v1119_v63  ;;  %v1139_v57 = vsel %vm1129_vm7, %v1125_v45, 1326507024 }
 0x269   : > { %v1136_v3 = vsel %vm1128_vm5, %v1119_v63, %v1135_v37  ;;  %vm1208_vm0 = vcmp.gt.s32.totalorder %v1207_v46, 0  ;;  %v2096_v40 = vor.u32 %v2095_v58, %v2094_v56  ;;  %v2099_v18 = vshll.u32 %v2098_v54, 23 }
 0x26a   : > { %v1130_v2 = vsel %vm1126_vm15, %v1110_v14, %v1113_v43  ;;  %v1137_v38 = vsel %vm1127_vm13, %v1134_v31, %v1136_v3  ;;  %v1132_v10 = vsel %vm1128_vm5, %v1116_v7, %v1131_v12  ;;  %v1140_v35 = vsel %vm1128_vm5, %v1122_v55, %v1139_v57 }
 0x26b   : > { %v6702_v39 = vmul.u32.u64.low %v6633_v20, %v1137_v38  ;;  %v6703_v37 = vmul.u32.u64.high %v6633_v20, %v1137_v38, %v6702_v39  ;;  %v2100_v63 = vor.u32 4788187, %v2099_v18  ;;  %v1141_v45 = vsel %vm1127_vm13, %v1138_v59, %v1140_v35 }
 0x26c   : > { %v1205_v43 = vor.u32 8388608, %v6642_v48  ;;  %v1209_v14 = vsel %vm1208_vm0, %v1207_v46, 0  ;;  %v2110_v56 = vsel %vm6675_vm4, 0, %v6638_v27  ;;  %4566 = vcosq.f32 %v6621_v21 }
 0x26d   : > { %v6713_v7 = vmul.u32.u64.low %v6633_v20, %v1141_v45  ;;  %v6714_v31 = vmul.u32.u64.high %v6633_v20, %v1141_v45, %v6713_v7  ;;  %v1211_v55 = vand.u32 31, %v1209_v14  ;;  %v2101_v58 = vand.u32 2147483647, %v2100_v63 }
 0x26e   : > { %v2103_v54 = vcvt.s32.f32 %v2096_v40  ;;  %v1133_v12 = vsel %vm1127_vm13, %v1130_v2, %v1132_v10  ;;  %4568 = vsinq.f32 %v6621_v21  ;;  %vm2013_vm5 = vcmp.eq.s32.totalorder %v6612_v34, 0 }
 0x26f   : > { %vm2016_vm7 = vcmp.eq.s32.totalorder %v6612_v34, 2  ;;  %v1152_v27 = vadd.s32 1, %v6703_v37  ;;  %v1212_v48 = vsub.s32 32, %v1211_v55  ;;  %v4563_v46 = vpop.eup %4562  ;;  %v6723_v59 = vand.u32 3, %v2110_v56 }
 0x270   : > { %v2104_v3 = vmul.f32 %v2103_v54, %v2101_v58  ;;  %v6725_v57 = vshll.u32 %v1205_v43, 8  ;;  %v7746_v40 = vsub.s32 4, %v7736_v53  ;;  %vm7747_vm13 = vcmp.lt.s32.totalorder %v5089_v22, 0  ;;  %v4565_v21 = vpop.eup %4564 }
 0x271   : > { %v1149_v18 = vmul.u32 %v6633_v20, %v1133_v12  ;;  %vm1151_vm15 = vc.u32 %v6714_v31, %v6702_v39  ;;  %v1214_v2 = vshll.u32 %v7574_v1, %v1211_v55  ;;  %v1217_v38 = vshll.u32 %v7567_v0, %v1211_v55 }
 0x272   : > { %v1387_v28 = vsel %vm7747_vm13, %v7746_v40, %v7736_v53  ;;  %v2105_v10 = vxor.u32 2147483648, %v2104_v3  ;;  %v1153_v35 = vsel %vm1151_vm15, %v1152_v27, %v6703_v37  ;;  %v1215_v63 = vshrl.u32 %v7567_v0, %v1212_v48 }
 0x273   : > { %v1220_v45 = vshll.u32 %v7568_v5, %v1211_v55  ;;  %v1154_v53 = vadd.s32 %v1153_v35, %v1149_v18  ;;  %v1218_v43 = vshrl.u32 %v7568_v5, %v1212_v48  ;;  %v1221_v20 = vshrl.u32 %v7569_v62, %v1212_v48 }
 0x274   : > { %v1223_v56 = vshll.u32 %v7569_v62, %v1211_v55  ;;  %v2014_v7 = vxor.u32 2147483648, %v4565_v21  ;;  %v2017_v58 = vxor.u32 2147483648, %v4563_v46  ;;  %vm7748_vm13 = vcmp.lt.s32.totalorder %v6370_v8, 0 }
 0x275   : > { %v2106_v54 = vsel %vm7748_vm13, %v2105_v10, %v2104_v3  ;;  %v1224_v37 = vshrl.u32 %v7570_v19, %v1212_v48  ;;  %v1155_v12 = vadd.s32 536870912, %v1154_v53  ;;  %v1210_v27 = vshrl.u32 %v1209_v14, 5 }
 0x276   : > { %v2109_v0 = vsel %vm6675_vm4, %v6370_v8, %v2106_v54  ;;  %v1216_v40 = vor.u32 %v1215_v63, %v1214_v2  ;;  %v1219_v5 = vor.u32 %v1218_v43, %v1217_v38  ;;  %v1222_v18 = vor.u32 %v1221_v20, %v1220_v45 }
 0x277   : > { %4570 = vcosq.f32 %v2109_v0  ;;  %v1225_v62 = vor.u32 %v1224_v37, %v1223_v56  ;;  %v1156_v35 = vshrl.u32 %v1155_v12, 30  ;;  %v1226_v42 = vshll.u32 %v7570_v19, %v1211_v55 }
 0x278   : > { %4572 = vsinq.f32 %v2109_v0  ;;  %v1227_v3 = vshrl.u32 %v7572_v16, %v1212_v48  ;;  %v2015_v10 = vsel %vm2013_vm5, %v4563_v46, %v2014_v7  ;;  %v2018_v36 = vsel %vm2016_vm7, %v2017_v58, %v4565_v21 }
 0x279   : > { %v1213_v14 = vshrl.u32 %v7574_v1, %v1212_v48  ;;  %v1389_v2 = vsel %vm5600_vm12, 0, %v1387_v28  ;;  %v1157_v38 = vshll.u32 %v1156_v35, 30  ;;  %vm1229_vm4 = vcmp.lt.s32.totalorder %v1210_v27, 1  ;;  %v6764_v46 = vpop.eup %4566 }
 0x27a   : > { %v1228_v63 = vor.u32 %v1227_v3, %v1226_v42  ;;  %vm1232_vm13 = vcmp.lt.s32.totalorder %v1210_v27, 4  ;;  %vm1231_vm0 = vcmp.lt.s32.totalorder %v1210_v27, 3  ;;  %v1237_v16 = vsel %vm1229_vm4, %v1216_v40, %v1219_v5 }
 0x27b   : > { %v1234_v19 = vsel %vm1232_vm13, %v1222_v18, 2102212464  ;;  %v1238_v55 = vsel %vm1232_vm13, %v1225_v62, 920167782  ;;  %v6766_v21 = vsub.s32 %v1154_v53, %v1157_v38  ;;  %vm7546_vm5 = vcmp.lt.s32.totalorder %v1210_v27, 2  ;;  %v6770_v42 = vpop.eup %4568 }
 0x27c   : > { %v1239_v1 = vsel %vm1231_vm0, %v1222_v18, %v1238_v55  ;;  %v1396_v60 = vxor.u32 2147483648, %v5736_v23  ;;  %vm7749_vm12 = vcmp.lt.s32.totalorder %v6612_v34, 2  ;;  %v1233_v28 = vsel %vm1229_vm4, %v1213_v14, %v1216_v40 }
 0x27d   : > { %v2019_v48 = vsel %vm7749_vm12, %v2015_v10, %v2018_v36  ;;  %v1240_v45 = vsel %vm7546_vm5, %v1237_v16, %v1239_v1  ;;  %v1399_v43 = vxor.u32 2147483648, %v5732_v41  ;;  %v1160_v20 = vsub.s32 0, %v6766_v21 }
 0x27e   : > { %v1235_v53 = vsel %vm1231_vm0, %v1219_v5, %v1234_v19  ;;  %v1241_v56 = vsel %vm1229_vm4, %v1219_v5, %v1222_v18  ;;  %v1242_v7 = vsel %vm1232_vm13, %v1228_v63, 1326507024  ;;  %v1393_v37 = vand.u32 3, %v1389_v2 }
 0x27f   : > { %v1243_v58 = vsel %vm1231_vm0, %v1225_v62, %v1242_v7  ;;  %v6784_v34 = vmul.u32.u64.low %v6725_v57, %v1240_v45  ;;  %v6785_v54 = vmul.u32.u64.high %v6725_v57, %v1240_v45, %v6784_v34  ;;  %vm7750_vm12 = vweird.f32 %v6347_v30 }
 0x280   : > { %v2020_v0 = vsel %vm7750_vm12, nan, %v2019_v48  ;;  %vm2115_vm15 = vcmp.lt.s32.totalorder %v6723_v59, 2  ;;  %vm2119_vm5 = vcmp.eq.s32.totalorder %v6723_v59, 2  ;;  %v4001_v12 = vmin.u32 %v1160_v20, %v6766_v21 }
 0x281   : > { %v1180_v40 = vsub.s32 4, %v1156_v35  ;;  %vm7751_vm13 = vcmp.lt.s32.totalorder %v1210_v27, 2  ;;  %vm1395_vm7 = vcmp.eq.s32.totalorder %v1393_v37, 0  ;;  %vm1398_vm1 = vcmp.eq.s32.totalorder %v1393_v37, 2 }
 0x282   : > { %v1236_v5 = vsel %vm7751_vm13, %v1233_v28, %v1235_v53  ;;  %vm7752_vm0 = vmmov %vm7751_vm13  ;;  %v1162_v62 = vclz %v4001_v12  ;;  %v1397_v10 = vsel %vm1395_vm7, %v5732_v41, %v1396_v60  ;;  %v1150_v36 = vadd.s32 %v6702_v39, %v6714_v31 }
 0x283   : > { %v1244_v18 = vsel %vm7752_vm0, %v1241_v56, %v1243_v58  ;;  %v1255_v14 = vadd.s32 1, %v6785_v54  ;;  %v1400_v2 = vsel %vm1398_vm1, %v1399_v43, %v5736_v23  ;;  %v1489_v38 = vsub.s32 4, %v5665_v4 }
 0x284   : > { %v6797_v3 = vmul.u32.u64.low %v6725_v57, %v1244_v18  ;;  %v6798_v30 = vmul.u32.u64.high %v6725_v57, %v1244_v18, %v6797_v3  ;;  %v4571_v27 = vpop.eup %4570  ;;  %v2750_v63 = vadd.f32 1.0, %v2020_v0  ;;  %v4002_v19 = vadd.s32 4294967294, %v1162_v62 }
 0x285   : > { %vm7753_vm12 = vcmp.lt.s32.totalorder %v6564_v47, 0  ;;  %vm1394_vm13 = vcmp.lt.s32.totalorder %v1393_v37, 2  ;;  %v4573_v55 = vpop.eup %4572  ;;  %v2120_v1 = vxor.u32 2147483648, %v4571_v27  ;;  %v1252_v41 = vmul.u32 %v6725_v57, %v1236_v5 }
 0x286   : > { %v1181_v16 = vsel %vm7753_vm12, %v1180_v40, %v1156_v35  ;;  %vm1392_vm7 = vweird.f32 %v5089_v22  ;;  %v1401_v39 = vsel %vm1394_vm13, %v1397_v10, %v1400_v2  ;;  %vm7754_vm0 = vcmp.lt.s32.totalorder %v7641_v52, 0  ;;  %v7758_v35 = vld [vmem:[#allocation17_spill] sm:$0xff] }
 0x287   : > { %v1490_v23 = vsel %vm7754_vm0, %v1489_v38, %v5665_v4  ;;  %v2117_v31 = vxor.u32 2147483648, %v4573_v55  ;;  %v7755_v60 = vand.u32 2147483647, %v6564_v47  ;;  %vm4003_vm12 = vcmp.lt.s32.totalorder %v4002_v19, 0 }
 0x288   : > { %vm1254_vm4 = vc.u32 %v6798_v30, %v6784_v34  ;;  %v2210_v57 = vsub.s32 4, %v7758_v35  ;;  %v2121_v28 = vsel %vm2119_vm5, %v2120_v1, %v4573_v55  ;;  %v1165_v45 = vsel %vm4003_vm12, 0, %v4002_v19 }
 0x289   : > { %vm6815_vm1 = vcmp.le.f32.partialorder %v7755_v60, 0.7853982  ;;  %v1256_v43 = vsel %vm1254_vm4, %v1255_v14, %v6785_v54  ;;  %v1492_v4 = vsel %vm6089_vm9, 0, %v1490_v23  ;;  %vm7759_vm13 = vcmp.eq.s32.totalorder %v6723_v59, 0 }
 0x28a   : > { %v2118_v20 = vsel %vm7759_vm13, %v4571_v27, %v2117_v31  ;;  %v1166_v53 = vsub.s32 32, %v1165_v45  ;;  %v1170_v56 = vsub.s32 4294967266, %v1165_v45  ;;  %v1499_v7 = vxor.u32 2147483648, %v6260_v50 }
 0x28b   : > { %v2122_v58 = vsel %vm2115_vm15, %v2118_v20, %v2121_v28  ;;  %v1257_v37 = vadd.s32 %v1256_v43, %v1252_v41  ;;  %v1496_v0 = vand.u32 3, %v1492_v4  ;;  %v1502_v12 = vxor.u32 2147483648, %v6245_v26 }
 0x28c   : > { %vm7760_vm5 = vweird.f32 %v6370_v8  ;;  %v1167_v11 = vshll.u32 %v6766_v21, %v1165_v45  ;;  %v1168_v40 = vshrl.u32 %v1150_v36, %v1166_v53  ;;  %v1171_v5 = vadd.s32 127, %v1170_v56 }
 0x28d   : > { %v2123_v54 = vsel %vm7760_vm5, nan, %v2122_v58  ;;  %v1258_v62 = vadd.s32 536870912, %v1257_v37  ;;  %vm1498_vm9 = vcmp.eq.s32.totalorder %v1496_v0, 0  ;;  %vm7761_vm4 = vcmp.lt.s32.totalorder %v5108_v13, 0 }
 0x28e   : > { %v2751_v18 = vadd.f32 1.0, %v2123_v54  ;;  %v2211_v3 = vsel %vm7761_vm4, %v2210_v57, %v7758_v35  ;;  %v1169_v59 = vor.u32 %v1168_v40, %v1167_v11  ;;  %v1172_v10 = vshll.u32 %v1171_v5, 23  ;;  %v7764_v35 = vld [vmem:[#allocation36_spill] sm:$0xff] }
 0x28f   : > { %v1500_v14 = vsel %vm1498_vm9, %v6245_v26, %v1499_v7  ;;  %vm1501_vm15 = vcmp.eq.s32.totalorder %v1496_v0, 2  ;;  %v2766_v2 = vmul.f32 0.5, %v2750_v63  ;;  %v1259_v8 = vshrl.u32 %v1258_v62, 30  ;;  %v7770_v62 = vld [vmem:[#allocation29_spill] sm:$0xff] }
 0x290   : > { %v2767_v38 = vmul.f32 0.5, %v2751_v18  ;;  %v1503_v27 = vsel %vm1501_vm15, %v1502_v12, %v6260_v50  ;;  %v1173_v21 = vor.u32 4788187, %v1172_v10  ;;  %vm1199_vm0 = vcmp.lt.s32.totalorder %v6585_v49, 0 }
 0x291   : > { %v1402_v36 = vsel %vm1392_vm7, nan, %v1401_v39  ;;  %vm1497_vm12 = vcmp.lt.s32.totalorder %v1496_v0, 2  ;;  %v2213_v55 = vsel %vm5650_vm2, 0, %v2211_v3  ;;  %v1183_v26 = vsel %vm6815_vm1, 0, %v1181_v16  ;;  %vm7763_vm7 = vmpackc.low %vm6411_vm10, %vm6404_vm11 }
 0x292   : > { %v4085_v1 = vpack.c.bf16 %v2767_v38, %v2766_v2  ;;  %v1260_v41 = vshll.u32 %v1259_v8, 30  ;;  %v1504_v63 = vsel %vm1497_vm12, %v1500_v14, %v1503_v27  ;;  %v1174_v23 = vand.u32 2147483647, %v1173_v21  ;;  %v7771_v2 = vld [vmem:[#allocation14_spill] sm:$0xff]  ;;  %v7774_v21 = vld [vmem:[#allocation15_spill] sm:$0xff] }
 0x293   : > { %v1176_v31 = vcvt.s32.f32 %v1169_v59  ;;  %vm1495_vm13 = vweird.f32 %v7641_v52  ;;  %v2217_v50 = vand.u32 3, %v2213_v55  ;;  %v2744_v39 = vadd.f32 1.0, %v1402_v36 }
 0x294   : > { %4260 = vmatprep.mubr.msk.bf16.mxu1 %vm7763_vm7, %v4085_v1  ;;  %v6854_v22 = vsub.s32 %v1257_v37, %v1260_v41  ;;  %v2220_v60 = vxor.u32 2147483648, %v5909_v33  ;;  %v2223_v16 = vxor.u32 2147483648, %v7764_v35  ;;  %v6858_v28 = vand.u32 3, %v1183_v26 }
 0x295   : > { %v1177_v57 = vmul.f32 %v1176_v31, %v1174_v23  ;;  %v7765_v45 = vand.u32 2147483647, %v6585_v49  ;;  %v1505_v44 = vsel %vm1495_vm13, nan, %v1504_v63  ;;  %v1283_v43 = vsub.s32 4, %v1259_v8  ;;  %v7776_v31 = vld [vmem:[#allocation41_spill] sm:$0xff] }
 0x296   : > { %v1263_v24 = vsub.s32 0, %v6854_v22  ;;  %vm2219_vm11 = vcmp.eq.s32.totalorder %v2217_v50, 0  ;;  %vm2222_vm10 = vcmp.eq.s32.totalorder %v2217_v50, 2  ;;  %v1253_v20 = vadd.s32 %v6784_v34, %v6798_v30 }
 0x297   : > { %vm6862_vm2 = vcmp.le.f32.partialorder %v7765_v45, 0.7853982  ;;  %v1178_v4 = vxor.u32 2147483648, %v1177_v57  ;;  %v2221_v53 = vsel %vm2219_vm11, %v7764_v35, %v2220_v60  ;;  %v2224_v56 = vsel %vm2222_vm10, %v2223_v16, %v5909_v33 }
 0x298   : > { %v4005_v7 = vmin.u32 %v1263_v24, %v6854_v22  ;;  %v6872_v58 = vadd.f32 1.0, %v1505_v44  ;;  %v6874_v37 = vmul.f32 0.5, %v2744_v39  ;;  %vm2218_vm5 = vcmp.lt.s32.totalorder %v2217_v50, 2  ;;  %v7780_v44 = vld [vmem:[#allocation11_spill] sm:$0xff] }
 0x299   : > { %vm7768_vm9 = vcmp.lt.s32.totalorder %v6564_v47, 0  ;;  %vm2216_vm4 = vweird.f32 %v5108_v13  ;;  %v2225_v12 = vsel %vm2218_vm5, %v2221_v53, %v2224_v56  ;;  %v2313_v54 = vsub.s32 4, %v5879_v9  ;;  %v7781_v53 = vld [vmem:[#allocation8_spill] sm:$0xff] }
 0x29a   : > { %v1179_v0 = vsel %vm7768_vm9, %v1178_v4, %v1177_v57  ;;  %v1265_v33 = vclz %v4005_v7  ;;  %v6885_v30 = vsel %vm1199_vm0, %v1283_v43, %v1259_v8  ;;  %v2226_v11 = vsel %vm2216_vm4, nan, %v2225_v12  ;;  %v7773_v8 = vld [vmem:[#allocation48_spill] sm:$0xff] }
 0x29b   : > { %v1182_v34 = vsel %vm6815_vm1, %v6564_v47, %v1179_v0  ;;  %vm7769_vm15 = vcmp.lt.s32.totalorder %v5628_v29, 0  ;;  %v2323_v13 = vxor.u32 2147483648, %v6328_v32  ;;  %v2752_v5 = vadd.f32 1.0, %v2226_v11  ;;  %v7782_v0 = vld [vmem:[#allocation31_spill] sm:$0xff] }
 0x29c   : > { %4574 = vcosq.f32 %v1182_v34  ;;  %v2314_v40 = vsel %vm7769_vm15, %v2313_v54, %v5879_v9  ;;  %v4006_v18 = vadd.s32 4294967294, %v1265_v33  ;;  %v1592_v3 = vsub.s32 4, %v7770_v62 }
 0x29d   : > { %4576 = vsinq.f32 %v1182_v34  ;;  %v2316_v48 = vsel %vm6159_vm8, 0, %v2314_v40  ;;  %v1286_v59 = vsel %vm6862_vm2, 0, %v6885_v30  ;;  %vm2319_vm1 = vweird.f32 %v5628_v29 }
 0x29e   : > { %v2320_v10 = vand.u32 3, %v2316_v48  ;;  %v2326_v14 = vxor.u32 2147483648, %v6268_v17  ;;  %vm4007_vm12 = vcmp.lt.s32.totalorder %v4006_v18, 0  ;;  %v2768_v9 = vmul.f32 0.5, %v2752_v5 }
 0x29f   : > { %vm7772_vm13 = vcmp.lt.s32.totalorder %v7771_v2, 0  ;;  %v1695_v51 = vsub.s32 4, %v7773_v8  ;;  %v1268_v27 = vsel %vm4007_vm12, 0, %v4006_v18  ;;  %v1602_v36 = vxor.u32 2147483648, %v7774_v21 }
 0x2a0   : > { %v1593_v38 = vsel %vm7772_vm13, %v1592_v3, %v7770_v62  ;;  %vm2321_vm8 = vcmp.lt.s32.totalorder %v2320_v10, 2  ;;  %vm2322_vm7 = vcmp.eq.s32.totalorder %v2320_v10, 0  ;;  %v1269_v19 = vsub.s32 32, %v1268_v27 }
 0x2a1   : > { %v1273_v55 = vsub.s32 4294967266, %v1268_v27  ;;  %v2324_v1 = vsel %vm2322_vm7, %v6268_v17, %v2323_v13  ;;  %vm2325_vm11 = vcmp.eq.s32.totalorder %v2320_v10, 2  ;;  %v1270_v26 = vshll.u32 %v6854_v22, %v1268_v27  ;;  %v7778_v22 = vld [vmem:[#allocation24_spill] sm:$0xff] }
 0x2a2   : > { %v2327_v41 = vsel %vm2325_vm11, %v2326_v14, %v6328_v32  ;;  %v1595_v23 = vsel %vm5726_vm14, 0, %v1593_v38  ;;  %vm7777_vm10 = vcmp.lt.s32.totalorder %v7776_v31, 0  ;;  %vm1192_vm5 = vcmp.eq.s32.totalorder %v6858_v28, 2  ;;  %v7783_v14 = vld [vmem:[#allocation28_spill] sm:$0xff] }
 0x2a3   : > { %v1696_v50 = vsel %vm7777_vm10, %v1695_v51, %v7773_v8  ;;  %v1271_v39 = vshrl.u32 %v1253_v20, %v1269_v19  ;;  %v1274_v60 = vadd.s32 127, %v1273_v55  ;;  %v2328_v35 = vsel %vm2321_vm8, %v2324_v1, %v2327_v41  ;;  %v7789_v55 = vld [vmem:[#allocation42_spill] sm:$0xff] }
 0x2a4   : > { %v1599_v16 = vand.u32 3, %v1595_v23  ;;  %vm1189_vm9 = vcmp.eq.s32.totalorder %v6858_v28, 0  ;;  %v2329_v17 = vsel %vm2319_vm1, nan, %v2328_v35  ;;  %v1605_v32 = vxor.u32 2147483648, %v7778_v22  ;;  %v7792_v35 = vld [vmem:[#allocation50_spill] sm:$0xff] }
 0x2a5   : > { %v1698_v45 = vsel %vm6375_vm6, 0, %v1696_v50  ;;  %v1705_v24 = vxor.u32 2147483648, %v7780_v44  ;;  %vm1188_vm14 = vcmp.lt.s32.totalorder %v6858_v28, 2  ;;  %v1272_v43 = vor.u32 %v1271_v39, %v1270_v26  ;;  %v7791_v39 = vld [vmem:[#allocation55_spill] sm:$0xff] }
 0x2a6   : > { %v1275_v4 = vshll.u32 %v1274_v60, 23  ;;  %v2753_v20 = vadd.f32 1.0, %v2329_v17  ;;  %v1708_v56 = vxor.u32 2147483648, %v7781_v53  ;;  %vm1600_vm4 = vcmp.lt.s32.totalorder %v1599_v16, 2 }
 0x2a7   : > { %vm1601_vm15 = vcmp.eq.s32.totalorder %v1599_v16, 0  ;;  %v1702_v7 = vand.u32 3, %v1698_v45  ;;  %v2416_v29 = vsub.s32 4, %v7782_v0  ;;  %vm1186_vm1 = vweird.f32 %v6564_v47  ;;  %v7794_v47 = vld [vmem:[#allocation44_spill] sm:$0xff] }
 0x2a8   : > { %v1276_v12 = vor.u32 4788187, %v1275_v4  ;;  %v2769_v54 = vmul.f32 0.5, %v2753_v20  ;;  %v1603_v34 = vsel %vm1601_vm15, %v7778_v22, %v1602_v36  ;;  %vm1604_vm6 = vcmp.eq.s32.totalorder %v1599_v16, 2  ;;  %v7793_v22 = vld [vmem:[#allocation53_spill] sm:$0xff]  ;;  %v7798_v20 = vld [vmem:[#allocation60_spill] sm:$0xff] }
 0x2a9   : > { %v1279_v33 = vcvt.s32.f32 %v1272_v43  ;;  %v1606_v11 = vsel %vm1604_vm6, %v1605_v32, %v7774_v21  ;;  %vm1704_vm12 = vcmp.eq.s32.totalorder %v1702_v7, 0  ;;  %vm1707_vm13 = vcmp.eq.s32.totalorder %v1702_v7, 2  ;;  %v4575_v40 = vpop.eup %4574  ;;  %v7786_v21 = vld [vmem:[#allocation32_spill] sm:$0xff]  ;;  %v7796_v43 = vld [vmem:[#allocation21_spill] sm:$0xff] }
 0x2aa   : > { %v1277_v13 = vand.u32 2147483647, %v1276_v12  ;;  %v4088_v5 = vpack.c.bf16 %v2769_v54, %v2768_v9  ;;  %v1607_v18 = vsel %vm1600_vm4, %v1603_v34, %v1606_v11  ;;  %v1706_v48 = vsel %vm1704_vm12, %v7781_v53, %v1705_v24  ;;  %v4577_v62 = vpop.eup %4576  ;;  %v7800_v12 = vld [vmem:[#allocation37_spill] sm:$0xff] }
 0x2ab   : > { %v1193_v3 = vxor.u32 2147483648, %v4575_v40  ;;  %vm1703_vm8 = vcmp.lt.s32.totalorder %v1702_v7, 2  ;;  %v1709_v10 = vsel %vm1707_vm13, %v1708_v56, %v7780_v44  ;;  %vm7784_vm7 = vcmp.lt.s32.totalorder %v7783_v14, 0  ;;  %v7802_v11 = vld [vmem:[#allocation57_spill] sm:$0xff] }
 0x2ac   : > { %v2417_v38 = vsel %vm7784_vm7, %v2416_v29, %v7782_v0  ;;  %v1190_v8 = vxor.u32 2147483648, %v4577_v62  ;;  %v1280_v51 = vmul.f32 %v1279_v33, %v1277_v13  ;;  %vm7787_vm11 = vnez %v7786_v21  ;;  %v7799_v0 = vld [vmem:[#allocation59_spill] sm:$0xff]  ;;  %v7801_v33 = vld [vmem:[#allocation30_spill] sm:$0xff] }
 0x2ad   : > { %vm7788_vm10 = vmpackc.low %vm5660_vm3, %vm7787_vm11  ;;  %vm1598_vm4 = vweird.f32 %v7771_v2  ;;  %v1710_v9 = vsel %vm1703_vm8, %v1706_v48, %v1709_v10  ;;  %v1194_v36 = vsel %vm1192_vm5, %v1193_v3, %v4577_v62  ;;  %vm1701_vm15 = vweird.f32 %v7776_v31  ;;  %v7805_v3 = vld [vmem:[#allocation49_spill] sm:$0xff] }
 0x2ae   : > { %4261 = vmatmul.mubr.msk.bf16.vlgmr.msra.gmra.mxu1 %vm7788_vm10, %v4088_v5  ;;  %v1608_v19 = vsel %vm1598_vm4, nan, %v1607_v18  ;;  %vm7790_vm6 = vnez %v7789_v55  ;;  %v1191_v26 = vsel %vm1189_vm9, %v4575_v40, %v1190_v8  ;;  %v1281_v41 = vxor.u32 2147483648, %v1280_v51  ;;  %v7804_v5 = vld [vmem:[#allocation56_spill] sm:$0xff] }
 0x2af   : > { %v2419_v1 = vsel %vm7790_vm6, 0, %v2417_v38  ;;  %v6946_v63 = vmul.f32 0.5, %v6872_v58  ;;  %v1711_v23 = vsel %vm1701_vm15, nan, %v1710_v9  ;;  %v1195_v2 = vsel %vm1188_vm14, %v1191_v26, %v1194_v36 }
 0x2b0   : > { %v2423_v50 = vand.u32 3, %v2419_v1  ;;  %v2426_v60 = vxor.u32 2147483648, %v7791_v39  ;;  %v2429_v16 = vxor.u32 2147483648, %v7792_v35  ;;  %v1282_v31 = vsel %vm1199_vm0, %v1281_v41, %v1280_v51  ;;  %v7807_v51 = vld [vmem:[#allocation9_spill] sm:$0xff] }
 0x2b1   : > { %v6958_v17 = vand.u32 3, %v1286_v59  ;;  %v6960_v58 = vadd.f32 1.0, %v1608_v19  ;;  %v2519_v32 = vsub.s32 4, %v7793_v22  ;;  %v1196_v28 = vsel %vm1186_vm1, nan, %v1195_v2  ;;  %v7808_v19 = vld [vmem:[#allocation45_spill] sm:$0xff]  ;;  %v7810_v2 = vld [vmem:[#allocation38_spill] sm:$0xff] }
 0x2b2   : > { %v1285_v57 = vsel %vm6862_vm2, %v6585_v49, %v1282_v31  ;;  %vm2422_vm3 = vweird.f32 %v7783_v14  ;;  %vm2425_vm0 = vcmp.eq.s32.totalorder %v2423_v50, 0  ;;  %v6969_v45 = vadd.f32 1.0, %v1711_v23 }
 0x2b3   : > { %4578 = vcosq.f32 %v1285_v57  ;;  %v2427_v30 = vsel %vm2425_vm0, %v7792_v35, %v2426_v60  ;;  %vm2428_vm5 = vcmp.eq.s32.totalorder %v2423_v50, 2  ;;  %vm2424_vm9 = vcmp.lt.s32.totalorder %v2423_v50, 2 }
 0x2b4   : > { %4580 = vsinq.f32 %v1285_v57  ;;  %v2430_v59 = vsel %vm2428_vm5, %v2429_v16, %v7791_v39  ;;  %vm7795_vm14 = vcmp.lt.s32.totalorder %v7794_v47, 0  ;;  %v6976_v24 = vadd.f32 1.0, %v1196_v28  ;;  %v7813_v16 = vld [vmem:[#allocation12_spill] sm:$0xff] }
 0x2b5   : > { %v2520_v44 = vsel %vm7795_vm14, %v2519_v32, %v7793_v22  ;;  %v2431_v52 = vsel %vm2424_vm9, %v2427_v30, %v2430_v59  ;;  %vm7797_vm2 = vnez %v7796_v43  ;;  %v2529_v53 = vxor.u32 2147483648, %v7798_v20 }
 0x2b6   : > { %v2522_v4 = vsel %vm7797_vm2, 0, %v2520_v44  ;;  %v2432_v56 = vsel %vm2422_vm3, nan, %v2431_v52  ;;  %v2532_v29 = vxor.u32 2147483648, %v7799_v0  ;;  %v1798_v54 = vsub.s32 4, %v7800_v12  ;;  %v7816_v52 = vld [vmem:[#allocation23_spill] sm:$0xff] }
 0x2b7   : > { %v2526_v7 = vand.u32 3, %v2522_v4  ;;  %vm2525_vm1 = vweird.f32 %v7794_v47  ;;  %v2754_v34 = vadd.f32 1.0, %v2432_v56  ;;  %vm1804_vm12 = vweird.f32 %v7801_v33  ;;  %v7815_v47 = vld [vmem:[#allocation58_spill] sm:$0xff] }
 0x2b8   : > { %v1808_v40 = vxor.u32 2147483648, %v7802_v11  ;;  %vm7803_vm7 = vcmp.lt.s32.totalorder %v7801_v33, 0  ;;  %v1811_v18 = vxor.u32 2147483648, %v7804_v5  ;;  %vm7806_vm10 = vnez %v7805_v3  ;;  %v7819_v56 = vld [vmem:[#allocation26_spill] sm:$0xff] }
 0x2b9   : > { %vm2528_vm13 = vcmp.eq.s32.totalorder %v2526_v7, 0  ;;  %vm2531_vm8 = vcmp.eq.s32.totalorder %v2526_v7, 2  ;;  %v1799_v13 = vsel %vm7803_vm7, %v1798_v54, %v7800_v12  ;;  %vm2527_vm11 = vcmp.lt.s32.totalorder %v2526_v7, 2 }
 0x2ba   : > { %v2530_v48 = vsel %vm2528_vm13, %v7799_v0, %v2529_v53  ;;  %v2533_v62 = vsel %vm2531_vm8, %v2532_v29, %v7798_v20  ;;  %v1801_v10 = vsel %vm7806_vm10, 0, %v1799_v13  ;;  %vm1295_vm4 = vcmp.eq.s32.totalorder %v6958_v17, 2  ;;  %v7817_v53 = vld [vmem:[#allocation43_spill] sm:$0xff]  ;;  %v7822_v13 = vld [vmem:[#allocation18_spill] sm:$0xff] }
 0x2bb   : > { %v2534_v14 = vsel %vm2527_vm11, %v2530_v48, %v2533_v62  ;;  %v2770_v38 = vmul.f32 0.5, %v2754_v34  ;;  %v1805_v8 = vand.u32 3, %v1801_v10  ;;  %v1901_v27 = vsub.s32 4, %v7807_v51 }
 0x2bc   : > { %vm1292_vm15 = vcmp.eq.s32.totalorder %v6958_v17, 0  ;;  %v2535_v21 = vsel %vm2525_vm1, nan, %v2534_v14  ;;  %v1911_v9 = vxor.u32 2147483648, %v6679_v15  ;;  %v1914_v36 = vxor.u32 2147483648, %v6671_v61 }
 0x2bd   : > { %v2622_v55 = vsub.s32 4, %v7808_v19  ;;  %vm1291_vm6 = vcmp.lt.s32.totalorder %v6958_v17, 2  ;;  %v2755_v1 = vadd.f32 1.0, %v2535_v21  ;;  %vm1806_vm3 = vcmp.lt.s32.totalorder %v1805_v8, 2  ;;  %v7823_v17 = vld [vmem:[#allocation54_spill] sm:$0xff] }
 0x2be   : > { %vm1807_vm0 = vcmp.eq.s32.totalorder %v1805_v8, 0  ;;  %vm1810_vm5 = vcmp.eq.s32.totalorder %v1805_v8, 2  ;;  %vm1289_vm9 = vweird.f32 %v6585_v49  ;;  %vm7809_vm14 = vcmp.lt.s32.totalorder %v6123_v6, 0  ;;  %v7825_v8 = vld [vmem:[#allocation16_spill] sm:$0xff] }
 0x2bf   : > { %v1809_v26 = vsel %vm1807_vm0, %v7804_v5, %v1808_v40  ;;  %v1812_v41 = vsel %vm1810_vm5, %v1811_v18, %v7802_v11  ;;  %v1902_v23 = vsel %vm7809_vm14, %v1901_v27, %v7807_v51  ;;  %vm7811_vm2 = vcmp.lt.s32.totalorder %v7810_v2, 0 }
 0x2c0   : > { %v2623_v50 = vsel %vm7811_vm2, %v2622_v55, %v7808_v19  ;;  %v2771_v39 = vmul.f32 0.5, %v2755_v1  ;;  %v1813_v60 = vsel %vm1806_vm3, %v1809_v26, %v1812_v41  ;;  %vm7812_vm1 = vnez %v7718_v25  ;;  %v4579_v57 = vpop.eup %4578 }
 0x2c1   : > { %v1904_v35 = vsel %vm7812_vm1, 0, %v1902_v23  ;;  %vm7814_vm13 = vnez %v7813_v16  ;;  %v1814_v22 = vsel %vm1804_vm12, nan, %v1813_v60  ;;  %vm1907_vm8 = vweird.f32 %v6123_v6  ;;  %v4581_v4 = vpop.eup %4580  ;;  %v7827_v23 = vld [vmem:[#allocation19_spill] sm:$0xff] }
 0x2c2   : > { %v2625_v31 = vsel %vm7814_vm13, 0, %v2623_v50  ;;  %v1908_v32 = vand.u32 3, %v1904_v35  ;;  %v4091_v30 = vpack.c.bf16 %v2771_v39, %v2770_v38  ;;  %v2748_v59 = vadd.f32 1.0, %v1814_v22  ;;  %v7837_v39 = vld [vmem:[#allocation40_spill] sm:$0xff]  ;;  %v7844_v22 = vld [vmem:[#allocation51_spill] sm:$0xff] }
 0x2c3   : > { %v2629_v28 = vand.u32 3, %v2625_v31  ;;  %v2632_v44 = vxor.u32 2147483648, %v7815_v47  ;;  %v2635_v43 = vxor.u32 2147483648, %v7816_v52  ;;  %v1296_v25 = vxor.u32 2147483648, %v4579_v57  ;;  %v7842_v31 = vld [vmem:[#allocation52_spill] sm:$0xff] }
 0x2c4   : > { %vm1909_vm7 = vcmp.lt.s32.totalorder %v1908_v32, 2  ;;  %vm1910_vm11 = vcmp.eq.s32.totalorder %v1908_v32, 0  ;;  %vm1913_vm10 = vcmp.eq.s32.totalorder %v1908_v32, 2  ;;  %v1293_v20 = vxor.u32 2147483648, %v4581_v4  ;;  %v7847_v32 = vld [vmem:[#allocation47_spill] sm:$0xff] }
 0x2c5   : > { %vm7818_vm3 = vnez %v7817_v53  ;;  %vm7820_vm12 = vnez %v7819_v56  ;;  %v1912_v7 = vsel %vm1910_vm11, %v6671_v61, %v1911_v9  ;;  %v1915_v0 = vsel %vm1913_vm10, %v1914_v36, %v6679_v15 }
 0x2c6   : > { %vm7821_vm0 = vmpackc.low %vm7818_vm3, %vm7820_vm12  ;;  %v2764_v29 = vmul.f32 0.5, %v2748_v59  ;;  %v1297_v12 = vsel %vm1295_vm4, %v1296_v25, %v4581_v4  ;;  %v1916_v54 = vsel %vm1909_vm7, %v1912_v7, %v1915_v0  ;;  %vm2630_vm5 = vcmp.lt.s32.totalorder %v2629_v28, 2  ;;  %v2830_v59 = vld [vmem:[#allocation2 + $0x40] sm:$0xff]  ;;  %v2824_v7 = vld [vmem:[#allocation2 + $0x58] sm:$0xff] }
 0x2c7   : > { %4264 = vmatprep.mubr.msk.bf16.mxu1 %vm7821_vm0, %v4091_v30  ;;  %vm2631_vm14 = vcmp.eq.s32.totalorder %v2629_v28, 0  ;;  %v1294_v34 = vsel %vm1292_vm15, %v4579_v57, %v1293_v20  ;;  %v1917_v33 = vsel %vm1907_vm8, nan, %v1916_v54  ;;  %vm2634_vm2 = vcmp.eq.s32.totalorder %v2629_v28, 2  ;;  %v7849_v28 = vld [vmem:[#allocation46_spill] sm:$0xff]  ;;  %v2831_v25 = vld [vmem:[#allocation2 + $0x20] sm:$0xff] }
 0x2c8   : > { %v2633_v11 = vsel %vm2631_vm14, %v7816_v52, %v2632_v44  ;;  %v1298_v61 = vsel %vm1291_vm6, %v1294_v34, %v1297_v12  ;;  %v2749_v15 = vadd.f32 1.0, %v1917_v33  ;;  %v2636_v40 = vsel %vm2634_vm2, %v2635_v43, %v7815_v47  ;;  %v2832_v57 = vld [vmem:[#allocation2 + $0x10] sm:$0xff]  ;;  %v2833_v52 = vld [vmem:[#allocation2 + $0x38] sm:$0xff] }
 0x2c9   : > { %v2725_v5 = vsub.s32 4, %v7822_v13  ;;  %v1299_v18 = vsel %vm1289_vm9, nan, %v1298_v61  ;;  %v2762_v48 = vmul.f32 0.5, %v6960_v58  ;;  %v2763_v62 = vmul.f32 0.5, %v6969_v45  ;;  %v2825_v34 = vld [vmem:[#allocation2 + $0x18] sm:$0xff]  ;;  %v2823_v61 = vld [vmem:[#allocation2] sm:$0xff] }
 0x2ca   : > { %v2637_v6 = vsel %vm2630_vm5, %v2633_v11, %v2636_v40  ;;  %v2743_v3 = vadd.f32 1.0, %v1299_v18  ;;  %v2765_v10 = vmul.f32 0.5, %v2749_v15  ;;  %vm2628_vm4 = vweird.f32 %v7810_v2  ;;  %v7829_v2 = vld [vmem:[#allocation22_spill] sm:$0xff]  ;;  %v2836_v40 = vld [vmem:[#allocation2 + $0x78] sm:$0xff] }
 0x2cb   : > { %vm7824_vm15 = vcmp.lt.s32.totalorder %v7823_v17, 0  ;;  %v2638_v38 = vsel %vm2628_vm4, nan, %v2637_v6  ;;  %vm7826_vm6 = vnez %v7825_v8  ;;  %v2735_v49 = vxor.u32 2147483648, %v6770_v42 }
 0x2cc   : > { %v2726_v14 = vsel %vm7824_vm15, %v2725_v5, %v7822_v13  ;;  %v2738_v27 = vxor.u32 2147483648, %v6764_v46  ;;  %v2758_v58 = vmul.f32 0.5, %v6976_v24  ;;  %v2759_v45 = vmul.f32 0.5, %v2743_v3  ;;  %v2828_v5 = vld [vmem:[#allocation2 + $0x8] sm:$0xff]  ;;  %v2826_v3 = vld [vmem:[#allocation2 + $0x50] sm:$0xff] }
 0x2cd   : > { %v2728_v51 = vsel %vm7826_vm6, 0, %v2726_v14  ;;  %v4082_v21 = vpack.c.bf16 %v2765_v10, %v2764_v29  ;;  %v4076_v36 = vpack.c.bf16 %v6946_v63, %v6874_v37  ;;  %v4079_v19 = vpack.c.bf16 %v2763_v62, %v2762_v48  ;;  %v7832_v37 = vld [vmem:[#allocation27_spill] sm:$0xff]  ;;  %v7834_v63 = vld [vmem:[#allocation25_spill] sm:$0xff]  ;;  %v2822_v29 = vld [vmem:[#allocation2 + $0x30] sm:$0xff] }
 0x2ce   : > { %v2732_v9 = vand.u32 3, %v2728_v51  ;;  %v4073_v55 = vpack.c.bf16 %v2759_v45, %v2758_v58  ;;  %v2756_v1 = vadd.f32 1.0, %v2638_v38  ;;  %vm7828_vm8 = vnez %v7827_v23  ;;  %v2834_v62 = vld [vmem:[#allocation2 + $0x60] sm:$0xff]  ;;  %v2837_v38 = vld [vmem:[#allocation2 + $0x28] sm:$0xff]  ;;  %v2835_v45 = vld [vmem:[#allocation2 + $0x70] sm:$0xff] }
 0x2cf   : > { %vm7830_vm7 = vnez %v7829_v2  ;;  %vm2731_vm10 = vweird.f32 %v7823_v17  ;;  %vm7833_vm3 = vnez %v7832_v37  ;;  %vm7835_vm12 = vnez %v7834_v63  ;;  %v2829_v51 = vld [vmem:[#allocation2 + $0x48] sm:$0xff] }
 0x2d0   : > { %vm2734_vm9 = vcmp.eq.s32.totalorder %v2732_v9, 0  ;;  %vm2737_vm1 = vcmp.eq.s32.totalorder %v2732_v9, 2  ;;  %vm2733_vm13 = vcmp.lt.s32.totalorder %v2732_v9, 2  ;;  %vm7831_vm11 = vmpackc.low %vm7828_vm8, %vm7830_vm7  ;;  %vm7838_vm5 = vnez %v7837_v39  ;;  %v2827_v9 = vld [vmem:[#allocation2 + $0x68] sm:$0xff] }
 0x2d1   : > { %v2736_v26 = vsel %vm2734_vm9, %v6764_v46, %v2735_v49  ;;  %v2739_v41 = vsel %vm2737_vm1, %v2738_v27, %v6770_v42  ;;  %4252 = vmatprep.mubr.msk.bf16.mxu0 %vm7831_vm11, %v4073_v55  ;;  %vm7836_vm0 = vmpackc.low %vm7833_vm3, %vm7835_vm12  ;;  %v7839_v46 = vld [vmem:[#allocation39_spill] sm:$0xff]  ;;  %v2772_v60 = vmul.f32 0.5, %v2756_v1  ;;  %vm7843_vm4 = vnez %v7842_v31 }
 0x2d2   : > { %v2740_v24 = vsel %vm2733_vm13, %v2736_v26, %v2739_v41  ;;  %4253 = vmatmul.mubr.msk.bf16.vlgmr.msra.gmra.mxu0 %vm7836_vm0, %v4076_v36  ;;  %vm7840_vm14 = vnez %v7839_v46  ;;  %vm7845_vm15 = vnez %v7844_v22  ;;  %vm7848_vm9 = vnez %v7847_v32 }
 0x2d3   : > { %v2741_v50 = vsel %vm2731_vm10, nan, %v2740_v24  ;;  %vm7841_vm2 = vmpackc.low %vm7838_vm5, %vm7840_vm14  ;;  %vm7850_vm1 = vnez %v7849_v28 }
 0x2d4   : > { %4256 = vmatprep.mubr.msk.bf16.mxu0 %vm7841_vm2, %v4079_v19  ;;  %v2757_v42 = vadd.f32 1.0, %v2741_v50  ;;  %vm7846_vm6 = vmpackc.low %vm7843_vm4, %vm7845_vm15 }
 0x2d5   : > { %vm7851_vm13 = vmpackc.low %vm7848_vm9, %vm7850_vm1 }
 0x2d6   : > { %v2773_v35 = vmul.f32 0.5, %v2757_v42 }
 0x2d8   : > { %v4094_v16 = vpack.c.bf16 %v2773_v35, %v2772_v60 }
 0x2da   : > { %4265 = vmatmul.mubr.msk.bf16.gmra.mxu1 %vm7846_vm6, %v4094_v16  ;;  %4257 = vmatmul.mubr.msk.bf16.gmra.mxu0 %vm7851_vm13, %v4082_v21 }
 0x36e   : > { %v4262_v30 = vpop.f32.mrf.mxu1 }
 0x36f   : > { %v3017_v47 = vadd.f32 %v4262_v30, %v2832_v57 }
 0x370   : > { %v2976_v44 = vpop.f32.mrf.mxu1 }
 0x371   : > { %3033 = vst [vmem:[#allocation2 + $0x10] sm:$0xff] %v3017_v47  ;;  %v3015_v43 = vadd.f32 %v2976_v44, %v2830_v59 }
 0x372   : > { %v4263_v4 = vpop.f32.mrf.mxu1 }
 0x373   : > { %3031 = vst [vmem:[#allocation2 + $0x40] sm:$0xff] %v3015_v43  ;;  %v3018_v20 = vadd.f32 %v4263_v4, %v2833_v52 }
 0x374   : > { %v2979_v53 = vpop.f32.mrf.mxu1 }
 0x375   : > { %3034 = vst [vmem:[#allocation2 + $0x38] sm:$0xff] %v3018_v20  ;;  %v3016_v56 = vadd.f32 %v2979_v53, %v2831_v25 }
 0x377   : > { %3032 = vst [vmem:[#allocation2 + $0x20] sm:$0xff] %v3016_v56 }
 0x392   : > { %v4254_v0 = vpop.f32.mrf.mxu0 }
 0x393   : > { %v3009_v12 = vadd.f32 %v4254_v0, %v2824_v7 }
 0x394   : > { %v2944_v54 = vpop.f32.mrf.mxu0 }
 0x395   : > { %3025 = vst [vmem:[#allocation2 + $0x58] sm:$0xff] %v3009_v12  ;;  %v3007_v33 = vadd.f32 %v2944_v54, %v2822_v29 }
 0x396   : > { %v4255_v11 = vpop.f32.mrf.mxu0 }
 0x397   : > { %3023 = vst [vmem:[#allocation2 + $0x30] sm:$0xff] %v3007_v33  ;;  %v3010_v15 = vadd.f32 %v4255_v11, %v2825_v34 }
 0x398   : > { %v2947_v13 = vpop.f32.mrf.mxu0 }
 0x399   : > { %3026 = vst [vmem:[#allocation2 + $0x18] sm:$0xff] %v3010_v15  ;;  %v3008_v18 = vadd.f32 %v2947_v13, %v2823_v61 }
 0x39a   : > { %v4266_v48 = vpop.f32.mrf.mxu1  ;;  %v4258_v6 = vpop.f32.mrf.mxu0 }
 0x39b   : > { %v3021_v10 = vadd.f32 %v4266_v48, %v2836_v40  ;;  %3024 = vst [vmem:[#allocation2] sm:$0xff] %v3008_v18  ;;  %v3013_v17 = vadd.f32 %v4258_v6, %v2828_v5 }
 0x39c   : > { %v2992_v14 = vpop.f32.mrf.mxu1  ;;  %v2960_v8 = vpop.f32.mrf.mxu0 }
 0x39d   : > { %3037 = vst [vmem:[#allocation2 + $0x78] sm:$0xff] %v3021_v10  ;;  %v3019_v49 = vadd.f32 %v2992_v14, %v2834_v62  ;;  %3029 = vst [vmem:[#allocation2 + $0x8] sm:$0xff] %v3013_v17  ;;  %v3011_v27 = vadd.f32 %v2960_v8, %v2826_v3 }
 0x39e   : > { %v4267_v58 = vpop.f32.mrf.mxu1  ;;  %v4259_v21 = vpop.f32.mrf.mxu0 }
 0x39f   : > { %3035 = vst [vmem:[#allocation2 + $0x60] sm:$0xff] %v3019_v49  ;;  %v3022_v36 = vadd.f32 %v4267_v58, %v2837_v38  ;;  %3027 = vst [vmem:[#allocation2 + $0x50] sm:$0xff] %v3011_v27  ;;  %v3014_v19 = vadd.f32 %v4259_v21, %v2829_v51  ;;  %3042 = sbr.rel (%p4096_p10) target bundleno = 1630 (0x65e), region = 72 }
 0x3a0   : > { %v2995_v55 = vpop.f32.mrf.mxu1  ;;  %v2963_v1 = vpop.f32.mrf.mxu0 }
 0x3a1   : > { %3038 = vst [vmem:[#allocation2 + $0x28] sm:$0xff] %v3022_v36  ;;  %v3020_v26 = vadd.f32 %v2995_v55, %v2835_v45  ;;  %3030 = vst [vmem:[#allocation2 + $0x48] sm:$0xff] %v3014_v19  ;;  %v3012_v41 = vadd.f32 %v2963_v1, %v2827_v9 }
 0x3a3   : > { %3036 = vst [vmem:[#allocation2 + $0x70] sm:$0xff] %v3020_v26  ;;  %3028 = vst [vmem:[#allocation2 + $0x68] sm:$0xff] %v3012_v41 }
 0x3a4   : > { %v4586_v23 = vld [vmem:[%s7401_s7 + $0x38] sm:$0xff]   ;;  %v4587_v2 = vld [vmem:[%s7401_s7 + $0x30] sm:$0xff]   ;;  %v4588_v24 = vld [vmem:[%s7401_s7 + $0x28] sm:$0xff]   ;;  %v4780_v18 = vmov 0  }
 0x3a5   : > { %4268 = vmatprep.subr.bf16.mxu0 %v4586_v23  ;;  %v4589_v37 = vld [vmem:[%s7401_s7 + $0x20] sm:$0xff]   ;;  %v3043_v63 = vld [vmem:[#allocation2 + $0x30] sm:$0xff]  ;;  %v4590_v46 = vld [vmem:[%s7401_s7 + $0x18] sm:$0xff]   ;;  %4585 = vset.pattern.permute.xlu1 %v4780_v18 }
 0x3a6   : > { %4269 = vmatpush3.bf16.msra.mxu0 %v4586_v23  ;;  %v3044_v50 = vld [vmem:[#allocation2] sm:$0xff]  ;;  %v4591_v42 = vld [vmem:[%s7401_s7 + $0x10] sm:$0xff]   ;;  %v4592_v60 = vld [vmem:[%s7401_s7 + $0x8] sm:$0xff]   ;;  %4584 = vset.pattern.permute.xlu0 %v4780_v18 }
 0x3a7   : > { %4270 = vmatprep.subr.bf16.mxu0 %v4587_v2  ;;  %v3059_v39 = vpack.c.bf16 %v3044_v50, %v3043_v63  ;;  %v4593_v35 = vld [vmem:[%s7401_s7] sm:$0xff]   ;;  %v3045_v16 = vld [vmem:[#allocation2 + $0x58] sm:$0xff]  ;;  %v3047_v22 = vld [vmem:[#allocation2 + $0x50] sm:$0xff] }
 0x3a8   : > { %v3046_v31 = vld [vmem:[#allocation2 + $0x18] sm:$0xff]  ;;  %v3049_v30 = vld [vmem:[#allocation2 + $0x8] sm:$0xff]  ;;  %v3051_v47 = vld [vmem:[#allocation2 + $0x40] sm:$0xff] }
 0x3a9   : > { %4284 = vmatprep.mubr.bf16.mxu0 %v3059_v39  ;;  %v3060_v28 = vpack.c.bf16 %v3046_v31, %v3045_v16  ;;  %v3050_v59 = vld [vmem:[#allocation2 + $0x48] sm:$0xff]  ;;  %v3052_v44 = vld [vmem:[#allocation2 + $0x20] sm:$0xff]  ;;  %v3053_v4 = vld [vmem:[#allocation2 + $0x10] sm:$0xff] }
 0x3aa   : > { %4271 = vmatpush3.bf16.msra.mxu0 %v4587_v2  ;;  %v3048_v32 = vld [vmem:[#allocation2 + $0x68] sm:$0xff]  ;;  %v3062_v52 = vpack.c.bf16 %v3050_v59, %v3049_v30  ;;  %v3063_v43 = vpack.c.bf16 %v3052_v44, %v3051_v47  ;;  %v3054_v25 = vld [vmem:[#allocation2 + $0x38] sm:$0xff]  ;;  %v3055_v20 = vld [vmem:[#allocation2 + $0x60] sm:$0xff] }
 0x3ab   : > { %4272 = vmatprep.subr.bf16.mxu0 %v4588_v24  ;;  %v3061_v57 = vpack.c.bf16 %v3048_v32, %v3047_v22  ;;  %v3056_v53 = vld [vmem:[#allocation2 + $0x70] sm:$0xff]  ;;  %v3064_v56 = vpack.c.bf16 %v3054_v25, %v3053_v4  ;;  %v3057_v0 = vld [vmem:[#allocation2 + $0x78] sm:$0xff]  ;;  %v3058_v29 = vld [vmem:[#allocation2 + $0x28] sm:$0xff] }
 0x3ac   : > { %v3065_v7 = vpack.c.bf16 %v3056_v53, %v3055_v20  ;;  %v3066_v12 = vpack.c.bf16 %v3058_v29, %v3057_v0  ;;  %v4594_v54 = vld [vmem:[%s7402_s8 + $0x38] sm:$0xff]   ;;  %v4595_v34 = vld [vmem:[%s7402_s8 + $0x30] sm:$0xff]   ;;  %v4596_v33 = vld [vmem:[%s7402_s8 + $0x28] sm:$0xff]  }
 0x3ad   : > { %4300 = vmatprep.subr.bf16.mxu1 %v4594_v54  ;;  %v4597_v11 = vld [vmem:[%s7402_s8 + $0x20] sm:$0xff]   ;;  %v4598_v61 = vld [vmem:[%s7402_s8 + $0x18] sm:$0xff]   ;;  %v4599_v15 = vld [vmem:[%s7402_s8 + $0x10] sm:$0xff]  }
 0x3ae   : > { %4273 = vmatpush3.bf16.msra.mxu0 %v4588_v24  ;;  %4301 = vmatpush3.bf16.msra.mxu1 %v4594_v54  ;;  %v4600_v40 = vld [vmem:[%s7402_s8 + $0x8] sm:$0xff]   ;;  %v4601_v13 = vld [vmem:[%s7402_s8] sm:$0xff]   ;;  %v3754_v62 = vld [vmem:[%s4900_s21 + $0x18] sm:$0xff] }
 0x3af   : > { %4274 = vmatprep.subr.bf16.mxu0 %v4589_v37  ;;  %4302 = vmatprep.subr.bf16.mxu1 %v4595_v34  ;;  %v3752_v5 = vld [vmem:[%s4900_s21 + $0x8] sm:$0xff]  ;;  %v3751_v48 = vld [vmem:[%s4900_s21] sm:$0xff]  ;;  %v3753_v6 = vld [vmem:[%s4900_s21 + $0x10] sm:$0xff] }
 0x3b0   : > { %3771 = vperm.xlu1 %4585, %v3752_v5   ;;  %3768 = vperm.xlu0 %4584, %v3751_v48   ;;  %v3756_v3 = vld [vmem:[%s4900_s21 + $0x28] sm:$0xff]  ;;  %v3755_v10 = vld [vmem:[%s4900_s21 + $0x20] sm:$0xff]  ;;  %v3758_v17 = vld [vmem:[%s4900_s21 + $0x38] sm:$0xff] }
 0x3b1   : > { %v3757_v14 = vld [vmem:[%s4900_s21 + $0x30] sm:$0xff]  ;;  %v3760_v38 = vld [vmem:[%s4900_s21 + $0x48] sm:$0xff]  ;;  %v3759_v8 = vld [vmem:[%s4900_s21 + $0x40] sm:$0xff] }
 0x3b2   : > { %4275 = vmatpush3.bf16.msra.mxu0 %v4589_v37  ;;  %4303 = vmatpush3.bf16.msra.mxu1 %v4595_v34  ;;  %v3762_v51 = vld [vmem:[%s4900_s21 + $0x58] sm:$0xff]  ;;  %v3761_v49 = vld [vmem:[%s4900_s21 + $0x50] sm:$0xff]  ;;  %v3763_v27 = vld [vmem:[%s4900_s21 + $0x60] sm:$0xff] }
 0x3b3   : > { %4276 = vmatprep.subr.bf16.mxu0 %v4590_v46  ;;  %4304 = vmatprep.subr.bf16.mxu1 %v4596_v33  ;;  %v3764_v58 = vld [vmem:[%s4900_s21 + $0x68] sm:$0xff]  ;;  %v4150_v48 = vld [vmem:[%s4905_s4] sm:$0xff]  }
 0x3b4   : > { %3777 = vperm.xlu1 %4585, %v3754_v62   ;;  %3774 = vperm.xlu0 %4584, %v3753_v6   ;;  %v4181_v6 = vld [vmem:[%s4905_s4 + $0x8] sm:$0xff]  }
 0x3b6   : > { %4277 = vmatpush3.bf16.msra.mxu0 %v4590_v46  ;;  %4305 = vmatpush3.bf16.msra.mxu1 %v4596_v33 }
 0x3b7   : > { %4278 = vmatprep.subr.bf16.mxu0 %v4591_v42  ;;  %4306 = vmatprep.subr.bf16.mxu1 %v4597_v11 }
 0x3b8   : > { %3783 = vperm.xlu1 %4585, %v3756_v3   ;;  %3780 = vperm.xlu0 %4584, %v3755_v10  }
 0x3ba   : > { %4279 = vmatpush3.bf16.msra.mxu0 %v4591_v42  ;;  %4307 = vmatpush3.bf16.msra.mxu1 %v4597_v11 }
 0x3bb   : > { %4280 = vmatprep.subr.bf16.mxu0 %v4592_v60  ;;  %4308 = vmatprep.subr.bf16.mxu1 %v4598_v61 }
 0x3bc   : > { %3789 = vperm.xlu1 %4585, %v3758_v17   ;;  %3786 = vperm.xlu0 %4584, %v3757_v14   ;;  %v4156_v17 = vunpack.c.h.bf16 %v4181_v6 }
 0x3be   : > { %4281 = vmatpush3.bf16.msra.mxu0 %v4592_v60  ;;  %4309 = vmatpush3.bf16.msra.mxu1 %v4598_v61 }
 0x3bf   : > { %4282 = vmatprep.subr.bf16.mxu0 %v4593_v35  ;;  %4310 = vmatprep.subr.bf16.mxu1 %v4599_v15 }
 0x3c0   : > { %3795 = vperm.xlu1 %4585, %v3760_v38   ;;  %3792 = vperm.xlu0 %4584, %v3759_v8  }
 0x3c2   : > { %4283 = vmatpush3.bf16.msra.mxu0 %v4593_v35  ;;  %4311 = vmatpush3.bf16.msra.mxu1 %v4599_v15 }
 0x3c3   : > { %4312 = vmatprep.subr.bf16.mxu1 %v4600_v40 }
 0x3c4   : > { %3801 = vperm.xlu1 %4585, %v3762_v51   ;;  %3798 = vperm.xlu0 %4584, %v3761_v49   ;;  %v4151_v49 = vunpack.c.l.bf16 %v4150_v48 }
 0x3c5   : > { %4285 = vmatmul.mubr.bf16.vlgmr.msra.gmra.mxu0 %v3060_v28 }
 0x3c6   : > { %4288 = vmatprep.mubr.bf16.mxu0 %v3061_v57  ;;  %4313 = vmatpush3.bf16.msra.mxu1 %v4600_v40 }
 0x3c7   : > { %4314 = vmatprep.subr.bf16.mxu1 %v4601_v13 }
 0x3c8   : > { %3804 = vperm.xlu1 %4585, %v3763_v27   ;;  %v4152_v27 = vunpack.c.h.bf16 %v4150_v48 }
 0x3ca   : > { %4315 = vmatpush3.bf16.msra.mxu1 %v4601_v13 }
 0x3cc   : > { %3807 = vperm.xlu1 %4585, %v3764_v58  }
 0x3cd   : > { %4289 = vmatmul.mubr.bf16.gmra.mxu0 %v3062_v52 }
 0x3ce   : > { %4292 = vmatprep.mubr.bf16.mxu0 %v3063_v43 }
 0x3d5   : > { %4293 = vmatmul.mubr.bf16.gmra.mxu0 %v3064_v56 }
 0x3d6   : > { %4296 = vmatprep.mubr.bf16.mxu0 %v3065_v7 }
 0x3dd   : > { %4297 = vmatmul.mubr.bf16.gmra.mxu0 %v3066_v12 }
 0x485   : > { %v7145_v45 = vpop.f32.mrf.mxu0 }
 0x486   : > { %v4107_v21 = vmul.f32 -1.442695, %v7145_v45 }
 0x487   : > { %v7148_v9 = vpop.f32.mrf.mxu0 }
 0x488   : > { %4602 = vpow2.f32 %v4107_v21  ;;  %v4105_v36 = vmul.f32 -1.442695, %v7148_v9  ;;  %v4155_v21 = vunpack.c.l.bf16 %v4181_v6 }
 0x489   : > { %v7151_v19 = vpop.f32.mrf.mxu0 }
 0x48a   : > { %4604 = vpow2.f32 %v4105_v36  ;;  %v4108_v55 = vmul.f32 -1.442695, %v7151_v19 }
 0x48b   : > { %v7154_v1 = vpop.f32.mrf.mxu0 }
 0x48c   : > { %4606 = vpow2.f32 %v4108_v55  ;;  %v4106_v26 = vmul.f32 -1.442695, %v7154_v1 }
 0x48d   : > { %v7157_v41 = vpop.f32.mrf.mxu0 }
 0x48e   : > { %4608 = vpow2.f32 %v4106_v26  ;;  %v4111_v23 = vmul.f32 -1.442695, %v7157_v41 }
 0x48f   : > { %v7160_v2 = vpop.f32.mrf.mxu0 }
 0x490   : > { %4610 = vpow2.f32 %v4111_v23  ;;  %v4109_v24 = vmul.f32 -1.442695, %v7160_v2 }
 0x491   : > { %v7163_v37 = vpop.f32.mrf.mxu0 }
 0x492   : > { %4612 = vpow2.f32 %v4109_v24  ;;  %v4112_v63 = vmul.f32 -1.442695, %v7163_v37 }
 0x493   : > { %v7166_v50 = vpop.f32.mrf.mxu0 }
 0x494   : > { %4614 = vpow2.f32 %v4112_v63  ;;  %v4110_v39 = vmul.f32 -1.442695, %v7166_v50 }
 0x495   : > { %v4603_v46 = vpop.eup %4602  ;;  %v7169_v42 = vpop.f32.mrf.mxu0 }
 0x496   : > { %v3310_v60 = vadd.f32 1.0, %v4603_v46  ;;  %4616 = vpow2.f32 %v4110_v39  ;;  %v4115_v35 = vmul.f32 -1.442695, %v7169_v42 }
 0x497   : > { %v4605_v16 = vpop.eup %4604  ;;  %v7172_v31 = vpop.f32.mrf.mxu0 }
 0x498   : > { %4618 = vrcp.f32 %v3310_v60  ;;  %v3308_v22 = vadd.f32 1.0, %v4605_v16  ;;  %v4113_v32 = vmul.f32 -1.442695, %v7172_v31  ;;  %v4182_v16 = vld [vmem:[%s4905_s4 + $0x10] sm:$0xff]  }
 0x499   : > { %v4607_v28 = vpop.eup %4606  ;;  %4620 = vpow2.f32 %v4115_v35  ;;  %v7175_v57 = vpop.f32.mrf.mxu0 }
 0x49a   : > { %4622 = vrcp.f32 %v3308_v22  ;;  %v3311_v30 = vadd.f32 1.0, %v4607_v28  ;;  %v4116_v59 = vmul.f32 -1.442695, %v7175_v57 }
 0x49b   : > { %v4609_v47 = vpop.eup %4608  ;;  %4624 = vpow2.f32 %v4113_v32  ;;  %v7178_v44 = vpop.f32.mrf.mxu0 }
 0x49c   : > { %4626 = vrcp.f32 %v3311_v30  ;;  %v3309_v52 = vadd.f32 1.0, %v4609_v47  ;;  %v4114_v43 = vmul.f32 -1.442695, %v7178_v44 }
 0x49d   : > { %v4611_v4 = vpop.eup %4610  ;;  %4628 = vpow2.f32 %v4116_v59  ;;  %v7181_v25 = vpop.f32.mrf.mxu0 }
 0x49e   : > { %4630 = vrcp.f32 %v3309_v52  ;;  %v3314_v20 = vadd.f32 1.0, %v4611_v4  ;;  %v4119_v53 = vmul.f32 -1.442695, %v7181_v25 }
 0x49f   : > { %v4613_v56 = vpop.eup %4612  ;;  %4632 = vpow2.f32 %v4114_v43  ;;  %v7184_v7 = vpop.f32.mrf.mxu0  ;;  %v4159_v43 = vunpack.c.l.bf16 %v4182_v16 }
 0x4a0   : > { %4634 = vrcp.f32 %v3314_v20  ;;  %v3312_v0 = vadd.f32 1.0, %v4613_v56  ;;  %v4117_v29 = vmul.f32 -1.442695, %v7184_v7 }
 0x4a1   : > { %v4615_v12 = vpop.eup %4614  ;;  %4636 = vpow2.f32 %v4119_v53  ;;  %v7187_v54 = vpop.f32.mrf.mxu0  ;;  %v4160_v53 = vunpack.c.h.bf16 %v4182_v16 }
 0x4a2   : > { %4638 = vrcp.f32 %v3312_v0  ;;  %v3315_v34 = vadd.f32 1.0, %v4615_v12  ;;  %v4120_v33 = vmul.f32 -1.442695, %v7187_v54 }
 0x4a3   : > { %v4617_v11 = vpop.eup %4616  ;;  %4640 = vpow2.f32 %v4117_v29  ;;  %v7190_v61 = vpop.f32.mrf.mxu0 }
 0x4a4   : > { %4642 = vrcp.f32 %v3315_v34  ;;  %v3313_v15 = vadd.f32 1.0, %v4617_v11  ;;  %v4118_v40 = vmul.f32 -1.442695, %v7190_v61 }
 0x4a5   : > { %v4619_v13 = vpop.eup %4618  ;;  %4644 = vpow2.f32 %v4120_v33 }
 0x4a6   : > { %v4621_v5 = vpop.eup %4620  ;;  %4646 = vrcp.f32 %v3313_v15  ;;  %v3358_v36 = vmul.f32 %v4619_v13, %v7145_v45  ;;  %v4183_v45 = vld [vmem:[%s4905_s4 + $0x18] sm:$0xff]  }
 0x4a7   : > { %v4623_v18 = vpop.eup %4622  ;;  %4648 = vpow2.f32 %v4118_v40  ;;  %v3318_v3 = vadd.f32 1.0, %v4621_v5  ;;  %v4164_v59 = vunpack.c.h.bf16 %v4183_v45  ;;  %v4163_v0 = vunpack.c.l.bf16 %v4183_v45  ;;  %v4184_v5 = vld [vmem:[%s4905_s4 + $0x20] sm:$0xff]  }
 0x4a8   : > { %v4625_v62 = vpop.eup %4624  ;;  %v3356_v8 = vmul.f32 %v4623_v18, %v7148_v9  ;;  %v3374_v35 = vadd.f32 %v4155_v21, %v3358_v36 }
 0x4a9   : > { %v4627_v10 = vpop.eup %4626  ;;  %v3316_v14 = vadd.f32 1.0, %v4625_v62 }
 0x4aa   : > { %v4629_v38 = vpop.eup %4628  ;;  %v3359_v51 = vmul.f32 %v4627_v10, %v7151_v19  ;;  %v3372_v19 = vadd.f32 %v4151_v49, %v3356_v8  ;;  %v4167_v10 = vunpack.c.l.bf16 %v4184_v5 }
 0x4ab   : > { %v4631_v58 = vpop.eup %4630  ;;  %4650 = vrcp.f32 %v3316_v14  ;;  %v3319_v55 = vadd.f32 1.0, %v4629_v38  ;;  %v4168_v14 = vunpack.c.h.bf16 %v4184_v5 }
 0x4ac   : > { %v4633_v26 = vpop.eup %4632  ;;  %v3357_v23 = vmul.f32 %v4631_v58, %v7154_v1  ;;  %4652 = vrcp.f32 %v3318_v3  ;;  %v3375_v63 = vadd.f32 %v4156_v17, %v3359_v51 }
 0x4ad   : > { %v4635_v24 = vpop.eup %4634  ;;  %4654 = vrcp.f32 %v3319_v55  ;;  %v3317_v9 = vadd.f32 1.0, %v4633_v26  ;;  %v4186_v26 = vld [vmem:[%s4905_s4 + $0x30] sm:$0xff]  }
 0x4ae   : > { %v4637_v39 = vpop.eup %4636  ;;  %v3373_v46 = vadd.f32 %v4152_v27, %v3357_v23  ;;  %v3389_v1 = vpack.c.bf16 %v3375_v63, %v3374_v35  ;;  %v3362_v29 = vmul.f32 %v4635_v24, %v7157_v41  ;;  %v4185_v41 = vld [vmem:[%s4905_s4 + $0x28] sm:$0xff]   ;;  %v4187_v24 = vld [vmem:[%s4905_s4 + $0x38] sm:$0xff]  }
 0x4af   : > { %v4639_v60 = vpop.eup %4638  ;;  %4656 = vrcp.f32 %v3317_v9  ;;  %v3322_v32 = vadd.f32 1.0, %v4637_v39  ;;  %v4172_v3 = vunpack.c.h.bf16 %v4185_v41  ;;  %v4171_v8 = vunpack.c.l.bf16 %v4185_v41 }
 0x4b0   : > { %v4641_v22 = vpop.eup %4640  ;;  %v3388_v28 = vpack.c.bf16 %v3373_v46, %v3372_v19  ;;  %v3360_v4 = vmul.f32 %v4639_v60, %v7160_v2  ;;  %v3378_v40 = vadd.f32 %v4163_v0, %v3362_v29  ;;  %v4180_v9 = vunpack.c.h.bf16 %v4187_v24 }
 0x4b1   : > { %v4643_v30 = vpop.eup %4642  ;;  %v3320_v47 = vadd.f32 1.0, %v4641_v22  ;;  %v4175_v39 = vunpack.c.l.bf16 %v4186_v26  ;;  %v4179_v60 = vunpack.c.l.bf16 %v4187_v24 }
 0x4b2   : > { %v4645_v52 = vpop.eup %4644  ;;  %v3363_v20 = vmul.f32 %v4643_v30, %v7163_v37  ;;  %4316 = vmatprep.mubr.bf16.mxu1 %v3388_v28  ;;  %v3376_v15 = vadd.f32 %v4159_v43, %v3360_v4 }
 0x4b3   : > { %v4647_v56 = vpop.eup %4646  ;;  %4658 = vrcp.f32 %v3320_v47  ;;  %v3323_v12 = vadd.f32 1.0, %v4645_v52  ;;  %4317 = vmatmul.mubr.bf16.vlgmr.msra.gmra.mxu1 %v3389_v1 }
 0x4b4   : > { %v4649_v34 = vpop.eup %4648  ;;  %v3361_v33 = vmul.f32 %v4647_v56, %v7166_v50  ;;  %4660 = vrcp.f32 %v3322_v32  ;;  %v3379_v11 = vadd.f32 %v4164_v59, %v3363_v20 }
 0x4b5   : > { %4662 = vrcp.f32 %v3323_v12  ;;  %v3321_v2 = vadd.f32 1.0, %v4649_v34 }
 0x4b6   : > { %v3377_v37 = vadd.f32 %v4160_v53, %v3361_v33  ;;  %v3391_v62 = vpack.c.bf16 %v3379_v11, %v3378_v40 }
 0x4b7   : > { %4664 = vrcp.f32 %v3321_v2 }
 0x4b8   : > { %v4651_v13 = vpop.eup %4650  ;;  %v3390_v18 = vpack.c.bf16 %v3377_v37, %v3376_v15 }
 0x4b9   : > { %v4653_v48 = vpop.eup %4652  ;;  %v3364_v50 = vmul.f32 %v4651_v13, %v7172_v31 }
 0x4ba   : > { %v4655_v6 = vpop.eup %4654  ;;  %4320 = vmatprep.mubr.bf16.mxu1 %v3390_v18  ;;  %v3366_v51 = vmul.f32 %v4653_v48, %v7169_v42  ;;  %v4176_v42 = vunpack.c.h.bf16 %v4186_v26 }
 0x4bb   : > { %v3367_v17 = vmul.f32 %v4655_v6, %v7175_v57  ;;  %4321 = vmatmul.mubr.bf16.gmra.mxu1 %v3391_v62  ;;  %v3380_v58 = vadd.f32 %v4167_v10, %v3364_v50 }
 0x4bc   : > { %v4657_v38 = vpop.eup %4656  ;;  %v3382_v55 = vadd.f32 %v4171_v8, %v3366_v51 }
 0x4bd   : > { %v3365_v49 = vmul.f32 %v4657_v38, %v7178_v44  ;;  %v3383_v27 = vadd.f32 %v4172_v3, %v3367_v17 }
 0x4bf   : > { %v3381_v21 = vadd.f32 %v4168_v14, %v3365_v49  ;;  %v3393_v57 = vpack.c.bf16 %v3383_v27, %v3382_v55 }
 0x4c0   : > { %v4659_v36 = vpop.eup %4658 }
 0x4c1   : > { %v4661_v23 = vpop.eup %4660  ;;  %v3392_v63 = vpack.c.bf16 %v3381_v21, %v3380_v58  ;;  %v3368_v19 = vmul.f32 %v4659_v36, %v7184_v7  ;;  %v7220_v7 = vld [vmem:[%s7403_s9] ss:$0 sm:$0xff] }
 0x4c2   : > { %v4663_v31 = vpop.eup %4662  ;;  %v3370_v35 = vmul.f32 %v4661_v23, %v7181_v25 }
 0x4c3   : > { %v3371_v46 = vmul.f32 %v4663_v31, %v7187_v54  ;;  %4324 = vmatprep.mubr.bf16.mxu1 %v3392_v63  ;;  %v3384_v45 = vadd.f32 %v4175_v39, %v3368_v19 }
 0x4c4   : > { %v4665_v44 = vpop.eup %4664  ;;  %4325 = vmatmul.mubr.bf16.gmra.mxu1 %v3393_v57  ;;  %v3386_v28 = vadd.f32 %v4179_v60, %v3370_v35 }
 0x4c5   : > { %v3369_v16 = vmul.f32 %v4665_v44, %v7190_v61  ;;  %v3387_v22 = vadd.f32 %v4180_v9, %v3371_v46 }
 0x4c7   : > { %v3385_v32 = vadd.f32 %v4176_v42, %v3369_v16  ;;  %v3395_v59 = vpack.c.bf16 %v3387_v22, %v3386_v28 }
 0x4c9   : > { %v3394_v30 = vpack.c.bf16 %v3385_v32, %v3384_v45 }
 0x4cb   : > { %4328 = vmatprep.mubr.bf16.mxu1 %v3394_v30 }
 0x4cc   : > { %4329 = vmatmul.mubr.bf16.gmra.mxu1 %v3395_v59 }
 0x573   : > { %v4318_v54 = vpop.f32.mrf.mxu1 }
 0x574   : > { %v7223_v47 = vadd.f32 %v4318_v54, %v7220_v7 }
 0x575   : > { %v3501_v25 = vpop.f32.mrf.mxu1 }
 0x576   : > { %v4132_v61 = vmul.f32 -1.442695, %v7223_v47  ;;  %v7227_v1 = vadd.f32 %v7220_v7, %v3501_v25 }
 0x577   : > { %v4319_v52 = vpop.f32.mrf.mxu1 }
 0x578   : > { %4666 = vpow2.f32 %v4132_v61  ;;  %v4130_v43 = vmul.f32 -1.442695, %v7227_v1  ;;  %v7231_v4 = vadd.f32 %v4319_v52, %v7220_v7  ;;  %v7289_v61 = vld [vmem:[%s7404_s10] ss:$0 sm:$0xff] }
 0x579   : > { %v3504_v20 = vpop.f32.mrf.mxu1 }
 0x57a   : > { %4668 = vpow2.f32 %v4130_v43  ;;  %v4133_v53 = vmul.f32 -1.442695, %v7231_v4  ;;  %v7235_v56 = vadd.f32 %v7220_v7, %v3504_v20 }
 0x57b   : > { %v4322_v0 = vpop.f32.mrf.mxu1 }
 0x57c   : > { %4670 = vpow2.f32 %v4133_v53  ;;  %v4131_v29 = vmul.f32 -1.442695, %v7235_v56  ;;  %v7239_v12 = vadd.f32 %v4322_v0, %v7220_v7 }
 0x57d   : > { %v3517_v34 = vpop.f32.mrf.mxu1 }
 0x57e   : > { %4672 = vpow2.f32 %v4131_v29  ;;  %v4136_v33 = vmul.f32 -1.442695, %v7239_v12  ;;  %v7243_v11 = vadd.f32 %v7220_v7, %v3517_v34 }
 0x57f   : > { %v4323_v2 = vpop.f32.mrf.mxu1 }
 0x580   : > { %4674 = vpow2.f32 %v4136_v33  ;;  %v4134_v15 = vmul.f32 -1.442695, %v7243_v11  ;;  %v7247_v37 = vadd.f32 %v4323_v2, %v7220_v7 }
 0x581   : > { %v3520_v40 = vpop.f32.mrf.mxu1 }
 0x582   : > { %4676 = vpow2.f32 %v4134_v15  ;;  %v4137_v13 = vmul.f32 -1.442695, %v7247_v37  ;;  %v7251_v5 = vadd.f32 %v7220_v7, %v3520_v40 }
 0x584   : > { %4678 = vpow2.f32 %v4137_v13  ;;  %v4135_v18 = vmul.f32 -1.442695, %v7251_v5  ;;  %v4326_v48 = vpop.f32.mrf.mxu1 }
 0x585   : > { %v4667_v41 = vpop.eup %4666  ;;  %v7255_v62 = vadd.f32 %v4326_v48, %v7220_v7 }
 0x586   : > { %v3614_v6 = vadd.f32 1.0, %v4667_v41  ;;  %4680 = vpow2.f32 %v4135_v18  ;;  %v3533_v3 = vpop.f32.mrf.mxu1 }
 0x587   : > { %v4669_v10 = vpop.eup %4668  ;;  %v4140_v50 = vmul.f32 -1.442695, %v7255_v62  ;;  %v7259_v17 = vadd.f32 %v7220_v7, %v3533_v3 }
 0x588   : > { %4682 = vrcp.f32 %v3614_v6  ;;  %v3612_v14 = vadd.f32 1.0, %v4669_v10  ;;  %v4327_v38 = vpop.f32.mrf.mxu1 }
 0x589   : > { %v4671_v8 = vpop.eup %4670  ;;  %4684 = vpow2.f32 %v4140_v50  ;;  %v4138_v51 = vmul.f32 -1.442695, %v7259_v17  ;;  %v7263_v49 = vadd.f32 %v4327_v38, %v7220_v7 }
 0x58a   : > { %4686 = vrcp.f32 %v3612_v14  ;;  %v3615_v27 = vadd.f32 1.0, %v4671_v8  ;;  %v3536_v58 = vpop.f32.mrf.mxu1 }
 0x58b   : > { %v4673_v21 = vpop.eup %4672  ;;  %4688 = vpow2.f32 %v4138_v51  ;;  %v4141_v36 = vmul.f32 -1.442695, %v7263_v49  ;;  %v7267_v55 = vadd.f32 %v7220_v7, %v3536_v58 }
 0x58c   : > { %4690 = vrcp.f32 %v3615_v27  ;;  %v3613_v26 = vadd.f32 1.0, %v4673_v21  ;;  %v4330_v23 = vpop.f32.mrf.mxu1 }
 0x58d   : > { %v4675_v24 = vpop.eup %4674  ;;  %4692 = vpow2.f32 %v4141_v36  ;;  %v4139_v63 = vmul.f32 -1.442695, %v7267_v55  ;;  %v7271_v31 = vadd.f32 %v4330_v23, %v7220_v7 }
 0x58e   : > { %4694 = vrcp.f32 %v3613_v26  ;;  %v3618_v9 = vadd.f32 1.0, %v4675_v24  ;;  %v3549_v57 = vpop.f32.mrf.mxu1 }
 0x58f   : > { %v4677_v39 = vpop.eup %4676  ;;  %4696 = vpow2.f32 %v4139_v63  ;;  %v4144_v19 = vmul.f32 -1.442695, %v7271_v31  ;;  %v7275_v46 = vadd.f32 %v7220_v7, %v3549_v57 }
 0x590   : > { %4698 = vrcp.f32 %v3618_v9  ;;  %v3616_v42 = vadd.f32 1.0, %v4677_v39  ;;  %v4331_v44 = vpop.f32.mrf.mxu1 }
 0x591   : > { %v4679_v60 = vpop.eup %4678  ;;  %4700 = vpow2.f32 %v4144_v19  ;;  %v4142_v35 = vmul.f32 -1.442695, %v7275_v46  ;;  %v7279_v16 = vadd.f32 %v4331_v44, %v7220_v7 }
 0x592   : > { %4702 = vrcp.f32 %v3616_v42  ;;  %v3619_v22 = vadd.f32 1.0, %v4679_v60  ;;  %v3552_v45 = vpop.f32.mrf.mxu1 }
 0x593   : > { %v4681_v32 = vpop.eup %4680  ;;  %4704 = vpow2.f32 %v4142_v35  ;;  %v4145_v28 = vmul.f32 -1.442695, %v7279_v16  ;;  %v7283_v30 = vadd.f32 %v7220_v7, %v3552_v45 }
 0x594   : > { %4706 = vrcp.f32 %v3619_v22  ;;  %v3617_v59 = vadd.f32 1.0, %v4681_v32 }
 0x595   : > { %v4683_v54 = vpop.eup %4682  ;;  %4708 = vpow2.f32 %v4145_v28  ;;  %v4143_v25 = vmul.f32 -1.442695, %v7283_v30 }
 0x596   : > { %v4685_v52 = vpop.eup %4684  ;;  %v3662_v43 = vmul.f32 %v4683_v54, %v7223_v47  ;;  %4710 = vrcp.f32 %v3617_v59 }
 0x597   : > { %v4687_v20 = vpop.eup %4686  ;;  %v3622_v53 = vadd.f32 1.0, %v4685_v52  ;;  %4712 = vpow2.f32 %v4143_v25 }
 0x598   : > { %v4689_v7 = vpop.eup %4688  ;;  %v3660_v0 = vmul.f32 %v4687_v20, %v7227_v1  ;;  %v3685_v29 = vmul.f32 %v7289_v61, %v3662_v43 }
 0x599   : > { %v4691_v34 = vpop.eup %4690  ;;  %4714 = vrcp.f32 %v3622_v53  ;;  %v3620_v33 = vadd.f32 1.0, %v4689_v7  ;;  %v3765_v53 = vld [vmem:[%s4900_s21 + $0x70] sm:$0xff]  ;;  %v3772_v7 = vpop.permute.xlu1 %3771 }
 0x59a   : > { %v4693_v2 = vpop.eup %4692  ;;  %v3663_v15 = vmul.f32 %v4691_v34, %v7231_v4  ;;  %3703 = vadd.xlane.f32.xlu1 %v3685_v29  ;;  %v3683_v40 = vmul.f32 %v7289_v61, %v3660_v0  ;;  %v3769_v29 = vpop.permute.xlu0 %3768 }
 0x59b   : > { %v4695_v13 = vpop.eup %4694  ;;  %4716 = vrcp.f32 %v3620_v33  ;;  %v3623_v47 = vadd.f32 1.0, %v4693_v2 }
 0x59c   : > { %v4697_v18 = vpop.eup %4696  ;;  %v3661_v48 = vmul.f32 %v4695_v13, %v7235_v56  ;;  %3699 = vadd.xlane.f32.xlu0 %v3683_v40  ;;  %v3686_v1 = vmul.f32 %v7289_v61, %v3663_v15 }
 0x59d   : > { %v4699_v41 = vpop.eup %4698  ;;  %4718 = vrcp.f32 %v3623_v47  ;;  %v3621_v6 = vadd.f32 1.0, %v4697_v18 }
 0x59e   : > { %v4701_v3 = vpop.eup %4700  ;;  %v3666_v10 = vmul.f32 %v4699_v41, %v7239_v12  ;;  %3705 = vadd.xlane.f32.xlu1 %v3686_v1  ;;  %v3684_v4 = vmul.f32 %v7289_v61, %v3661_v48  ;;  %v3775_v33 = vpop.permute.xlu0 %3774  ;;  %v7852_v41 = vlaneseq }
 0x59f   : > { %v4703_v50 = vpop.eup %4702  ;;  %4720 = vrcp.f32 %v3621_v6  ;;  %v3626_v14 = vadd.f32 1.0, %v4701_v3  ;;  %v7336_v3 = vstv %s3731_s13 }
 0x5a0   : > { %v4705_v38 = vpop.eup %4704  ;;  %v3664_v8 = vmul.f32 %v4703_v50, %v7243_v11  ;;  %3701 = vadd.xlane.f32.xlu0 %v3684_v4  ;;  %v3689_v56 = vmul.f32 %v7289_v61, %v3666_v10  ;;  %v7334_v6 = vand.u32 127, %v7852_v41 }
 0x5a1   : > { %v4707_v51 = vpop.eup %4706  ;;  %4722 = vrcp.f32 %v3626_v14  ;;  %v3624_v27 = vadd.f32 1.0, %v4705_v38 }
 0x5a2   : > { %v4709_v58 = vpop.eup %4708  ;;  %v3667_v21 = vmul.f32 %v4707_v51, %v7247_v37  ;;  %3711 = vadd.xlane.f32.xlu1 %v3689_v56  ;;  %v3687_v12 = vmul.f32 %v7289_v61, %v3664_v8  ;;  %v3781_v2 = vpop.permute.xlu0 %3780  ;;  %vm3816_vm8 = vcmp.eq.s32.totalorder %v3772_v7, %v7334_v6  ;;  %vm3815_vm7 = vcmp.eq.s32.totalorder %v3769_v29, %v7334_v6 }
 0x5a3   : > { %v4711_v36 = vpop.eup %4710  ;;  %4724 = vrcp.f32 %v3624_v27  ;;  %v3627_v26 = vadd.f32 1.0, %v4709_v58  ;;  %vm3817_vm11 = vcmp.eq.s32.totalorder %v3775_v33, %v7334_v6  ;;  %vm3819_vm3 = vcmp.eq.s32.totalorder %v3781_v2, %v7334_v6 }
 0x5a4   : > { %v4713_v23 = vpop.eup %4712  ;;  %v3665_v24 = vmul.f32 %v4711_v36, %v7251_v5  ;;  %3707 = vadd.xlane.f32.xlu0 %v3687_v12  ;;  %v3690_v57 = vmul.f32 %v7289_v61, %v3667_v21 }
 0x5a5   : > { %4726 = vrcp.f32 %v3627_v26  ;;  %v3625_v11 = vadd.f32 1.0, %v4713_v23 }
 0x5a6   : > { %v4715_v63 = vpop.eup %4714  ;;  %v3688_v9 = vmul.f32 %v7289_v61, %v3665_v24  ;;  %v3787_v40 = vpop.permute.xlu0 %3786 }
 0x5a7   : > { %v3670_v39 = vmul.f32 %v4715_v63, %v7255_v62  ;;  %4728 = vrcp.f32 %v3625_v11  ;;  %vm3821_vm0 = vcmp.eq.s32.totalorder %v3787_v40, %v7334_v6 }
 0x5a8   : > { %v4717_v37 = vpop.eup %4716  ;;  %3709 = vadd.xlane.f32.xlu1 %v3688_v9  ;;  %3713 = vadd.xlane.f32.xlu0 %v3690_v57 }
 0x5a9   : > { %v3668_v42 = vmul.f32 %v4717_v37, %v7259_v17  ;;  %v3693_v44 = vmul.f32 %v7289_v61, %v3670_v39 }
 0x5aa   : > { %v4719_v19 = vpop.eup %4718 }
 0x5ab   : > { %v3671_v5 = vmul.f32 %v4719_v19, %v7263_v49  ;;  %v3691_v62 = vmul.f32 %v7289_v61, %v3668_v42 }
 0x5ac   : > { %v4721_v60 = vpop.eup %4720  ;;  %3719 = vadd.xlane.f32.xlu1 %v3693_v44 }
 0x5ad   : > { %v3669_v35 = vmul.f32 %v4721_v60, %v7267_v55  ;;  %v3694_v22 = vmul.f32 %v7289_v61, %v3671_v5 }
 0x5ae   : > { %v4723_v45 = vpop.eup %4722 }
 0x5af   : > { %v3674_v32 = vmul.f32 %v4723_v45, %v7271_v31  ;;  %3721 = vadd.xlane.f32.xlu0 %v3694_v22  ;;  %v3692_v17 = vmul.f32 %v7289_v61, %v3669_v35 }
 0x5b0   : > { %v4725_v28 = vpop.eup %4724  ;;  %3715 = vadd.xlane.f32.xlu1 %v3691_v62 }
 0x5b1   : > { %v3672_v49 = vmul.f32 %v4725_v28, %v7275_v46  ;;  %v3697_v54 = vmul.f32 %v7289_v61, %v3674_v32  ;;  %v3766_v46 = vld [vmem:[%s4900_s21 + $0x78] sm:$0xff] }
 0x5b2   : > { %v4727_v59 = vpop.eup %4726 }
 0x5b3   : > { %v3675_v55 = vmul.f32 %v4727_v59, %v7279_v16  ;;  %3717 = vadd.xlane.f32.xlu0 %v3692_v17  ;;  %v3695_v43 = vmul.f32 %v7289_v61, %v3672_v49  ;;  %v3778_v16 = vpop.permute.xlu1 %3777 }
 0x5b4   : > { %v4729_v25 = vpop.eup %4728  ;;  %3727 = vadd.xlane.f32.xlu1 %v3697_v54  ;;  %vm3818_vm10 = vcmp.eq.s32.totalorder %v3778_v16, %v7334_v6 }
 0x5b5   : > { %v3673_v52 = vmul.f32 %v4729_v25, %v7283_v30  ;;  %v3698_v31 = vmul.f32 %v7289_v61, %v3675_v55 }
 0x5b7   : > { %3729 = vadd.xlane.f32.xlu0 %v3698_v31  ;;  %v3696_v20 = vmul.f32 %v7289_v61, %v3673_v52  ;;  %v3784_v0 = vpop.permute.xlu1 %3783  ;;  %v3793_v61 = vpop.permute.xlu0 %3792 }
 0x5b8   : > { %3723 = vadd.xlane.f32.xlu1 %v3695_v43  ;;  %vm3820_vm12 = vcmp.eq.s32.totalorder %v3784_v0, %v7334_v6  ;;  %vm3823_vm14 = vcmp.eq.s32.totalorder %v3793_v61, %v7334_v6 }
 0x5bb   : > { %3725 = vadd.xlane.f32.xlu0 %v3696_v20  ;;  %v3790_v34 = vpop.permute.xlu1 %3789  ;;  %v3799_v18 = vpop.permute.xlu0 %3798 }
 0x5bc   : > { %vm3822_vm5 = vcmp.eq.s32.totalorder %v3790_v34, %v7334_v6  ;;  %vm3825_vm4 = vcmp.eq.s32.totalorder %v3799_v18, %v7334_v6 }
 0x5bf   : > { %v7325_v30 = vpop.permute.xlu1 %3795 }
 0x5c0   : > { %vm3824_vm2 = vcmp.eq.s32.totalorder %v7325_v30, %v7334_v6 }
 0x5c3   : > { %v7327_v15 = vpop.permute.xlu1 %3801 }
 0x5c4   : > { %vm3826_vm15 = vcmp.eq.s32.totalorder %v7327_v15, %v7334_v6 }
 0x5c7   : > { %v7329_v13 = vpop.permute.xlu1 %3804 }
 0x5c8   : > { %vm3827_vm6 = vcmp.eq.s32.totalorder %v7329_v13, %v7334_v6 }
 0x5c9   : > { %3810 = vperm.xlu1 %4585, %v3765_v53  }
 0x5cb   : > { %v7331_v47 = vpop.permute.xlu1 %3807 }
 0x5cc   : > { %vm3828_vm9 = vcmp.eq.s32.totalorder %v7331_v47, %v7334_v6 }
 0x5d1   : > { %3813 = vperm.xlu0 %4584, %v3766_v46  }
 0x623   : > { %v3704_v48 = vpop.xlane.xlu1 %3703 }
 0x624   : > { %v3735_v14 = vadd.f32 %v7336_v3, %v3704_v48 }
 0x625   : > { %v3700_v1 = vpop.xlane.xlu0 %3699 }
 0x626   : > { %v3733_v4 = vadd.f32 %v7336_v3, %v3700_v1  ;;  %v3833_v12 = vsel %vm3817_vm11, %v3735_v14, 0.0 }
 0x627   : > { %v3706_v10 = vpop.xlane.xlu1 %3705 }
 0x628   : > { %v3831_v8 = vsel %vm3815_vm7, %v3733_v4, 0.0  ;;  %v3736_v56 = vadd.f32 %v7336_v3, %v3706_v10 }
 0x629   : > { %v3702_v50 = vpop.xlane.xlu0 %3701 }
 0x62a   : > { %v3734_v38 = vadd.f32 %v7336_v3, %v3702_v50  ;;  %v3834_v23 = vsel %vm3818_vm10, %v3736_v56, 0.0 }
 0x62b   : > { %v3712_v58 = vpop.xlane.xlu1 %3711 }
 0x62c   : > { %v3832_v51 = vsel %vm3816_vm8, %v3734_v38, 0.0  ;;  %v3739_v63 = vadd.f32 %v7336_v3, %v3712_v58 }
 0x62d   : > { %v3847_v27 = vadd.f32 %v3832_v51, %v3831_v8  ;;  %v3708_v21 = vpop.xlane.xlu0 %3707 }
 0x62e   : > { %v3737_v36 = vadd.f32 %v7336_v3, %v3708_v21  ;;  %v3837_v5 = vsel %vm3821_vm0, %v3739_v63, 0.0 }
 0x62f   : > { %v3848_v26 = vadd.f32 %v3847_v27, %v3833_v12 }
 0x630   : > { %v3835_v9 = vsel %vm3819_vm3, %v3737_v36, 0.0 }
 0x631   : > { %v3849_v24 = vadd.f32 %v3848_v26, %v3834_v23  ;;  %v3710_v11 = vpop.xlane.xlu1 %3709  ;;  %v3714_v37 = vpop.xlane.xlu0 %3713 }
 0x632   : > { %v3738_v57 = vadd.f32 %v7336_v3, %v3710_v11  ;;  %v3740_v60 = vadd.f32 %v7336_v3, %v3714_v37 }
 0x633   : > { %v3850_v39 = vadd.f32 %v3849_v24, %v3835_v9 }
 0x634   : > { %v3836_v19 = vsel %vm3820_vm12, %v3738_v57, 0.0  ;;  %v3838_v62 = vsel %vm3822_vm5, %v3740_v60, 0.0 }
 0x635   : > { %v3851_v42 = vadd.f32 %v3850_v39, %v3836_v19  ;;  %v3720_v44 = vpop.xlane.xlu1 %3719 }
 0x636   : > { %v3743_v49 = vadd.f32 %v7336_v3, %v3720_v44 }
 0x637   : > { %v3852_v35 = vadd.f32 %v3851_v42, %v3837_v5 }
 0x638   : > { %v3722_v22 = vpop.xlane.xlu0 %3721  ;;  %v3841_v53 = vsel %vm3825_vm4, %v3743_v49, 0.0 }
 0x639   : > { %v3716_v45 = vpop.xlane.xlu1 %3715  ;;  %v3853_v28 = vadd.f32 %v3852_v35, %v3838_v62  ;;  %v3744_v52 = vadd.f32 %v7336_v3, %v3722_v22 }
 0x63a   : > { %v3741_v32 = vadd.f32 %v7336_v3, %v3716_v45 }
 0x63b   : > { %v3842_v0 = vsel %vm3826_vm15, %v3744_v52, 0.0 }
 0x63c   : > { %v3839_v17 = vsel %vm3823_vm14, %v3741_v32, 0.0  ;;  %v3718_v59 = vpop.xlane.xlu0 %3717 }
 0x63d   : > { %v3854_v54 = vadd.f32 %v3853_v28, %v3839_v17  ;;  %v3742_v55 = vadd.f32 %v7336_v3, %v3718_v59  ;;  %v3728_v25 = vpop.xlane.xlu1 %3727 }
 0x63e   : > { %v3747_v15 = vadd.f32 %v7336_v3, %v3728_v25 }
 0x63f   : > { %v3840_v31 = vsel %vm3824_vm2, %v3742_v55, 0.0 }
 0x640   : > { %v3855_v43 = vadd.f32 %v3854_v54, %v3840_v31  ;;  %v3730_v20 = vpop.xlane.xlu0 %3729 }
 0x641   : > { %v3724_v46 = vpop.xlane.xlu1 %3723  ;;  %v3748_v13 = vadd.f32 %v7336_v3, %v3730_v20 }
 0x642   : > { %v3856_v7 = vadd.f32 %v3855_v43, %v3841_v53  ;;  %v3745_v16 = vadd.f32 %v7336_v3, %v3724_v46 }
 0x644   : > { %v3857_v29 = vadd.f32 %v3856_v7, %v3842_v0  ;;  %v3843_v34 = vsel %vm3827_vm6, %v3745_v16, 0.0  ;;  %v3726_v33 = vpop.xlane.xlu0 %3725 }
 0x645   : > { %v3746_v30 = vadd.f32 %v7336_v3, %v3726_v33  ;;  %v3811_v2 = vpop.permute.xlu1 %3810 }
 0x646   : > { %v3858_v40 = vadd.f32 %v3857_v29, %v3843_v34  ;;  %vm3829_vm1 = vcmp.eq.s32.totalorder %v3811_v2, %v7334_v6 }
 0x647   : > { %v3844_v61 = vsel %vm3828_vm9, %v3746_v30, 0.0  ;;  %v3845_v48 = vsel %vm3829_vm1, %v3747_v15, 0.0 }
 0x648   : > { %v3859_v18 = vadd.f32 %v3858_v40, %v3844_v61 }
 0x64a   : > { %v3860_v41 = vadd.f32 %v3859_v18, %v3845_v48 }
 0x64c   : > { %v3814_v1 = vpop.permute.xlu0 %3813 }
 0x64d   : > { %vm3830_vm13 = vcmp.eq.s32.totalorder %v3814_v1, %v7334_v6 }
 0x64e   : > { %v3846_v10 = vsel %vm3830_vm13, %v3748_v13, 0.0 }
 0x64f   : > { %v3861_v4 = vadd.f32 %v3860_v41, %v3846_v10 }
 0x651   : > { %v3862_v50 = vrot.slane %v3861_v4, 4 }
 0x653   : > { %v3863_v14 = vadd.f32 %v3862_v50, %v3861_v4 }
 0x655   : > { %v3864_v47 = vrot.slane %v3863_v14, 2 }
 0x657   : > { %v3865_v38 = vadd.f32 %v3864_v47, %v3863_v14 }
 0x659   : > { %v3866_v8 = vrot.slane %v3865_v38, 1 }
 0x65b   : > { %v3867_v56 = vadd.f32 %v3866_v8, %v3865_v38 }
 0x65d   : > { %3868 = vst [vmem:[%s494_s25] sm:$0x1] %v3867_v56 }
 0x65e PF: > { %s22_s23 = sadd.s32 1, %s4768_s23   ;;  %s7853_s19 = sld [smem:[#allocation4_spill]] }
 0x65f   : > { %p19_p11 = scmp.ge.s32.totalorder %s22_s23, 6   ;;  %s7854_s20 = sld [smem:[#allocation5_spill]] }
 0x660   : > { %s7855_s21 = sld [smem:[#allocation6_spill]] }
 0x661   : > { %s7856_s22 = sld [smem:[#allocation7_spill]]  ;;  %21 = sbr.rel (!%p19_p11) target bundleno = 4 (0x4), region = 117 }

</bundles_post_ra>
